<compile_context>
chip_gen: v7x
topology: tpu7x:2x2x1
jax: 0.10.0
libtpu: 0.0.40
codegen_flags: <defaults>
</compile_context>

<pallas_src>
import functools

import jax
import jax.numpy as jnp
from jax.experimental import pallas as pl
from jax.experimental.pallas import tpu as pltpu

_LANE = 128
_SUBLANE = 8


def _round_up(x, m):
    return ((x + m - 1) // m) * m


def _mlp_kernel(x_ref, w1_ref, b1_ref, w2_ref, b2_ref, w3_ref, b3_ref, o_ref):
    # bf16 operands on the MXU, f32 accumulation; bias/ReLU math in f32.
    h1 = jnp.dot(x_ref[...], w1_ref[...], preferred_element_type=jnp.float32)
    h1 = jnp.maximum(h1 + b1_ref[...], 0.0)
    h2 = jnp.dot(h1.astype(jnp.bfloat16), w2_ref[...],
                 preferred_element_type=jnp.float32)
    h2 = jnp.maximum(h2 + b2_ref[...], 0.0)
    q = jnp.dot(h2.astype(jnp.bfloat16), w3_ref[...],
                preferred_element_type=jnp.float32)
    o_ref[...] = (q + b3_ref[...]).astype(o_ref.dtype)


def init_dqn_params(key, num_inputs, num_actions, hidden=1024):
    """PyTorch nn.Linear default init: U(-1/sqrt(fan_in), 1/sqrt(fan_in)).
    Weights stored as (in_features, out_features) (transposed vs torch)."""
    dims = [(num_inputs, hidden), (hidden, hidden), (hidden, num_actions)]
    params = []
    for fan_in, fan_out in dims:
        key, kw, kb = jax.random.split(key, 3)
        bound = 1.0 / (fan_in ** 0.5)
        w = jax.random.uniform(kw, (fan_in, fan_out), jnp.float32, -bound, bound)
        b = jax.random.uniform(kb, (fan_out,), jnp.float32, -bound, bound)
        params.extend([w, b])
    return tuple(params)


def prepare_dqn_params(params):
    """One-time (outside jit): pad feature/action dims to lane multiples and
    cast weights to bf16.  Zero padding is exact (padded input columns hit
    zero weight rows; padded action columns are sliced off after the kernel)."""
    w1, b1, w2, b2, w3, b3 = params
    D, H = w1.shape
    A = w3.shape[1]
    Dp = _round_up(D, _LANE)
    Ap = _round_up(A, _LANE)

    w1_p = jnp.zeros((Dp, H), jnp.bfloat16).at[:D, :].set(w1.astype(jnp.bfloat16))
    w2_p = w2.astype(jnp.bfloat16)
    w3_p = jnp.zeros((H, Ap), jnp.bfloat16).at[:, :A].set(w3.astype(jnp.bfloat16))
    b1_p = b1.reshape(1, H).astype(jnp.float32)
    b2_p = b2.reshape(1, H).astype(jnp.float32)
    b3_p = jnp.zeros((1, Ap), jnp.float32).at[:, :A].set(b3.astype(jnp.float32))
    return (w1_p, b1_p, w2_p, b2_p, w3_p, b3_p)


def _device_kind():
    try:
        return jax.devices()[0].device_kind.lower()
    except Exception:  # pragma: no cover - CPU/interpret fallback
        return ""


def _pick_batch_tile(B):
    """Rows per grid step (trace-time Python).  Multiple of 8; generation
    aware: v5e -> 128-row MXU granularity, v6e -> up to 512-row tiles,
    v7x -> always >=2 grid steps for medium batches (dual-TC sharding)."""
    kind = _device_kind()
    is_v5 = "v5" in kind
    is_v7 = "v7" in kind

    if is_v5:
        max_tile, gran = 256, 128     # 4x128^2 MXU
    elif is_v7:
        max_tile, gran = 256, 256     # keep tiles modest; 64 MiB VMEM, 2 TCs
    else:                             # v6e and default
        max_tile, gran = 512, 256     # 2x256^2 MXU

    Bp8 = _round_up(max(B, 1), _SUBLANE)
    if Bp8 <= max_tile:
        # v7x: split medium batches into two grid steps so the 'parallel'
        # batch axis shards across both TensorCores.
        if is_v7 and Bp8 >= 16:
            return _round_up(pl.cdiv(Bp8, 2), _SUBLANE)
        return Bp8
    n_steps = pl.cdiv(Bp8, max_tile)
    return min(_round_up(pl.cdiv(Bp8, n_steps), gran), max_tile)


@functools.partial(jax.jit, static_argnames=("num_actions",))
def dqn_forward(x, prepared_params, *, num_actions):
    """x: (B, num_inputs) float32 -> (B, num_actions) float32."""
    w1_p, b1_p, w2_p, b2_p, w3_p, b3_p = prepared_params
    B, D = x.shape
    Dp, H = w1_p.shape
    Ap = w3_p.shape[1]

    tile_b = _pick_batch_tile(B)
    grid = (pl.cdiv(B, tile_b),)

    # Cast to bf16 first, pad only the feature dim (no batch pad).
    x_bf = x.astype(jnp.bfloat16)
    if Dp != D:
        x_bf = jnp.pad(x_bf, ((0, 0), (0, Dp - D)))

    # VMEM budget: double-buffered inputs/outputs + in-kernel activations + margin.
    weight_bytes = (Dp * H + H * H + H * Ap) * 2              # bf16
    bias_bytes = (2 * H + Ap) * 4                             # f32
    io_bytes = tile_b * (Dp * 2 + Ap * 4)                     # bf16 in, f32 out
    act_bytes = tile_b * H * (4 + 2) * 2                      # h1/h2 f32 + bf16 casts
    vmem_limit = max(2 * (weight_bytes + bias_bytes + io_bytes) + act_bytes
                     + (8 << 20), 16 << 20)

    out = pl.pallas_call(
        _mlp_kernel,
        out_shape=jax.ShapeDtypeStruct((B, Ap), jnp.float32),
        grid_spec=pl.GridSpec(
            grid=grid,
            in_specs=[
                pl.BlockSpec((tile_b, Dp), lambda i: (i, 0)),   # x tile (bf16)
                pl.BlockSpec((Dp, H), lambda i: (0, 0)),        # w1 (bf16)
                pl.BlockSpec((1, H), lambda i: (0, 0)),         # b1 (f32)
                pl.BlockSpec((H, H), lambda i: (0, 0)),         # w2 (bf16)
                pl.BlockSpec((1, H), lambda i: (0, 0)),         # b2 (f32)
                pl.BlockSpec((H, Ap), lambda i: (0, 0)),        # w3 (bf16)
                pl.BlockSpec((1, Ap), lambda i: (0, 0)),        # b3 (f32)
            ],
            out_specs=pl.BlockSpec((tile_b, Ap), lambda i: (i, 0)),
        ),
        compiler_params=pltpu.CompilerParams(
            dimension_semantics=("parallel",),
            vmem_limit_bytes=int(vmem_limit),
        ),
    )(x_bf, w1_p, b1_p, w2_p, b2_p, w3_p, b3_p)

    return out[:, :num_actions]


def dqn_forward_ref(x, params, compute_dtype=jnp.float32):
    """Pure-JAX reference (same math as kernel when compute_dtype=bf16)."""
    w1, b1, w2, b2, w3, b3 = params

    def lin(h, w, b):
        return jnp.dot(h.astype(compute_dtype), w.astype(compute_dtype),
                       preferred_element_type=jnp.float32) + b

    h1 = jnp.maximum(lin(x, w1, b1), 0.0)
    h2 = jnp.maximum(lin(h1, w2, b2), 0.0)
    return lin(h2, w3, b3)


if __name__ == "__main__":
    # TODO(synk): get_action's epsilon-greedy host-side randomness is not a
    # kernel; argmax over the returned Q-values covers the greedy branch.
    key = jax.random.PRNGKey(0)
    num_inputs, num_actions, batch = 32, 6, 2

    kx, kp = jax.random.split(key)
    x = jax.random.normal(kx, (batch, num_inputs), jnp.float32)
    params = init_dqn_params(kp, num_inputs, num_actions)
    prepared = prepare_dqn_params(params)

    q = dqn_forward(x, prepared, num_actions=num_actions)
    q = jax.block_until_ready(q)
    assert q.shape == (batch, num_actions), q.shape

    # Exact-math check (bf16 operands, f32 accumulation, same as kernel).
    q_bf16 = dqn_forward_ref(x, params, compute_dtype=jnp.bfloat16)
    err_bf16 = float(jnp.max(jnp.abs(q - q_bf16)))
    assert jnp.allclose(q, q_bf16, atol=5e-3, rtol=5e-3), err_bf16

    # Sanity vs. full-f32 reference (bf16 weights => small expected deviation).
    q_f32 = dqn_forward_ref(x, params, compute_dtype=jnp.float32)
    err_f32 = float(jnp.max(jnp.abs(q - q_f32)))
    assert jnp.allclose(q, q_f32, atol=5e-2, rtol=5e-2), err_f32

    print("KERNEL_OK")
</pallas_src>

<mosaic_0001>
module attributes {stable_mosaic.version = 11 : i64} {
  func.func @_mlp_kernel(%arg0: i32, %arg1: memref<8x128xbf16, #tpu.memory_space<vmem>>, %arg2: memref<128x1024xbf16, #tpu.memory_space<vmem>>, %arg3: memref<1x1024xf32, #tpu.memory_space<vmem>>, %arg4: memref<1024x1024xbf16, #tpu.memory_space<vmem>>, %arg5: memref<1x1024xf32, #tpu.memory_space<vmem>>, %arg6: memref<1024x128xbf16, #tpu.memory_space<vmem>>, %arg7: memref<1x128xf32, #tpu.memory_space<vmem>>, %arg8: memref<8x128xf32, #tpu.memory_space<vmem>>) attributes {dimension_semantics = [#tpu.dimension_semantics<parallel>], iteration_bounds = array<i64: 1>, scalar_prefetch = 0 : i64, scratch_operands = 0 : i64, tpu.core_type = #tpu.core_type<tc>, window_params = [{transform_indices = @transform_0, window_bounds = array<i64: 8, 128>}, {pipeline_mode = #tpu.pipeline_mode<synchronous>, transform_indices = @transform_1, window_bounds = array<i64: 128, 1024>}, {pipeline_mode = #tpu.pipeline_mode<synchronous>, transform_indices = @transform_2, window_bounds = array<i64: 1, 1024>}, {pipeline_mode = #tpu.pipeline_mode<synchronous>, transform_indices = @transform_3, window_bounds = array<i64: 1024, 1024>}, {pipeline_mode = #tpu.pipeline_mode<synchronous>, transform_indices = @transform_4, window_bounds = array<i64: 1, 1024>}, {pipeline_mode = #tpu.pipeline_mode<synchronous>, transform_indices = @transform_5, window_bounds = array<i64: 1024, 128>}, {pipeline_mode = #tpu.pipeline_mode<synchronous>, transform_indices = @transform_6, window_bounds = array<i64: 1, 128>}, {transform_indices = @transform_7, window_bounds = array<i64: 8, 128>}]} {
    %c0 = arith.constant 0 : index
    %c0_0 = arith.constant 0 : index
    %0 = vector.load %arg1[%c0, %c0_0] : memref<8x128xbf16, #tpu.memory_space<vmem>>, vector<8x128xbf16>
    %c0_1 = arith.constant 0 : index
    %c0_2 = arith.constant 0 : index
    %1 = vector.load %arg2[%c0_1, %c0_2] : memref<128x1024xbf16, #tpu.memory_space<vmem>>, vector<128x1024xbf16>
    %cst = arith.constant dense<0.000000e+00> : vector<8x1024xf32>
    %2 = tpu.matmul %0, %1, %cst {dimension_numbers = #tpu.dot_dimension_numbers<[1], [0], [0], [1], [0, 0, 1, 1], [], []>} : vector<8x128xbf16>, vector<128x1024xbf16>, vector<8x1024xf32> -> vector<8x1024xf32>
    %c0_3 = arith.constant 0 : index
    %c0_4 = arith.constant 0 : index
    %3 = vector.load %arg3[%c0_3, %c0_4] : memref<1x1024xf32, #tpu.memory_space<vmem>>, vector<1x1024xf32>
    %4 = vector.broadcast %3 : vector<1x1024xf32> to vector<8x1024xf32>
    %5 = arith.addf %2, %4 : vector<8x1024xf32>
    %cst_5 = arith.constant 0.000000e+00 : f32
    %6 = vector.broadcast %cst_5 : f32 to vector<8x1024xf32>
    %7 = arith.maximumf %5, %6 : vector<8x1024xf32>
    %8 = arith.truncf %7 : vector<8x1024xf32> to vector<8x1024xbf16>
    %c0_6 = arith.constant 0 : index
    %c0_7 = arith.constant 0 : index
    %9 = vector.load %arg4[%c0_6, %c0_7] : memref<1024x1024xbf16, #tpu.memory_space<vmem>>, vector<1024x1024xbf16>
    %cst_8 = arith.constant dense<0.000000e+00> : vector<8x1024xf32>
    %10 = tpu.matmul %8, %9, %cst_8 {dimension_numbers = #tpu.dot_dimension_numbers<[1], [0], [0], [1], [0, 0, 1, 1], [], []>} : vector<8x1024xbf16>, vector<1024x1024xbf16>, vector<8x1024xf32> -> vector<8x1024xf32>
    %c0_9 = arith.constant 0 : index
    %c0_10 = arith.constant 0 : index
    %11 = vector.load %arg5[%c0_9, %c0_10] : memref<1x1024xf32, #tpu.memory_space<vmem>>, vector<1x1024xf32>
    %12 = vector.broadcast %11 : vector<1x1024xf32> to vector<8x1024xf32>
    %13 = arith.addf %10, %12 : vector<8x1024xf32>
    %cst_11 = arith.constant 0.000000e+00 : f32
    %14 = vector.broadcast %cst_11 : f32 to vector<8x1024xf32>
    %15 = arith.maximumf %13, %14 : vector<8x1024xf32>
    %16 = arith.truncf %15 : vector<8x1024xf32> to vector<8x1024xbf16>
    %c0_12 = arith.constant 0 : index
    %c0_13 = arith.constant 0 : index
    %17 = vector.load %arg6[%c0_12, %c0_13] : memref<1024x128xbf16, #tpu.memory_space<vmem>>, vector<1024x128xbf16>
    %cst_14 = arith.constant dense<0.000000e+00> : vector<8x128xf32>
    %18 = tpu.matmul %16, %17, %cst_14 {dimension_numbers = #tpu.dot_dimension_numbers<[1], [0], [0], [1], [0, 0, 1, 1], [], []>} : vector<8x1024xbf16>, vector<1024x128xbf16>, vector<8x128xf32> -> vector<8x128xf32>
    %c0_15 = arith.constant 0 : index
    %c0_16 = arith.constant 0 : index
    %19 = vector.load %arg7[%c0_15, %c0_16] : memref<1x128xf32, #tpu.memory_space<vmem>>, vector<1x128xf32>
    %20 = vector.broadcast %19 : vector<1x128xf32> to vector<8x128xf32>
    %21 = arith.addf %18, %20 : vector<8x128xf32>
    %c0_17 = arith.constant 0 : index
    %c0_18 = arith.constant 0 : index
    %22 = vector.load %arg8[%c0_17, %c0_18] : memref<8x128xf32, #tpu.memory_space<vmem>>, vector<8x128xf32>
    tpu.vector_store %arg8[%c0_17, %c0_18], %21 {strides = array<i32>} : memref<8x128xf32, #tpu.memory_space<vmem>>, vector<8x128xf32>,
    return
  }
  func.func @transform_0(%arg0: i32) -> (i32, i32) {
    %c0_i32 = arith.constant 0 : i32
    %c0_i32_0 = arith.constant 0 : i32
    return %arg0, %c0_i32 : i32, i32
  }
  func.func @transform_1(%arg0: i32) -> (i32, i32) {
    %c0_i32 = arith.constant 0 : i32
    %c0_i32_0 = arith.constant 0 : i32
    %c0_i32_1 = arith.constant 0 : i32
    return %c0_i32, %c0_i32_0 : i32, i32
  }
  func.func @transform_2(%arg0: i32) -> (i32, i32) {
    %c0_i32 = arith.constant 0 : i32
    %c0_i32_0 = arith.constant 0 : i32
    %c0_i32_1 = arith.constant 0 : i32
    return %c0_i32, %c0_i32_0 : i32, i32
  }
  func.func @transform_3(%arg0: i32) -> (i32, i32) {
    %c0_i32 = arith.constant 0 : i32
    %c0_i32_0 = arith.constant 0 : i32
    %c0_i32_1 = arith.constant 0 : i32
    return %c0_i32, %c0_i32_0 : i32, i32
  }
  func.func @transform_4(%arg0: i32) -> (i32, i32) {
    %c0_i32 = arith.constant 0 : i32
    %c0_i32_0 = arith.constant 0 : i32
    %c0_i32_1 = arith.constant 0 : i32
    return %c0_i32, %c0_i32_0 : i32, i32
  }
  func.func @transform_5(%arg0: i32) -> (i32, i32) {
    %c0_i32 = arith.constant 0 : i32
    %c0_i32_0 = arith.constant 0 : i32
    %c0_i32_1 = arith.constant 0 : i32
    return %c0_i32, %c0_i32_0 : i32, i32
  }
  func.func @transform_6(%arg0: i32) -> (i32, i32) {
    %c0_i32 = arith.constant 0 : i32
    %c0_i32_0 = arith.constant 0 : i32
    %c0_i32_1 = arith.constant 0 : i32
    return %c0_i32, %c0_i32_0 : i32, i32
  }
  func.func @transform_7(%arg0: i32) -> (i32, i32) {
    %c0_i32 = arith.constant 0 : i32
    %c0_i32_0 = arith.constant 0 : i32
    return %arg0, %c0_i32 : i32, i32
  }
}

</mosaic_0001>

<bundles_post_ra>
// kernel: dqn_forward.1
= control target key start
LH: loop header
LB: loop body
LE: loop exit
PB: predicated region body
PF: predicated region fallthrough
CT: control target
= control target key end

     0   :  { %12 = vsyncpa [#allocation3], 0  ;;  %s6558_s0 = inlined_call_operand.vmem [shape: bf16[2,128], index: 0, kind: input, shape index: {}]   ;;  %s6559_s1 = inlined_call_operand.hbm [shape: bf16[128,1024], index: 1, kind: input, shape index: {}]   ;;  %s6560_s2 = inlined_call_operand.hbm [shape: f32[1,1024], index: 2, kind: input, shape index: {}]   ;;  %s6561_s3 = inlined_call_operand.hbm [shape: bf16[1024,1024], index: 3, kind: input, shape index: {}]   ;;  %s6562_s4 = inlined_call_operand.hbm [shape: f32[1,1024], index: 4, kind: input, shape index: {}]   ;;  %s6563_s5 = inlined_call_operand.hbm [shape: bf16[1024,128], index: 5, kind: input, shape index: {}]   ;;  %s6564_s6 = inlined_call_operand.hbm [shape: f32[1,128], index: 6, kind: input, shape index: {}]   ;;  %s6565_s7 = inlined_call_operand.hbm [shape: f32[2,128], index: 7, kind: output, shape index: {}]  }
   0x1   :  { %13 = vsyncpa [#allocation6], 0 }
   0x2   :  { %14 = vsyncpa [#allocation9], 0 }
   0x3   :  { %15 = vsyncpa [#allocation12], 0 }
   0x4   :  { %16 = vsyncpa [#allocation4], 0  ;;  %s6257_s24 = smov [#allocation5]   ;;  %s6258_s26 = smov [#allocation8]  }
   0x5   :  { %s37_s25 = sshll.u32 %s6257_s24, 4  ;;  %s59_s27 = sshll.u32 %s6258_s26, 4  ;;  %s38_s25 = int_to_ptr.vmem [resolvable:$true] %s37_s25  ;;  %s60_s27 = int_to_ptr.vmem [resolvable:$true] %s59_s27 }
   0x6   :  { %s6093_s30 = scalar_lea.hbm %s6560_s2, 128 }
   0x7   :  { %p6094_p0 = scmp.ne.s32.totalorder %s6560_s2, %s6093_s30  ;;  %p6097_p1 = scmp.lt.u32.totalorder %s6093_s30, %s6560_s2 }
   0x9   :  { %p6099_p2 = pnand %p6097_p1, %p6094_p0 }
   0xb   :  { %6102 = shalt.err (!%p6099_p2)
}
   0xc   :  { %s6103_s12 = scalar_lea.vmem %s38_s25, 128  ;;  %p6108_p4 = scmp.lt.s32.totalorder %s38_s25, %s38_s25 }
   0xd   :  { %p6104_p3 = scmp.ne.s32.totalorder %s38_s25, %s6103_s12  ;;  %p6109_p5 = scmp.lt.s32.totalorder %s6103_s12, %s6103_s12 }
   0xf   :  { %p6110_p6 = por %p6109_p5, %p6108_p4 }
  0x11   :  { %p6111_p7 = pnand %p6110_p6, %p6104_p3 }
  0x13   :  { %6114 = shalt.err (!%p6111_p7)
}
  0x14   :  { %40 = dma.hbm_to_vmem [thread:$0]  %s6560_s2, 128, %s38_s25, [#allocation6]  }
  0x15   :  { %s6115_s17 = scalar_lea.hbm %s6562_s4, 128 }
  0x16   :  { %p6116_p8 = scmp.ne.s32.totalorder %s6562_s4, %s6115_s17  ;;  %p6119_p9 = scmp.lt.u32.totalorder %s6115_s17, %s6562_s4 }
  0x18   :  { %p6121_p10 = pnand %p6119_p9, %p6116_p8 }
  0x1a   :  { %6124 = shalt.err (!%p6121_p10)
}
  0x1b   :  { %s6125_s22 = scalar_lea.vmem %s60_s27, 128  ;;  %p6130_p12 = scmp.lt.s32.totalorder %s60_s27, %s60_s27 }
  0x1c   :  { %p6126_p11 = scmp.ne.s32.totalorder %s60_s27, %s6125_s22  ;;  %p6131_p13 = scmp.lt.s32.totalorder %s6125_s22, %s6125_s22 }
  0x1e   :  { %p6132_p0 = por %p6131_p13, %p6130_p12 }
  0x20   :  { %p6133_p1 = pnand %p6132_p0, %p6126_p11 }
  0x22   :  { %6136 = shalt.err (!%p6133_p1)
}
  0x23   :  { %62 = dma.hbm_to_vmem [thread:$0]  %s6562_s4, 128, %s60_s27, [#allocation9]  }
  0x24   :  { %s6259_s24 = smov [#allocation2]   ;;  %s6137_s29 = scalar_lea.hbm %s6559_s1, 8192 }
  0x25   :  { %s24_s25 = sshll.u32 %s6259_s24, 4  ;;  %p6138_p2 = scmp.ne.s32.totalorder %s6559_s1, %s6137_s29  ;;  %s25_s25 = int_to_ptr.vmem [resolvable:$true] %s24_s25 }
  0x26   :  { %p6141_p3 = scmp.lt.u32.totalorder %s6137_s29, %s6559_s1 }
  0x28   :  { %p6143_p4 = pnand %p6141_p3, %p6138_p2 }
  0x2a   :  { %6146 = shalt.err (!%p6143_p4)
}
  0x2b   :  { %s6147_s11 = scalar_lea.vmem %s25_s25, 8192  ;;  %p6152_p6 = scmp.lt.s32.totalorder %s25_s25, %s25_s25 }
  0x2c   :  { %p6148_p5 = scmp.ne.s32.totalorder %s25_s25, %s6147_s11  ;;  %p6153_p7 = scmp.lt.s32.totalorder %s6147_s11, %s6147_s11 }
  0x2e   :  { %p6154_p8 = por %p6153_p7, %p6152_p6 }
  0x30   :  { %p6155_p9 = pnand %p6154_p8, %p6148_p5 }
  0x32   :  { %6158 = shalt.err (!%p6155_p9)
}
  0x33   :  { %s6260_s4 = smov 512   ;;  %s6261_s27 = smov 32  }
  0x34   :  { %30 = dma.hbm_to_vmem [thread:$0]  %s6559_s1, 8192, %s25_s25, [#allocation3], %s6260_s4, %s6260_s4, %s6261_s27  }
  0x35   :  { %s6262_s14 = smov [#allocation7]   ;;  %s6263_s16 = smov [#allocation10]  }
  0x36   :  { %s46_s15 = sshll.u32 %s6262_s14, 4  ;;  %s68_s17 = sshll.u32 %s6263_s16, 4  ;;  %s47_s15 = int_to_ptr.vmem [resolvable:$true] %s46_s15  ;;  %s69_s17 = int_to_ptr.vmem [resolvable:$true] %s68_s17 }
  0x37   :  { %s6159_s20 = scalar_lea.hbm %s6561_s3, 65536 }
  0x38   :  { %p6160_p10 = scmp.ne.s32.totalorder %s6561_s3, %s6159_s20  ;;  %p6163_p11 = scmp.lt.u32.totalorder %s6159_s20, %s6561_s3 }
  0x3a   :  { %p6165_p12 = pnand %p6163_p11, %p6160_p10 }
  0x3c   :  { %6168 = shalt.err (!%p6165_p12)
}
  0x3d   :  { %s6169_s1 = scalar_lea.vmem %s47_s15, 65536  ;;  %p6174_p0 = scmp.lt.s32.totalorder %s47_s15, %s47_s15 }
  0x3e   :  { %p6170_p13 = scmp.ne.s32.totalorder %s47_s15, %s6169_s1  ;;  %p6175_p1 = scmp.lt.s32.totalorder %s6169_s1, %s6169_s1 }
  0x40   :  { %p6176_p2 = por %p6175_p1, %p6174_p0 }
  0x42   :  { %p6177_p3 = pnand %p6176_p2, %p6170_p13 }
  0x44   :  { %6180 = shalt.err (!%p6177_p3)
}
  0x45   :  { %52 = dma.hbm_to_vmem [thread:$0]  %s6561_s3, 65536, %s47_s15, [#allocation6], %s6260_s4, %s6260_s4, %s6261_s27  }
  0x46   :  { %s6181_s29 = scalar_lea.hbm %s6563_s5, 8192 }
  0x47   :  { %p6182_p4 = scmp.ne.s32.totalorder %s6563_s5, %s6181_s29  ;;  %p6185_p5 = scmp.lt.u32.totalorder %s6181_s29, %s6563_s5 }
  0x49   :  { %p6187_p6 = pnand %p6185_p5, %p6182_p4 }
  0x4b   :  { %6190 = shalt.err (!%p6187_p6)
}
  0x4c   :  { %s6191_s11 = scalar_lea.vmem %s69_s17, 8192  ;;  %p6196_p8 = scmp.lt.s32.totalorder %s69_s17, %s69_s17 }
  0x4d   :  { %p6192_p7 = scmp.ne.s32.totalorder %s69_s17, %s6191_s11  ;;  %p6197_p9 = scmp.lt.s32.totalorder %s6191_s11, %s6191_s11 }
  0x4f   :  { %p6198_p10 = por %p6197_p9, %p6196_p8 }
  0x51   :  { %p6199_p11 = pnand %p6198_p10, %p6192_p7 }
  0x53   :  { %6202 = shalt.err (!%p6199_p11)
}
  0x54   :  { %s6264_s3 = smov 64   ;;  %s6265_s4 = smov 4  }
  0x55   :  { %74 = dma.hbm_to_vmem [thread:$0]  %s6563_s5, 8192, %s69_s17, [#allocation9], %s6264_s3, %s6264_s3, %s6265_s4  }
  0x56   :  { %s6266_s14 = smov [#allocation11]   ;;  %s6203_s19 = scalar_lea.hbm %s6564_s6, 16 }
  0x57   :  { %s81_s15 = sshll.u32 %s6266_s14, 4  ;;  %p6204_p12 = scmp.ne.s32.totalorder %s6564_s6, %s6203_s19  ;;  %s82_s15 = int_to_ptr.vmem [resolvable:$true] %s81_s15 }
  0x58   :  { %p6207_p13 = scmp.lt.u32.totalorder %s6203_s19, %s6564_s6 }
  0x5a   :  { %p6209_p0 = pnand %p6207_p13, %p6204_p12 }
  0x5c   :  { %6212 = shalt.err (!%p6209_p0)
}
  0x5d   :  { %s6213_s23 = scalar_lea.vmem %s82_s15, 16  ;;  %s6217_s5 = scalar_lea.vmem %s82_s15, 32 }
  0x5e   :  { %p6214_p1 = scmp.ne.s32.totalorder %s82_s15, %s6213_s23  ;;  %p6218_p2 = scmp.lt.s32.totalorder %s82_s15, %s82_s15 }
  0x5f   :  { %p6219_p3 = scmp.lt.s32.totalorder %s6217_s5, %s6213_s23 }
  0x61   :  { %p6220_p4 = por %p6219_p3, %p6218_p2 }
  0x63   :  { %p6221_p5 = pnand %p6220_p4, %p6214_p1 }
  0x65   :  { %6224 = shalt.err (!%p6221_p5)
}
  0x66   :  { %84 = dma.hbm_to_vmem [thread:$0]  %s6564_s6, 16, %s82_s15, [#allocation12]  }
  0x67   :  { %6247 = dma.done.wait [#allocation3], 8192  }
  0x68   :  { %6248 = vsyncadd [#allocation3], 4294959104 }
  0x69   :  { %6249 = dma.done.wait [#allocation6], 65664  }
  0x6a   :  { %6250 = vsyncadd [#allocation6], 4294901632 }
  0x6b   :  { %6251 = dma.done.wait [#allocation9], 8320  }
  0x6c   :  { %6252 = vsyncadd [#allocation9], 4294958976 }
  0x6d   :  { %6253 = dma.done.wait [#allocation12], 16  }
  0x6e   :  { %6254 = vsyncadd [#allocation12], 4294967280  ;;  %v6267_v0 = vmov 0   ;;  %v108_v1 = vld [vmem:[#allocation2] sm:$0xff]  ;;  %v109_v14 = vld [vmem:[#allocation2 + $0x8] sm:$0xff]  ;;  %v174_v27 = vlaneseq }
  0x6f   :  { %595 = vmatprep.mubr.bf16.mxu0 %v6267_v0  ;;  %636 = vmatprep.mubr.bf16.mxu1 %v6267_v0  ;;  %v112_v2 = vld [vmem:[#allocation2 + $0x20] sm:$0xff]  ;;  %v113_v15 = vld [vmem:[#allocation2 + $0x28] sm:$0xff]  ;;  %v6268_v28 = vmov 1966171168  }
  0x70   :  { %v116_v3 = vld [vmem:[#allocation2 + $0x40] sm:$0xff]  ;;  %v5230_v4 = vcombine.high %v108_v1, %v112_v2  ;;  %v5229_v5 = vcombine.low %v108_v1, %v112_v2  ;;  %v117_v16 = vld [vmem:[#allocation2 + $0x48] sm:$0xff]  ;;  %v5232_v19 = vcombine.high %v109_v14, %v113_v15  ;;  %v5231_v20 = vcombine.low %v109_v14, %v113_v15 }
  0x71   :  { %v120_v6 = vld [vmem:[#allocation2 + $0x60] sm:$0xff]  ;;  %v121_v17 = vld [vmem:[#allocation2 + $0x68] sm:$0xff]  ;;  %v221_v29 = vunpack.c.l.s4 %v6268_v28  ;;  %v6390_v39 = vshrl.u32 %v174_v27, 7  ;;  %v130_v27 = vld [vmem:[#allocation2 + $0xb0] sm:$0xff] }
  0x72   :  { %v5238_v7 = vcombine.high %v116_v3, %v120_v6  ;;  %v124_v8 = vld [vmem:[#allocation2 + $0x80] sm:$0xff]  ;;  %563 = vmatprep.subr.bf16.mxu0 %v5230_v4  ;;  %v5237_v10 = vcombine.low %v116_v3, %v120_v6  ;;  %v5240_v21 = vcombine.high %v117_v16, %v121_v17  ;;  %v125_v23 = vld [vmem:[#allocation2 + $0x88] sm:$0xff]  ;;  %604 = vmatprep.subr.bf16.mxu1 %v5232_v19 }
  0x73   :  { %v128_v9 = vld [vmem:[#allocation2 + $0xa0] sm:$0xff]  ;;  %564 = vmatpush1.bf16.msra.mxu0 %v5229_v5  ;;  %v129_v24 = vld [vmem:[#allocation2 + $0xa8] sm:$0xff]  ;;  %605 = vmatpush1.bf16.msra.mxu1 %v5231_v20  ;;  %v5239_v30 = vcombine.low %v117_v16, %v121_v17  ;;  %v222_v40 = vunpack.c.0.s8 %v221_v29  ;;  %v118_v17 = vld [vmem:[#allocation2 + $0x50] sm:$0xff] }
  0x74   :  { %565 = vmatprep.subr.bf16.mxu0 %v5238_v7  ;;  %v5246_v11 = vcombine.high %v124_v8, %v128_v9  ;;  %v132_v12 = vld [vmem:[#allocation2 + $0xc0] sm:$0xff]  ;;  %v5245_v18 = vcombine.low %v124_v8, %v128_v9  ;;  %606 = vmatprep.subr.bf16.mxu1 %v5240_v21  ;;  %v5248_v32 = vcombine.high %v125_v23, %v129_v24  ;;  %v133_v34 = vld [vmem:[#allocation2 + $0xc8] sm:$0xff]  ;;  %v110_v8 = vld [vmem:[#allocation2 + $0x10] sm:$0xff] }
  0x75   :  { %v136_v13 = vld [vmem:[#allocation2 + $0xe0] sm:$0xff]  ;;  %v137_v35 = vld [vmem:[#allocation2 + $0xe8] sm:$0xff]  ;;  %v5247_v41 = vcombine.low %v125_v23, %v129_v24  ;;  %v225_v54 = vsub.s32 %v222_v40, %v6390_v39  ;;  %v114_v9 = vld [vmem:[#allocation2 + $0x30] sm:$0xff] }
  0x76   :  { %v5254_v22 = vcombine.high %v132_v12, %v136_v13  ;;  %v140_v25 = vld [vmem:[#allocation2 + $0x100] sm:$0xff]  ;;  %v5253_v31 = vcombine.low %v132_v12, %v136_v13  ;;  %v5256_v46 = vcombine.high %v133_v34, %v137_v35  ;;  %v141_v48 = vld [vmem:[#allocation2 + $0x108] sm:$0xff]  ;;  %v5255_v55 = vcombine.low %v133_v34, %v137_v35  ;;  %v111_v24 = vld [vmem:[#allocation2 + $0x18] sm:$0xff] }
  0x77   :  { %566 = vmatpush1.bf16.msra.mxu0 %v5237_v10  ;;  %v144_v26 = vld [vmem:[#allocation2 + $0x120] sm:$0xff]  ;;  %607 = vmatpush1.bf16.msra.mxu1 %v5239_v30  ;;  %v145_v49 = vld [vmem:[#allocation2 + $0x128] sm:$0xff]  ;;  %v5234_v16 = vcombine.high %v110_v8, %v114_v9  ;;  %v134_v34 = vld [vmem:[#allocation2 + $0xd0] sm:$0xff] }
  0x78   :  { %567 = vmatprep.subr.bf16.mxu0 %v5246_v11  ;;  %v5262_v33 = vcombine.high %v140_v25, %v144_v26  ;;  %v148_v36 = vld [vmem:[#allocation2 + $0x140] sm:$0xff]  ;;  %v5261_v42 = vcombine.low %v140_v25, %v144_v26  ;;  %608 = vmatprep.subr.bf16.mxu1 %v5248_v32  ;;  %v5264_v57 = vcombine.high %v141_v48, %v145_v49  ;;  %v149_v59 = vld [vmem:[#allocation2 + $0x148] sm:$0xff]  ;;  %v115_v25 = vld [vmem:[#allocation2 + $0x38] sm:$0xff] }
  0x79   :  { %v152_v37 = vld [vmem:[#allocation2 + $0x160] sm:$0xff]  ;;  %v153_v60 = vld [vmem:[#allocation2 + $0x168] sm:$0xff]  ;;  %v5263_v2 = vcombine.low %v141_v48, %v145_v49  ;;  %v126_v26 = vld [vmem:[#allocation2 + $0x90] sm:$0xff]  ;;  %v5236_v30 = vcombine.high %v111_v24, %v115_v25 }
  0x7a   :  { %v104_v38 = vld [vmem:[%s6558_s0] sm:$0x1]  ;;  %v105_v43 = vld [vmem:[%s6558_s0 + $0x1] sm:$0x1]  ;;  %v106_v44 = vld [vmem:[%s6558_s0 + $0x2] sm:$0x1]  ;;  %v5270_v47 = vcombine.high %v148_v36, %v152_v37  ;;  %v5269_v56 = vcombine.low %v148_v36, %v152_v37  ;;  %v5272_v4 = vcombine.high %v149_v59, %v153_v60  ;;  %v5271_v11 = vcombine.low %v149_v59, %v153_v60 }
  0x7b   :  { %568 = vmatpush1.bf16.msra.mxu0 %v5245_v18  ;;  %v107_v45 = vld [vmem:[%s6558_s0 + $0x3] sm:$0x1]  ;;  %v218_v52 = vcombine.low %v104_v38, %v105_v43  ;;  %609 = vmatpush1.bf16.msra.mxu1 %v5247_v41  ;;  %v157_v6 = vld [vmem:[#allocation2 + $0x188] sm:$0xff]  ;;  %v122_v18 = vld [vmem:[#allocation2 + $0x70] sm:$0xff]  ;;  %v5235_v36 = vcombine.low %v111_v24, %v115_v25  ;;  %v5249_v37 = vcombine.low %v126_v26, %v130_v27 }
  0x7c   :  { %569 = vmatprep.subr.bf16.mxu0 %v5254_v22  ;;  %v156_v50 = vld [vmem:[#allocation2 + $0x180] sm:$0xff]  ;;  %v219_v53 = vcombine.low %v106_v44, %v107_v45  ;;  %610 = vmatprep.subr.bf16.mxu1 %v5256_v46  ;;  %v161_v7 = vld [vmem:[#allocation2 + $0x1a8] sm:$0xff]  ;;  %v5233_v22 = vcombine.low %v110_v8, %v114_v9  ;;  %v5242_v23 = vcombine.high %v118_v17, %v122_v18  ;;  %v119_v32 = vld [vmem:[#allocation2 + $0x58] sm:$0xff] }
  0x7d   :  { %v160_v51 = vld [vmem:[#allocation2 + $0x1a0] sm:$0xff]  ;;  %v226_v63 = vrot.slane %v218_v52, %v225_v54  ;;  %v5280_v13 = vcombine.high %v157_v6, %v161_v7  ;;  %v165_v14 = vld [vmem:[#allocation2 + $0x1c8] sm:$0xff]  ;;  %v5279_v20 = vcombine.low %v157_v6, %v161_v7  ;;  %v5241_v29 = vcombine.low %v118_v17, %v122_v18  ;;  %v138_v35 = vld [vmem:[#allocation2 + $0xf0] sm:$0xff] }
  0x7e   :  { %v5278_v58 = vcombine.high %v156_v50, %v160_v51  ;;  %v164_v61 = vld [vmem:[#allocation2 + $0x1c0] sm:$0xff]  ;;  %v233_v1 = vrot.slane %v219_v53, %v225_v54  ;;  %v5277_v3 = vcombine.low %v156_v50, %v160_v51  ;;  %v169_v15 = vld [vmem:[#allocation2 + $0x1e8] sm:$0xff]  ;;  %v142_v38 = vld [vmem:[#allocation2 + $0x110] sm:$0xff]  ;;  %v5257_v48 = vcombine.low %v134_v34, %v138_v35 }
  0x7f   :  { %570 = vmatpush1.bf16.msra.mxu0 %v5253_v31  ;;  %v168_v62 = vld [vmem:[#allocation2 + $0x1e0] sm:$0xff]  ;;  %611 = vmatpush1.bf16.msra.mxu1 %v5255_v55  ;;  %v5288_v21 = vcombine.high %v165_v14, %v169_v15  ;;  %v5287_v28 = vcombine.low %v165_v14, %v169_v15  ;;  %v5250_v31 = vcombine.high %v126_v26, %v130_v27  ;;  %v146_v40 = vld [vmem:[#allocation2 + $0x130] sm:$0xff]  ;;  %v127_v43 = vld [vmem:[#allocation2 + $0x98] sm:$0xff] }
  0x80   :  { %571 = vmatprep.subr.bf16.mxu0 %v5262_v33  ;;  %612 = vmatprep.subr.bf16.mxu1 %v5264_v57  ;;  %v5286_v5 = vcombine.high %v164_v61, %v168_v62  ;;  %v234_v10 = vcombine.low %v226_v63, %v233_v1  ;;  %v5285_v12 = vcombine.low %v164_v61, %v168_v62  ;;  %v123_v33 = vld [vmem:[#allocation2 + $0x78] sm:$0xff]  ;;  %v150_v49 = vld [vmem:[#allocation2 + $0x150] sm:$0xff]  ;;  %v751_v18 = vld [vmem:[#allocation7 + $0x40] sm:$0xff] }
  0x81   :  { %v5244_v41 = vcombine.high %v119_v32, %v123_v33  ;;  %v131_v44 = vld [vmem:[#allocation2 + $0xb8] sm:$0xff]  ;;  %v5243_v45 = vcombine.low %v119_v32, %v123_v33  ;;  %v154_v50 = vld [vmem:[#allocation2 + $0x170] sm:$0xff]  ;;  %v5266_v52 = vcombine.high %v142_v38, %v146_v40  ;;  %v759_v27 = vld [vmem:[#allocation7 + $0x80] sm:$0xff] }
  0x82   :  { %v6402_v19 = vrot.slane %v234_v10, %v225_v54  ;;  %v135_v46 = vld [vmem:[#allocation2 + $0xd8] sm:$0xff]  ;;  %v5252_v51 = vcombine.high %v127_v43, %v131_v44  ;;  %v5251_v53 = vcombine.low %v127_v43, %v131_v44  ;;  %v158_v57 = vld [vmem:[#allocation2 + $0x190] sm:$0xff]  ;;  %v5273_v63 = vcombine.low %v150_v49, %v154_v50  ;;  %v743_v10 = vld [vmem:[#allocation7] sm:$0xff] }
  0x83   :  { %572 = vmatpush1.bf16.msra.mxu0 %v5261_v42  ;;  %613 = vmatpush1.bf16.msra.mxu1 %v5263_v2  ;;  %v5258_v42 = vcombine.high %v134_v34, %v138_v35  ;;  %v143_v54 = vld [vmem:[#allocation2 + $0x118] sm:$0xff]  ;;  %v166_v1 = vld [vmem:[#allocation2 + $0x1d0] sm:$0xff]  ;;  %v767_v35 = vld [vmem:[#allocation7 + $0xc0] sm:$0xff] }
  0x84   :  { %573 = vmatprep.subr.bf16.mxu0 %v5270_v47  ;;  %614 = vmatprep.subr.bf16.mxu1 %v5272_v4  ;;  %v139_v47 = vld [vmem:[#allocation2 + $0xf8] sm:$0xff]  ;;  %v170_v2 = vld [vmem:[#allocation2 + $0x1f0] sm:$0xff]  ;;  %v775_v44 = vld [vmem:[#allocation7 + $0x100] sm:$0xff] }
  0x85   :  { %v147_v55 = vld [vmem:[#allocation2 + $0x138] sm:$0xff]  ;;  %v5260_v59 = vcombine.high %v135_v46, %v139_v47  ;;  %v5259_v60 = vcombine.low %v135_v46, %v139_v47  ;;  %v748_v24 = vld [vmem:[#allocation7 + $0x28] sm:$0xff] }
  0x86   :  { %v151_v61 = vld [vmem:[#allocation2 + $0x158] sm:$0xff]  ;;  %v756_v32 = vld [vmem:[#allocation7 + $0x68] sm:$0xff] }
  0x87   :  { %574 = vmatpush1.bf16.msra.mxu0 %v5269_v56  ;;  %615 = vmatpush1.bf16.msra.mxu1 %v5271_v11  ;;  %v5265_v56 = vcombine.low %v142_v38, %v146_v40  ;;  %v155_v62 = vld [vmem:[#allocation2 + $0x178] sm:$0xff]  ;;  %v747_v11 = vld [vmem:[#allocation7 + $0x20] sm:$0xff]  ;;  %v760_v40 = vld [vmem:[#allocation7 + $0x88] sm:$0xff] }
  0x88   :  { %575 = vmatprep.subr.bf16.mxu0 %v5278_v58  ;;  %616 = vmatprep.subr.bf16.mxu1 %v5280_v13  ;;  %v162_v58 = vld [vmem:[#allocation2 + $0x1b0] sm:$0xff]  ;;  %v159_v6 = vld [vmem:[#allocation2 + $0x198] sm:$0xff]  ;;  %v5276_v9 = vcombine.high %v151_v61, %v155_v62  ;;  %v5275_v13 = vcombine.low %v151_v61, %v155_v62  ;;  %v5293_v26 = vcombine.low %v743_v10, %v747_v11 }
  0x89   :  { %v5282_v4 = vcombine.high %v158_v57, %v162_v58  ;;  %v163_v7 = vld [vmem:[#allocation2 + $0x1b8] sm:$0xff]  ;;  %v5281_v8 = vcombine.low %v158_v57, %v162_v58  ;;  %v780_v57 = vld [vmem:[#allocation7 + $0x128] sm:$0xff] }
  0x8a   :  { %v167_v14 = vld [vmem:[#allocation2 + $0x1d8] sm:$0xff]  ;;  %v5284_v17 = vcombine.high %v159_v6, %v163_v7 }
  0x8b   :  { %576 = vmatpush1.bf16.msra.mxu0 %v5277_v3  ;;  %617 = vmatpush1.bf16.msra.mxu1 %v5279_v20  ;;  %v5268_v3 = vcombine.high %v143_v54, %v147_v55  ;;  %v171_v15 = vld [vmem:[#allocation2 + $0x1f8] sm:$0xff]  ;;  %v755_v20 = vld [vmem:[#allocation7 + $0x60] sm:$0xff] }
  0x8c   :  { %577 = vmatprep.subr.bf16.mxu0 %v5286_v5  ;;  %618 = vmatprep.subr.bf16.mxu1 %v5288_v21  ;;  %v5267_v5 = vcombine.low %v143_v54, %v147_v55  ;;  %v5294_v21 = vcombine.high %v743_v10, %v747_v11  ;;  %v5292_v25 = vcombine.high %v167_v14, %v171_v15  ;;  %v796_v10 = vld [vmem:[#allocation7 + $0x1a8] sm:$0xff] }
  0x8d   :  { %v5301_v34 = vcombine.low %v751_v18, %v755_v20 }
  0x8f   :  { %578 = vmatpush1.bf16.msra.mxu0 %v5285_v12  ;;  %619 = vmatpush1.bf16.msra.mxu1 %v5287_v28  ;;  %v5290_v12 = vcombine.high %v166_v1, %v170_v2  ;;  %v763_v28 = vld [vmem:[#allocation7 + $0xa0] sm:$0xff] }
  0x90   :  { %645 = vmatprep.subr.bf16.mxu0 %v5234_v16  ;;  %686 = vmatprep.subr.bf16.mxu1 %v5236_v30  ;;  %v5289_v16 = vcombine.low %v166_v1, %v170_v2  ;;  %v5291_v30 = vcombine.low %v167_v14, %v171_v15  ;;  %v5309_v43 = vcombine.low %v759_v27, %v763_v28  ;;  %v784_v1 = vld [vmem:[#allocation7 + $0x148] sm:$0xff] }
  0x91   :  { %v788_v2 = vld [vmem:[#allocation7 + $0x168] sm:$0xff] }
  0x92   :  { %596 = vmatmul.mubr.bf16.vlgmr.msra.gmra.mrb[0].mxu0 %v6402_v19  ;;  %637 = vmatmul.mubr.bf16.vlgmr.msra.gmra.mrb[0].mxu1 %v6402_v19  ;;  %v5335_v14 = vcombine.low %v784_v1, %v788_v2 }
  0x93   :  { %646 = vmatpush1.bf16.msra.mxu0 %v5233_v22  ;;  %677 = vmatprep.mubr.bf16.mxu0 %v6267_v0  ;;  %v5283_v22 = vcombine.low %v159_v6, %v163_v7  ;;  %v5336_v7 = vcombine.high %v784_v1, %v788_v2  ;;  %v848_v2 = vld [vmem:[#allocation7 + $0x348] sm:$0xff] }
  0x94   :  { %647 = vmatprep.subr.bf16.mxu0 %v5242_v23  ;;  %687 = vmatpush1.bf16.msra.mxu1 %v5235_v36  ;;  %v744_v23 = vld [vmem:[#allocation7 + $0x8] sm:$0xff]  ;;  %v771_v36 = vld [vmem:[#allocation7 + $0xe0] sm:$0xff] }
  0x95   :  { %718 = vmatprep.mubr.bf16.mxu1 %v6267_v0  ;;  %688 = vmatprep.subr.bf16.mxu1 %v5244_v41  ;;  %v5274_v0 = vcombine.high %v150_v49, %v154_v50  ;;  %v5296_v33 = vcombine.high %v744_v23, %v748_v24  ;;  %v5295_v38 = vcombine.low %v744_v23, %v748_v24  ;;  %v764_v41 = vld [vmem:[#allocation7 + $0xa8] sm:$0xff] }
  0x96   :  { %v5318_v46 = vcombine.high %v767_v35, %v771_v36  ;;  %v772_v49 = vld [vmem:[#allocation7 + $0xe8] sm:$0xff]  ;;  %v5312_v50 = vcombine.high %v760_v40, %v764_v41  ;;  %v5311_v55 = vcombine.low %v760_v40, %v764_v41 }
  0x97   :  { %648 = vmatpush1.bf16.msra.mxu0 %v5241_v29  ;;  %v5302_v29 = vcombine.high %v751_v18, %v755_v20  ;;  %v804_v18 = vld [vmem:[#allocation7 + $0x1e8] sm:$0xff] }
  0x98   :  { %649 = vmatprep.subr.bf16.mxu0 %v5250_v31  ;;  %689 = vmatpush1.bf16.msra.mxu1 %v5243_v45  ;;  %v752_v31 = vld [vmem:[#allocation7 + $0x48] sm:$0xff]  ;;  %v779_v45 = vld [vmem:[#allocation7 + $0x120] sm:$0xff] }
  0x99   :  { %690 = vmatprep.subr.bf16.mxu1 %v5252_v51  ;;  %v5303_v47 = vcombine.low %v752_v31, %v756_v32  ;;  %v5317_v51 = vcombine.low %v767_v35, %v771_v36  ;;  %v5326_v54 = vcombine.high %v775_v44, %v779_v45  ;;  %v820_v35 = vld [vmem:[#allocation7 + $0x268] sm:$0xff] }
  0x9b   :  { %650 = vmatpush1.bf16.msra.mxu0 %v5249_v37  ;;  %v5310_v37 = vcombine.high %v759_v27, %v763_v28  ;;  %v812_v27 = vld [vmem:[#allocation7 + $0x228] sm:$0xff] }
  0x9c   :  { %651 = vmatprep.subr.bf16.mxu0 %v5258_v42  ;;  %691 = vmatpush1.bf16.msra.mxu1 %v5251_v53  ;;  %v5304_v42 = vcombine.high %v752_v31, %v756_v32  ;;  %v787_v53 = vld [vmem:[#allocation7 + $0x160] sm:$0xff] }
  0x9d   :  { %692 = vmatprep.subr.bf16.mxu1 %v5260_v59  ;;  %v791_v59 = vld [vmem:[#allocation7 + $0x180] sm:$0xff] }
  0x9f   :  { %652 = vmatpush1.bf16.msra.mxu0 %v5257_v48  ;;  %v768_v48 = vld [vmem:[#allocation7 + $0xc8] sm:$0xff] }
  0xa0   :  { %653 = vmatprep.subr.bf16.mxu0 %v5266_v52  ;;  %693 = vmatpush1.bf16.msra.mxu1 %v5259_v60  ;;  %v783_v52 = vld [vmem:[#allocation7 + $0x140] sm:$0xff]  ;;  %v5320_v58 = vcombine.high %v768_v48, %v772_v49  ;;  %v5319_v61 = vcombine.low %v768_v48, %v772_v49 }
  0xa1   :  { %694 = vmatprep.subr.bf16.mxu1 %v5268_v3  ;;  %v5334_v60 = vcombine.high %v783_v52, %v787_v53 }
  0xa3   :  { %654 = vmatpush1.bf16.msra.mxu0 %v5265_v56  ;;  %v776_v56 = vld [vmem:[#allocation7 + $0x108] sm:$0xff] }
  0xa4   :  { %655 = vmatprep.subr.bf16.mxu0 %v5274_v0  ;;  %695 = vmatpush1.bf16.msra.mxu1 %v5267_v5  ;;  %v795_v0 = vld [vmem:[#allocation7 + $0x1a0] sm:$0xff]  ;;  %v5328_v62 = vcombine.high %v776_v56, %v780_v57  ;;  %v5327_v6 = vcombine.low %v776_v56, %v780_v57 }
  0xa5   :  { %696 = vmatprep.subr.bf16.mxu1 %v5276_v9  ;;  %v5342_v3 = vcombine.high %v791_v59, %v795_v0  ;;  %v803_v5 = vld [vmem:[#allocation7 + $0x1e0] sm:$0xff]  ;;  %v792_v9 = vld [vmem:[#allocation7 + $0x188] sm:$0xff] }
  0xa6   :  { %v5344_v15 = vcombine.high %v792_v9, %v796_v10  ;;  %v5343_v23 = vcombine.low %v792_v9, %v796_v10  ;;  %v856_v10 = vld [vmem:[#allocation7 + $0x388] sm:$0xff] }
  0xa7   :  { %656 = vmatpush1.bf16.msra.mxu0 %v5273_v63  ;;  %v5333_v63 = vcombine.low %v783_v52, %v787_v53  ;;  %v836_v52 = vld [vmem:[#allocation7 + $0x2e8] sm:$0xff] }
  0xa8   :  { %657 = vmatprep.subr.bf16.mxu0 %v5282_v4  ;;  %697 = vmatpush1.bf16.msra.mxu1 %v5275_v13  ;;  %v799_v4 = vld [vmem:[#allocation7 + $0x1c0] sm:$0xff] }
  0xa9   :  { %698 = vmatprep.subr.bf16.mxu1 %v5284_v17  ;;  %v5350_v11 = vcombine.high %v799_v4, %v803_v5  ;;  %v811_v13 = vld [vmem:[#allocation7 + $0x220] sm:$0xff]  ;;  %v800_v17 = vld [vmem:[#allocation7 + $0x1c8] sm:$0xff] }
  0xaa   :  { %v5352_v24 = vcombine.high %v800_v17, %v804_v18  ;;  %v5351_v31 = vcombine.low %v800_v17, %v804_v18 }
  0xab   :  { %658 = vmatpush1.bf16.msra.mxu0 %v5281_v8  ;;  %v5341_v8 = vcombine.low %v791_v59, %v795_v0  ;;  %v844_v59 = vld [vmem:[#allocation7 + $0x328] sm:$0xff] }
  0xac   :  { %659 = vmatprep.subr.bf16.mxu0 %v5290_v12  ;;  %699 = vmatpush1.bf16.msra.mxu1 %v5283_v22  ;;  %v807_v12 = vld [vmem:[#allocation7 + $0x200] sm:$0xff] }
  0xad   :  { %700 = vmatprep.subr.bf16.mxu1 %v5292_v25  ;;  %v5358_v20 = vcombine.high %v807_v12, %v811_v13  ;;  %v819_v22 = vld [vmem:[#allocation7 + $0x260] sm:$0xff]  ;;  %v5357_v25 = vcombine.low %v807_v12, %v811_v13 }
  0xaf   :  { %660 = vmatpush1.bf16.msra.mxu0 %v5289_v16  ;;  %v5349_v16 = vcombine.low %v799_v4, %v803_v5 }
  0xb0   :  { %3857 = vmatprep.subr.bf16.mxu0 %v5294_v21  ;;  %701 = vmatpush1.bf16.msra.mxu1 %v5291_v30  ;;  %v815_v21 = vld [vmem:[#allocation7 + $0x240] sm:$0xff] }
  0xb1   :  { %4021 = vmatprep.subr.bf16.mxu1 %v5296_v33  ;;  %v5366_v28 = vcombine.high %v815_v21, %v819_v22  ;;  %v827_v30 = vld [vmem:[#allocation7 + $0x2a0] sm:$0xff]  ;;  %v5365_v33 = vcombine.low %v815_v21, %v819_v22  ;;  %v864_v21 = vld [vmem:[#allocation7 + $0x3c8] sm:$0xff] }
  0xb2   :  { %678 = vmatmul.mubr.bf16.vlgmr.msra.gmra.mrb[4].mxu0 %v6402_v19  ;;  %v868_v22 = vld [vmem:[#allocation7 + $0x3e8] sm:$0xff] }
  0xb3   :  { %3858 = vmatpush1.bf16.msra.mxu0 %v5293_v26  ;;  %719 = vmatmul.mubr.bf16.vlgmr.msra.gmra.mrb[4].mxu1 %v6402_v19  ;;  %v5325_v19 = vcombine.low %v775_v44, %v779_v45  ;;  %v808_v26 = vld [vmem:[#allocation7 + $0x208] sm:$0xff] }
  0xb4   :  { %3859 = vmatprep.subr.bf16.mxu0 %v5302_v29  ;;  %4022 = vmatpush1.bf16.msra.mxu1 %v5295_v38  ;;  %v823_v29 = vld [vmem:[#allocation7 + $0x280] sm:$0xff]  ;;  %v5360_v32 = vcombine.high %v808_v26, %v812_v27  ;;  %v5359_v40 = vcombine.low %v808_v26, %v812_v27  ;;  %v828_v44 = vld [vmem:[#allocation7 + $0x2a8] sm:$0xff]  ;;  %v5416_v27 = vcombine.high %v864_v21, %v868_v22 }
  0xb5   :  { %4023 = vmatprep.subr.bf16.mxu1 %v5304_v42  ;;  %v5374_v36 = vcombine.high %v823_v29, %v827_v30  ;;  %v835_v38 = vld [vmem:[#allocation7 + $0x2e0] sm:$0xff]  ;;  %v5373_v42 = vcombine.low %v823_v29, %v827_v30  ;;  %v176_v30 = vsub.s32 0, %v6390_v39 }
  0xb7   :  { %3860 = vmatpush1.bf16.msra.mxu0 %v5301_v34  ;;  %v816_v34 = vld [vmem:[#allocation7 + $0x248] sm:$0xff] }
  0xb8   :  { %3861 = vmatprep.subr.bf16.mxu0 %v5310_v37  ;;  %4024 = vmatpush1.bf16.msra.mxu1 %v5303_v47  ;;  %v831_v37 = vld [vmem:[#allocation7 + $0x2c0] sm:$0xff]  ;;  %v5368_v41 = vcombine.high %v816_v34, %v820_v35  ;;  %v5367_v48 = vcombine.low %v816_v34, %v820_v35 }
  0xb9   :  { %4025 = vmatprep.subr.bf16.mxu1 %v5312_v50  ;;  %v5382_v45 = vcombine.high %v831_v37, %v835_v38  ;;  %v843_v47 = vld [vmem:[#allocation7 + $0x320] sm:$0xff]  ;;  %v5381_v50 = vcombine.low %v831_v37, %v835_v38  ;;  %v188_v38 = vsub.s32 3, %v6390_v39 }
  0xbb   :  { %3862 = vmatpush1.bf16.msra.mxu0 %v5309_v43  ;;  %v824_v43 = vld [vmem:[#allocation7 + $0x288] sm:$0xff] }
  0xbc   :  { %3863 = vmatprep.subr.bf16.mxu0 %v5318_v46  ;;  %4026 = vmatpush1.bf16.msra.mxu1 %v5311_v55  ;;  %v839_v46 = vld [vmem:[#allocation7 + $0x300] sm:$0xff]  ;;  %v5376_v49 = vcombine.high %v824_v43, %v828_v44  ;;  %v5375_v56 = vcombine.low %v824_v43, %v828_v44 }
  0xbd   :  { %4027 = vmatprep.subr.bf16.mxu1 %v5320_v58  ;;  %v5390_v53 = vcombine.high %v839_v46, %v843_v47  ;;  %v851_v55 = vld [vmem:[#allocation7 + $0x360] sm:$0xff]  ;;  %v5389_v58 = vcombine.low %v839_v46, %v843_v47  ;;  %v880_v47 = vld [vmem:[#allocation7 + $0x448] sm:$0xff] }
  0xbe   :  { %v879_v44 = vld [vmem:[#allocation7 + $0x440] sm:$0xff] }
  0xbf   :  { %3864 = vmatpush1.bf16.msra.mxu0 %v5317_v51  ;;  %v832_v51 = vld [vmem:[#allocation7 + $0x2c8] sm:$0xff]  ;;  %v883_v46 = vld [vmem:[#allocation7 + $0x460] sm:$0xff] }
  0xc0   :  { %3865 = vmatprep.subr.bf16.mxu0 %v5326_v54  ;;  %4028 = vmatpush1.bf16.msra.mxu1 %v5319_v61  ;;  %v847_v54 = vld [vmem:[#allocation7 + $0x340] sm:$0xff]  ;;  %v5384_v57 = vcombine.high %v832_v51, %v836_v52 }
  0xc1   :  { %4029 = vmatprep.subr.bf16.mxu1 %v5328_v62  ;;  %v5398_v0 = vcombine.high %v847_v54, %v851_v55  ;;  %v855_v61 = vld [vmem:[#allocation7 + $0x380] sm:$0xff]  ;;  %v5397_v1 = vcombine.low %v847_v54, %v851_v55 }
  0xc2   :  { %v859_v62 = vld [vmem:[#allocation7 + $0x3a0] sm:$0xff] }
  0xc3   :  { %3866 = vmatpush1.bf16.msra.mxu0 %v5325_v19  ;;  %v840_v19 = vld [vmem:[#allocation7 + $0x308] sm:$0xff]  ;;  %v5406_v4 = vcombine.high %v855_v61, %v859_v62  ;;  %v5405_v9 = vcombine.low %v855_v61, %v859_v62  ;;  %v887_v54 = vld [vmem:[#allocation7 + $0x480] sm:$0xff] }
  0xc4   :  { %3867 = vmatprep.subr.bf16.mxu0 %v5334_v60  ;;  %4030 = vmatpush1.bf16.msra.mxu1 %v5327_v6  ;;  %v5383_v60 = vcombine.low %v832_v51, %v836_v52  ;;  %v5391_v5 = vcombine.low %v840_v19, %v844_v59  ;;  %v863_v6 = vld [vmem:[#allocation7 + $0x3c0] sm:$0xff]  ;;  %v5430_v52 = vcombine.high %v879_v44, %v883_v46 }
  0xc5   :  { %4031 = vmatprep.subr.bf16.mxu1 %v5336_v7  ;;  %v867_v7 = vld [vmem:[#allocation7 + $0x3e0] sm:$0xff] }
  0xc6   :  { %v5414_v12 = vcombine.high %v863_v6, %v867_v7  ;;  %v5413_v18 = vcombine.low %v863_v6, %v867_v7  ;;  %v900_v6 = vld [vmem:[#allocation7 + $0x4e8] sm:$0xff] }
  0xc7   :  { %3868 = vmatpush1.bf16.msra.mxu0 %v5333_v63  ;;  %v5392_v63 = vcombine.high %v840_v19, %v844_v59 }
  0xc8   :  { %3869 = vmatprep.subr.bf16.mxu0 %v5342_v3  ;;  %4032 = vmatpush1.bf16.msra.mxu1 %v5335_v14  ;;  %v852_v3 = vld [vmem:[#allocation7 + $0x368] sm:$0xff]  ;;  %v871_v14 = vld [vmem:[#allocation7 + $0x400] sm:$0xff] }
  0xc9   :  { %4033 = vmatprep.subr.bf16.mxu1 %v5344_v15  ;;  %v5399_v13 = vcombine.low %v848_v2, %v852_v3  ;;  %v875_v15 = vld [vmem:[#allocation7 + $0x420] sm:$0xff] }
  0xcb   :  { %3870 = vmatpush1.bf16.msra.mxu0 %v5341_v8  ;;  %v5400_v8 = vcombine.high %v848_v2, %v852_v3  ;;  %v895_v2 = vld [vmem:[#allocation7 + $0x4c0] sm:$0xff] }
  0xcc   :  { %3871 = vmatprep.subr.bf16.mxu0 %v5350_v11  ;;  %4034 = vmatpush1.bf16.msra.mxu1 %v5343_v23  ;;  %v860_v11 = vld [vmem:[#allocation7 + $0x3a8] sm:$0xff]  ;;  %v5421_v23 = vcombine.low %v871_v14, %v875_v15 }
  0xcd   :  { %4035 = vmatprep.subr.bf16.mxu1 %v5352_v24  ;;  %v5408_v17 = vcombine.high %v856_v10, %v860_v11  ;;  %v5422_v24 = vcombine.high %v871_v14, %v875_v15  ;;  %v5407_v26 = vcombine.low %v856_v10, %v860_v11  ;;  %v904_v14 = vld [vmem:[#allocation7 + $0x508] sm:$0xff] }
  0xce   :  { %v908_v15 = vld [vmem:[#allocation7 + $0x528] sm:$0xff] }
  0xcf   :  { %3872 = vmatpush1.bf16.msra.mxu0 %v5349_v16  ;;  %v872_v16 = vld [vmem:[#allocation7 + $0x408] sm:$0xff] }
  0xd0   :  { %3873 = vmatprep.subr.bf16.mxu0 %v5358_v20  ;;  %4036 = vmatpush1.bf16.msra.mxu1 %v5351_v31  ;;  %v876_v20 = vld [vmem:[#allocation7 + $0x428] sm:$0xff]  ;;  %v6411_v31 = vld [vmem:[#allocation5] sm:$0xff] }
  0xd1   :  { %4037 = vmatprep.subr.bf16.mxu1 %v5360_v32  ;;  %v5424_v29 = vcombine.high %v872_v16, %v876_v20  ;;  %v180_v32 = vsub.s32 1, %v6390_v39 }
  0xd3   :  { %3874 = vmatpush1.bf16.msra.mxu0 %v5357_v25  ;;  %v5423_v25 = vcombine.low %v872_v16, %v876_v20  ;;  %v181_v34 = vrot.slane %v6411_v31, %v180_v32  ;;  %v5456_v20 = vcombine.high %v904_v14, %v908_v15 }
  0xd4   :  { %3875 = vmatprep.subr.bf16.mxu0 %v5366_v28  ;;  %4038 = vmatpush1.bf16.msra.mxu1 %v5359_v40  ;;  %v5415_v28 = vcombine.low %v864_v21, %v868_v22  ;;  %v911_v21 = vld [vmem:[#allocation7 + $0x540] sm:$0xff] }
  0xd5   :  { %4039 = vmatprep.subr.bf16.mxu1 %v5368_v41  ;;  %v915_v22 = vld [vmem:[#allocation7 + $0x560] sm:$0xff] }
  0xd7   :  { %3876 = vmatpush1.bf16.msra.mxu0 %v5365_v33  ;;  %v177_v33 = vrot.slane %v6411_v31, %v176_v30 }
  0xd8   :  { %3877 = vmatprep.subr.bf16.mxu0 %v5374_v36  ;;  %4040 = vmatpush1.bf16.msra.mxu1 %v5367_v48  ;;  %v884_v48 = vld [vmem:[#allocation7 + $0x468] sm:$0xff] }
  0xd9   :  { %4041 = vmatprep.subr.bf16.mxu1 %v5376_v49  ;;  %v189_v49 = vrot.slane %v6411_v31, %v188_v38  ;;  %v5431_v61 = vcombine.low %v880_v47, %v884_v48 }
  0xdb   :  { %3878 = vmatpush1.bf16.msra.mxu0 %v5373_v42 }
  0xdc   :  { %3879 = vmatprep.subr.bf16.mxu0 %v5382_v45  ;;  %4042 = vmatpush1.bf16.msra.mxu1 %v5375_v56  ;;  %v891_v56 = vld [vmem:[#allocation7 + $0x4a0] sm:$0xff] }
  0xdd   :  { %4043 = vmatprep.subr.bf16.mxu1 %v5384_v57  ;;  %v888_v57 = vld [vmem:[#allocation7 + $0x488] sm:$0xff] }
  0xdf   :  { %3880 = vmatpush1.bf16.msra.mxu0 %v5381_v50 }
  0xe0   :  { %3881 = vmatprep.subr.bf16.mxu0 %v5390_v53  ;;  %4044 = vmatpush1.bf16.msra.mxu1 %v5383_v60  ;;  %v5432_v53 = vcombine.high %v880_v47, %v884_v48  ;;  %v5429_v60 = vcombine.low %v879_v44, %v883_v46  ;;  %v928_v44 = vld [vmem:[#allocation7 + $0x5c8] sm:$0xff] }
  0xe1   :  { %4045 = vmatprep.subr.bf16.mxu1 %v5392_v63  ;;  %v5438_v63 = vcombine.high %v887_v54, %v891_v56 }
  0xe3   :  { %3882 = vmatpush1.bf16.msra.mxu0 %v5389_v58  ;;  %v892_v58 = vld [vmem:[#allocation7 + $0x4a8] sm:$0xff] }
  0xe4   :  { %3883 = vmatprep.subr.bf16.mxu0 %v5398_v0  ;;  %4046 = vmatpush1.bf16.msra.mxu1 %v5391_v5  ;;  %v896_v5 = vld [vmem:[#allocation7 + $0x4c8] sm:$0xff] }
  0xe5   :  { %4047 = vmatprep.subr.bf16.mxu1 %v5400_v8  ;;  %v5437_v8 = vcombine.low %v887_v54, %v891_v56  ;;  %v5448_v11 = vcombine.high %v896_v5, %v900_v6  ;;  %v936_v54 = vld [vmem:[#allocation7 + $0x608] sm:$0xff] }
  0xe6   :  { %v940_v56 = vld [vmem:[#allocation7 + $0x628] sm:$0xff] }
  0xe7   :  { %3884 = vmatpush1.bf16.msra.mxu0 %v5397_v1  ;;  %v5440_v1 = vcombine.high %v888_v57, %v892_v58 }
  0xe8   :  { %3885 = vmatprep.subr.bf16.mxu0 %v5406_v4  ;;  %4048 = vmatpush1.bf16.msra.mxu1 %v5399_v13  ;;  %v899_v4 = vld [vmem:[#allocation7 + $0x4e0] sm:$0xff] }
  0xe9   :  { %4049 = vmatprep.subr.bf16.mxu1 %v5408_v17  ;;  %v5446_v10 = vcombine.high %v895_v2, %v899_v4  ;;  %v907_v13 = vld [vmem:[#allocation7 + $0x520] sm:$0xff]  ;;  %v5445_v16 = vcombine.low %v895_v2, %v899_v4  ;;  %v5447_v17 = vcombine.low %v896_v5, %v900_v6  ;;  %v944_v2 = vld [vmem:[#allocation7 + $0x648] sm:$0xff]  ;;  %v5487_v5 = vcombine.low %v936_v54, %v940_v56 }
  0xeb   :  { %3886 = vmatpush1.bf16.msra.mxu0 %v5405_v9  ;;  %v5439_v9 = vcombine.low %v888_v57, %v892_v58 }
  0xec   :  { %3887 = vmatprep.subr.bf16.mxu0 %v5414_v12  ;;  %4050 = vmatpush1.bf16.msra.mxu1 %v5407_v26  ;;  %v903_v12 = vld [vmem:[#allocation7 + $0x500] sm:$0xff]  ;;  %v5455_v26 = vcombine.low %v904_v14, %v908_v15 }
  0xed   :  { %4051 = vmatprep.subr.bf16.mxu1 %v5416_v27  ;;  %v5462_v27 = vcombine.high %v911_v21, %v915_v22 }
  0xef   :  { %3888 = vmatpush1.bf16.msra.mxu0 %v5413_v18  ;;  %v5454_v18 = vcombine.high %v903_v12, %v907_v13 }
  0xf0   :  { %3898 = vmatprep.subr.bf16.mxu0 %v5422_v24  ;;  %4052 = vmatpush1.bf16.msra.mxu1 %v5415_v28  ;;  %v916_v24 = vld [vmem:[#allocation7 + $0x568] sm:$0xff] }
  0xf1   :  { %4062 = vmatprep.subr.bf16.mxu1 %v5424_v29  ;;  %v919_v29 = vld [vmem:[#allocation7 + $0x580] sm:$0xff] }
 0x165   :  { %v597_v35 = vpop.f32.mrb[0].mxu0  ;;  %v6428_v55 = vpop.f32.mrb[0].mxu1 }
 0x166   :  { %v598_v36 = vadd.f32 %v597_v35, %v177_v33  ;;  %v599_v37 = vpop.f32.mrb[1].mxu0  ;;  %v640_v19 = vpop.f32.mrb[1].mxu1  ;;  %v923_v33 = vld [vmem:[#allocation7 + $0x5a0] sm:$0xff]  ;;  %v924_v35 = vld [vmem:[#allocation7 + $0x5a8] sm:$0xff] }
 0x167   :  { %v600_v40 = vadd.f32 %v599_v37, %v181_v34  ;;  %v601_v41 = vpop.f32.mrb[2].mxu0  ;;  %v641_v59 = vadd.f32 %v640_v19, %v189_v49  ;;  %v642_v0 = vpop.f32.mrb[2].mxu1  ;;  %v920_v34 = vld [vmem:[#allocation7 + $0x588] sm:$0xff]  ;;  %v5469_v46 = vcombine.low %v919_v29, %v923_v33 }
 0x168   :  { %v727_v42 = vmax.f32 %v598_v36, 0.0  ;;  %v602_v43 = vpop.f32.mrb[3].mxu0  ;;  %v643_v62 = vpop.f32.mrb[3].mxu1  ;;  %v5461_v36 = vcombine.low %v911_v21, %v915_v22  ;;  %v5472_v41 = vcombine.high %v920_v34, %v924_v35  ;;  %v5471_v47 = vcombine.low %v920_v34, %v924_v35  ;;  %v959_v22 = vld [vmem:[#allocation7 + $0x6c0] sm:$0xff]  ;;  %v968_v35 = vld [vmem:[#allocation7 + $0x708] sm:$0xff] }
 0x169   :  { %v728_v45 = vmax.f32 %v600_v40, 0.0  ;;  %v730_v3 = vmax.f32 %v641_v59, 0.0  ;;  %v5470_v40 = vcombine.high %v919_v29, %v923_v33  ;;  %v931_v43 = vld [vmem:[#allocation7 + $0x5e0] sm:$0xff] }
 0x16a   :  { %v6426_v51 = vpack.c.bf16 %v727_v42, %v727_v42  ;;  %v927_v42 = vld [vmem:[#allocation7 + $0x5c0] sm:$0xff] }
 0x16b   :  { %v6424_v50 = vpack.c.bf16 %v728_v45, %v728_v45  ;;  %v6434_v7 = vpack.c.bf16 %v730_v3, %v730_v3  ;;  %v932_v45 = vld [vmem:[#allocation7 + $0x5e8] sm:$0xff]  ;;  %v5478_v48 = vcombine.high %v927_v42, %v931_v43  ;;  %v5477_v19 = vcombine.low %v927_v42, %v931_v43  ;;  %v943_v62 = vld [vmem:[#allocation7 + $0x640] sm:$0xff] }
 0x16c   :  { %v5480_v49 = vcombine.high %v928_v44, %v932_v45  ;;  %v5479_v59 = vcombine.low %v928_v44, %v932_v45  ;;  %v948_v3 = vld [vmem:[#allocation7 + $0x668] sm:$0xff]  ;;  %v967_v33 = vld [vmem:[#allocation7 + $0x700] sm:$0xff] }
 0x16d   :  { %3889 = vmatprep.mubr.bf16.mxu0 %v6424_v50  ;;  %4053 = vmatprep.mubr.bf16.mxu1 %v6424_v50  ;;  %v971_v34 = vld [vmem:[#allocation7 + $0x720] sm:$0xff]  ;;  %v976_v45 = vld [vmem:[#allocation7 + $0x748] sm:$0xff] }
 0x16e   :  { %3890 = vmatmul.mubr.bf16.vlgmr.msra.gmra.mrb[8].mxu0 %v6426_v51  ;;  %4054 = vmatmul.mubr.bf16.vlgmr.msra.gmra.mrb[8].mxu1 %v6426_v51  ;;  %v975_v43 = vld [vmem:[#allocation7 + $0x740] sm:$0xff] }
 0x16f   :  { %3899 = vmatpush1.bf16.msra.mxu0 %v5421_v23  ;;  %4063 = vmatpush1.bf16.msra.mxu1 %v5423_v25  ;;  %v912_v23 = vld [vmem:[#allocation7 + $0x548] sm:$0xff]  ;;  %v5453_v25 = vcombine.low %v903_v12, %v907_v13  ;;  %v979_v44 = vld [vmem:[#allocation7 + $0x760] sm:$0xff] }
 0x170   :  { %3900 = vmatprep.subr.bf16.mxu0 %v5430_v52  ;;  %4064 = vmatprep.subr.bf16.mxu1 %v5432_v53  ;;  %v5464_v28 = vcombine.high %v912_v23, %v916_v24  ;;  %v5463_v37 = vcombine.low %v912_v23, %v916_v24  ;;  %v935_v52 = vld [vmem:[#allocation7 + $0x600] sm:$0xff]  ;;  %v952_v12 = vld [vmem:[#allocation7 + $0x688] sm:$0xff] }
 0x171   :  { %3930 = vmatprep.mubr.bf16.mxu0 %v6434_v7  ;;  %4094 = vmatprep.mubr.bf16.mxu1 %v6434_v7  ;;  %v939_v53 = vld [vmem:[#allocation7 + $0x620] sm:$0xff]  ;;  %v956_v13 = vld [vmem:[#allocation7 + $0x6a8] sm:$0xff] }
 0x172   :  { %v5485_v4 = vcombine.low %v935_v52, %v939_v53  ;;  %v5504_v21 = vcombine.high %v952_v12, %v956_v13  ;;  %v963_v23 = vld [vmem:[#allocation7 + $0x6e0] sm:$0xff]  ;;  %v960_v24 = vld [vmem:[#allocation7 + $0x6c8] sm:$0xff] }
 0x173   :  { %3901 = vmatpush1.bf16.msra.mxu0 %v5429_v60  ;;  %4065 = vmatpush1.bf16.msra.mxu1 %v5431_v61  ;;  %v5486_v60 = vcombine.high %v935_v52, %v939_v53  ;;  %v5488_v61 = vcombine.high %v936_v54, %v940_v56  ;;  %v5526_v52 = vcombine.high %v975_v43, %v979_v44  ;;  %v983_v54 = vld [vmem:[#allocation7 + $0x780] sm:$0xff] }
 0x174   :  { %3902 = vmatprep.subr.bf16.mxu0 %v5438_v63  ;;  %4066 = vmatprep.subr.bf16.mxu1 %v5440_v1  ;;  %v947_v1 = vld [vmem:[#allocation7 + $0x660] sm:$0xff] }
 0x175   :  { %v5494_v6 = vcombine.high %v943_v62, %v947_v1  ;;  %v987_v56 = vld [vmem:[#allocation7 + $0x7a0] sm:$0xff] }
 0x177   :  { %3903 = vmatpush1.bf16.msra.mxu0 %v5437_v8  ;;  %4067 = vmatpush1.bf16.msra.mxu1 %v5439_v9  ;;  %v5496_v8 = vcombine.high %v944_v2, %v948_v3  ;;  %v951_v9 = vld [vmem:[#allocation7 + $0x680] sm:$0xff] }
 0x178   :  { %3904 = vmatprep.subr.bf16.mxu0 %v5446_v10  ;;  %4068 = vmatprep.subr.bf16.mxu1 %v5448_v11  ;;  %v955_v11 = vld [vmem:[#allocation7 + $0x6a0] sm:$0xff] }
 0x17b   :  { %3905 = vmatpush1.bf16.msra.mxu0 %v5445_v16  ;;  %4069 = vmatpush1.bf16.msra.mxu1 %v5447_v17  ;;  %v5493_v16 = vcombine.low %v943_v62, %v947_v1  ;;  %v5495_v17 = vcombine.low %v944_v2, %v948_v3  ;;  %v991_v2 = vld [vmem:[#allocation7 + $0x7c0] sm:$0xff] }
 0x17c   :  { %3906 = vmatprep.subr.bf16.mxu0 %v5454_v18  ;;  %4070 = vmatprep.subr.bf16.mxu1 %v5456_v20  ;;  %v5502_v20 = vcombine.high %v951_v9, %v955_v11  ;;  %v995_v3 = vld [vmem:[#allocation7 + $0x7e0] sm:$0xff] }
 0x17f   :  { %3907 = vmatpush1.bf16.msra.mxu0 %v5453_v25  ;;  %4071 = vmatpush1.bf16.msra.mxu1 %v5455_v26  ;;  %v964_v25 = vld [vmem:[#allocation7 + $0x6e8] sm:$0xff]  ;;  %v5501_v26 = vcombine.low %v951_v9, %v955_v11  ;;  %v5533_v9 = vcombine.low %v983_v54, %v987_v56 }
 0x180   :  { %3908 = vmatprep.subr.bf16.mxu0 %v5462_v27  ;;  %4072 = vmatprep.subr.bf16.mxu1 %v5464_v28  ;;  %v5503_v27 = vcombine.low %v952_v12, %v956_v13  ;;  %v5510_v28 = vcombine.high %v959_v22, %v963_v23  ;;  %v5512_v29 = vcombine.high %v960_v24, %v964_v25 }
 0x181   :  { %v5542_v12 = vcombine.high %v991_v2, %v995_v3 }
 0x183   :  { %3909 = vmatpush1.bf16.msra.mxu0 %v5461_v36  ;;  %4073 = vmatpush1.bf16.msra.mxu1 %v5463_v37  ;;  %v972_v36 = vld [vmem:[#allocation7 + $0x728] sm:$0xff]  ;;  %v5509_v37 = vcombine.low %v959_v22, %v963_v23  ;;  %v5541_v22 = vcombine.low %v991_v2, %v995_v3 }
 0x184   :  { %3910 = vmatprep.subr.bf16.mxu0 %v5470_v40  ;;  %4074 = vmatprep.subr.bf16.mxu1 %v5472_v41  ;;  %v5511_v40 = vcombine.low %v960_v24, %v964_v25  ;;  %v5518_v41 = vcombine.high %v967_v33, %v971_v34  ;;  %v5520_v42 = vcombine.high %v968_v35, %v972_v36  ;;  %v1007_v25 = vld [vmem:[#allocation7 + $0x840] sm:$0xff] }
 0x185   :  { %v6438_v57 = vpop.f32.mrb[4].mxu0 }
 0x186   :  { %v6440_v58 = vpop.f32.mrb[5].mxu0  ;;  %v6442_v10 = vpop.f32.mrb[4].mxu1 }
 0x187   :  { %3911 = vmatpush1.bf16.msra.mxu0 %v5469_v46  ;;  %4075 = vmatpush1.bf16.msra.mxu1 %v5471_v47  ;;  %v683_v0 = vpop.f32.mrb[6].mxu0  ;;  %v6444_v14 = vpop.f32.mrb[5].mxu1  ;;  %v980_v46 = vld [vmem:[#allocation7 + $0x768] sm:$0xff]  ;;  %v184_v47 = vsub.s32 2, %v6390_v39 }
 0x188   :  { %3912 = vmatprep.subr.bf16.mxu0 %v5478_v48  ;;  %4076 = vmatprep.subr.bf16.mxu1 %v5480_v49  ;;  %v684_v63 = vpop.f32.mrb[7].mxu0  ;;  %v724_v15 = vpop.f32.mrb[6].mxu1  ;;  %v5517_v48 = vcombine.low %v967_v33, %v971_v34  ;;  %v5519_v49 = vcombine.low %v968_v35, %v972_v36  ;;  %v5528_v53 = vcombine.high %v976_v45, %v980_v46  ;;  %v196_v0 = vsub.s32 5, %v6390_v39 }
 0x189   :  { %v725_v18 = vpop.f32.mrb[7].mxu1  ;;  %v5527_v62 = vcombine.low %v976_v45, %v980_v46  ;;  %v5534_v63 = vcombine.high %v983_v54, %v987_v56  ;;  %v999_v15 = vld [vmem:[#allocation7 + $0x800] sm:$0xff]  ;;  %v1028_v54 = vld [vmem:[#allocation7 + $0x8e8] sm:$0xff] }
 0x18a   :  { %v1004_v18 = vld [vmem:[#allocation7 + $0x828] sm:$0xff] }
 0x18b   :  { %3913 = vmatpush1.bf16.msra.mxu0 %v5477_v19  ;;  %4077 = vmatpush1.bf16.msra.mxu1 %v5479_v59  ;;  %v984_v19 = vld [vmem:[#allocation7 + $0x788] sm:$0xff] }
 0x18c   :  { %3914 = vmatprep.subr.bf16.mxu0 %v5486_v60  ;;  %4078 = vmatprep.subr.bf16.mxu1 %v5488_v61  ;;  %v988_v59 = vld [vmem:[#allocation7 + $0x7a8] sm:$0xff]  ;;  %v185_v60 = vrot.slane %v6411_v31, %v184_v47  ;;  %v5525_v61 = vcombine.low %v975_v43, %v979_v44 }
 0x18d   :  { %v5536_v1 = vcombine.high %v984_v19, %v988_v59  ;;  %v5535_v11 = vcombine.low %v984_v19, %v988_v59 }
 0x18f   :  { %3915 = vmatpush1.bf16.msra.mxu0 %v5485_v4  ;;  %4079 = vmatpush1.bf16.msra.mxu1 %v5487_v5  ;;  %v992_v4 = vld [vmem:[#allocation7 + $0x7c8] sm:$0xff] }
 0x190   :  { %3916 = vmatprep.subr.bf16.mxu0 %v5494_v6  ;;  %4080 = vmatprep.subr.bf16.mxu1 %v5496_v8  ;;  %v996_v5 = vld [vmem:[#allocation7 + $0x7e8] sm:$0xff]  ;;  %v197_v6 = vrot.slane %v6411_v31, %v196_v0  ;;  %v639_v8 = vadd.f32 %v6428_v55, %v185_v60 }
 0x191   :  { %v5544_v13 = vcombine.high %v992_v4, %v996_v5  ;;  %v5543_v23 = vcombine.low %v992_v4, %v996_v5 }
 0x193   :  { %3917 = vmatpush1.bf16.msra.mxu0 %v5493_v16  ;;  %4081 = vmatpush1.bf16.msra.mxu1 %v5495_v17  ;;  %v1003_v16 = vld [vmem:[#allocation7 + $0x820] sm:$0xff]  ;;  %v1000_v17 = vld [vmem:[#allocation7 + $0x808] sm:$0xff] }
 0x194   :  { %3918 = vmatprep.subr.bf16.mxu0 %v5502_v20  ;;  %4082 = vmatprep.subr.bf16.mxu1 %v5504_v21  ;;  %v682_v20 = vadd.f32 %v6440_v58, %v197_v6  ;;  %v729_v21 = vmax.f32 %v639_v8, 0.0  ;;  %v5550_v55 = vcombine.high %v999_v15, %v1003_v16  ;;  %v5552_v24 = vcombine.high %v1000_v17, %v1004_v18  ;;  %v1039_v6 = vld [vmem:[#allocation7 + $0x940] sm:$0xff] }
 0x195   :  { %v5549_v34 = vcombine.low %v999_v15, %v1003_v16  ;;  %v5551_v58 = vcombine.low %v1000_v17, %v1004_v18  ;;  %v1043_v8 = vld [vmem:[#allocation7 + $0x960] sm:$0xff] }
 0x196   :  { %v6456_v33 = vpack.c.bf16 %v729_v21, %v729_v21  ;;  %v5590_v15 = vcombine.high %v1039_v6, %v1043_v8  ;;  %v1047_v17 = vld [vmem:[#allocation7 + $0x980] sm:$0xff]  ;;  %v1052_v21 = vld [vmem:[#allocation7 + $0x9a8] sm:$0xff] }
 0x197   :  { %3919 = vmatpush1.bf16.msra.mxu0 %v5501_v26  ;;  %4083 = vmatpush1.bf16.msra.mxu1 %v5503_v27  ;;  %v1011_v26 = vld [vmem:[#allocation7 + $0x860] sm:$0xff]  ;;  %v1008_v27 = vld [vmem:[#allocation7 + $0x848] sm:$0xff] }
 0x198   :  { %3920 = vmatprep.subr.bf16.mxu0 %v5510_v28  ;;  %4084 = vmatprep.subr.bf16.mxu1 %v5512_v29  ;;  %v1012_v28 = vld [vmem:[#allocation7 + $0x868] sm:$0xff]  ;;  %v732_v29 = vmax.f32 %v682_v20, 0.0  ;;  %v5558_v35 = vcombine.high %v1007_v25, %v1011_v26  ;;  %v5557_v44 = vcombine.low %v1007_v25, %v1011_v26  ;;  %v1051_v18 = vld [vmem:[#allocation7 + $0x9a0] sm:$0xff] }
 0x199   :  { %v5560_v36 = vcombine.high %v1008_v27, %v1012_v28  ;;  %v5559_v45 = vcombine.low %v1008_v27, %v1012_v28  ;;  %v1048_v20 = vld [vmem:[#allocation7 + $0x988] sm:$0xff]  ;;  %v1055_v25 = vld [vmem:[#allocation7 + $0x9c0] sm:$0xff] }
 0x19a   :  { %v6458_v43 = vpack.c.bf16 %v732_v29, %v732_v29  ;;  %v1059_v26 = vld [vmem:[#allocation7 + $0x9e0] sm:$0xff]  ;;  %v1056_v27 = vld [vmem:[#allocation7 + $0x9c8] sm:$0xff]  ;;  %v5597_v29 = vcombine.low %v1047_v17, %v1051_v18 }
 0x19b   :  { %3921 = vmatpush1.bf16.msra.mxu0 %v5509_v37  ;;  %4085 = vmatpush1.bf16.msra.mxu1 %v5511_v40  ;;  %v1015_v37 = vld [vmem:[#allocation7 + $0x880] sm:$0xff]  ;;  %v1060_v28 = vld [vmem:[#allocation7 + $0x9e8] sm:$0xff] }
 0x19c   :  { %3922 = vmatprep.subr.bf16.mxu0 %v5518_v41  ;;  %4086 = vmatprep.subr.bf16.mxu1 %v5520_v42  ;;  %v1019_v40 = vld [vmem:[#allocation7 + $0x8a0] sm:$0xff]  ;;  %v1016_v41 = vld [vmem:[#allocation7 + $0x888] sm:$0xff] }
 0x19d   :  { %v1020_v42 = vld [vmem:[#allocation7 + $0x8a8] sm:$0xff]  ;;  %v5566_v46 = vcombine.high %v1015_v37, %v1019_v40  ;;  %v5565_v56 = vcombine.low %v1015_v37, %v1019_v40  ;;  %v1067_v37 = vld [vmem:[#allocation7 + $0xa20] sm:$0xff] }
 0x19e   :  { %v5567_v19 = vcombine.low %v1016_v41, %v1020_v42  ;;  %v1064_v40 = vld [vmem:[#allocation7 + $0xa08] sm:$0xff] }
 0x19f   :  { %3923 = vmatpush1.bf16.msra.mxu0 %v5517_v48  ;;  %4087 = vmatpush1.bf16.msra.mxu1 %v5519_v49  ;;  %v5568_v48 = vcombine.high %v1016_v41, %v1020_v42  ;;  %v1023_v49 = vld [vmem:[#allocation7 + $0x8c0] sm:$0xff]  ;;  %v1068_v41 = vld [vmem:[#allocation7 + $0xa28] sm:$0xff]  ;;  %v5605_v42 = vcombine.low %v1055_v25, %v1059_v26 }
 0x1a0   :  { %3924 = vmatprep.subr.bf16.mxu0 %v5526_v52  ;;  %4088 = vmatprep.subr.bf16.mxu1 %v5528_v53  ;;  %v1027_v52 = vld [vmem:[#allocation7 + $0x8e0] sm:$0xff]  ;;  %v1024_v53 = vld [vmem:[#allocation7 + $0x8c8] sm:$0xff] }
 0x1a1   :  { %v5574_v59 = vcombine.high %v1023_v49, %v1027_v52  ;;  %v5576_v60 = vcombine.high %v1024_v53, %v1028_v54  ;;  %v5573_v2 = vcombine.low %v1023_v49, %v1027_v52  ;;  %v5575_v3 = vcombine.low %v1024_v53, %v1028_v54  ;;  %v1075_v49 = vld [vmem:[#allocation7 + $0xa60] sm:$0xff]  ;;  %v1072_v52 = vld [vmem:[#allocation7 + $0xa48] sm:$0xff] }
 0x1a2   :  { %v1076_v53 = vld [vmem:[#allocation7 + $0xa68] sm:$0xff] }
 0x1a3   :  { %3925 = vmatpush1.bf16.msra.mxu0 %v5525_v61  ;;  %4089 = vmatpush1.bf16.msra.mxu1 %v5527_v62  ;;  %v1031_v61 = vld [vmem:[#allocation7 + $0x900] sm:$0xff] }
 0x1a4   :  { %3926 = vmatprep.subr.bf16.mxu0 %v5534_v63  ;;  %4090 = vmatprep.subr.bf16.mxu1 %v5536_v1  ;;  %v1035_v62 = vld [vmem:[#allocation7 + $0x920] sm:$0xff]  ;;  %v1032_v63 = vld [vmem:[#allocation7 + $0x908] sm:$0xff] }
 0x1a5   :  { %v1036_v1 = vld [vmem:[#allocation7 + $0x928] sm:$0xff]  ;;  %v5582_v4 = vcombine.high %v1031_v61, %v1035_v62 }
 0x1a6   :  { %v5584_v5 = vcombine.high %v1032_v63, %v1036_v1 }
 0x1a7   :  { %3927 = vmatpush1.bf16.msra.mxu0 %v5533_v9  ;;  %4091 = vmatpush1.bf16.msra.mxu1 %v5535_v11  ;;  %v1040_v9 = vld [vmem:[#allocation7 + $0x948] sm:$0xff] }
 0x1a8   :  { %3928 = vmatprep.subr.bf16.mxu0 %v5542_v12  ;;  %4092 = vmatprep.subr.bf16.mxu1 %v5544_v13  ;;  %v1044_v11 = vld [vmem:[#allocation7 + $0x968] sm:$0xff]  ;;  %v5581_v12 = vcombine.low %v1031_v61, %v1035_v62  ;;  %v5583_v13 = vcombine.low %v1032_v63, %v1036_v1  ;;  %v1083_v61 = vld [vmem:[#allocation7 + $0xaa0] sm:$0xff] }
 0x1a9   :  { %v5592_v16 = vcombine.high %v1040_v9, %v1044_v11  ;;  %v1080_v62 = vld [vmem:[#allocation7 + $0xa88] sm:$0xff] }
 0x1aa   :  { %v1084_v63 = vld [vmem:[#allocation7 + $0xaa8] sm:$0xff] }
 0x1ab   :  { %3929 = vmatpush1.bf16.msra.mxu0 %v5541_v22  ;;  %4093 = vmatpush1.bf16.msra.mxu1 %v5543_v23  ;;  %v5589_v22 = vcombine.low %v1039_v6, %v1043_v8  ;;  %v5591_v23 = vcombine.low %v1040_v9, %v1044_v11  ;;  %v1091_v6 = vld [vmem:[#allocation7 + $0xae0] sm:$0xff]  ;;  %v1088_v8 = vld [vmem:[#allocation7 + $0xac8] sm:$0xff] }
 0x1ac   :  { %3939 = vmatprep.subr.bf16.mxu0 %v5550_v55  ;;  %4103 = vmatprep.subr.bf16.mxu1 %v5552_v24  ;;  %v5598_v55 = vcombine.high %v1047_v17, %v1051_v18  ;;  %v5600_v24 = vcombine.high %v1048_v20, %v1052_v21  ;;  %v1092_v9 = vld [vmem:[#allocation7 + $0xae8] sm:$0xff]  ;;  %v1099_v17 = vld [vmem:[#allocation7 + $0xb20] sm:$0xff] }
 0x1ad   :  { %v1096_v18 = vld [vmem:[#allocation7 + $0xb08] sm:$0xff] }
 0x1ae   :  { %3931 = vmatmul.mubr.bf16.vlgmr.msra.gmra.mrb[8].mxu0 %v6456_v33  ;;  %4095 = vmatmul.mubr.bf16.vlgmr.msra.gmra.mrb[8].mxu1 %v6456_v33 }
 0x1af   :  { %3940 = vmatpush1.bf16.msra.mxu0 %v5549_v34  ;;  %4104 = vmatpush1.bf16.msra.mxu1 %v5551_v58  ;;  %v5599_v34 = vcombine.low %v1048_v20, %v1052_v21  ;;  %v5606_v58 = vcombine.high %v1055_v25, %v1059_v26  ;;  %v1100_v20 = vld [vmem:[#allocation7 + $0xb28] sm:$0xff]  ;;  %v1107_v25 = vld [vmem:[#allocation7 + $0xb60] sm:$0xff] }
 0x1b0   :  { %3941 = vmatprep.subr.bf16.mxu0 %v5558_v35  ;;  %4105 = vmatprep.subr.bf16.mxu1 %v5560_v36  ;;  %v5608_v35 = vcombine.high %v1056_v27, %v1060_v28  ;;  %v1063_v36 = vld [vmem:[#allocation7 + $0xa00] sm:$0xff]  ;;  %v1104_v26 = vld [vmem:[#allocation7 + $0xb48] sm:$0xff] }
 0x1b1   :  { %3971 = vmatprep.mubr.bf16.mxu0 %v6458_v43  ;;  %4135 = vmatprep.mubr.bf16.mxu1 %v6458_v43  ;;  %v5613_v54 = vcombine.low %v1063_v36, %v1067_v37 }
 0x1b3   :  { %3942 = vmatpush1.bf16.msra.mxu0 %v5557_v44  ;;  %4106 = vmatpush1.bf16.msra.mxu1 %v5559_v45  ;;  %v5607_v44 = vcombine.low %v1056_v27, %v1060_v28  ;;  %v5614_v45 = vcombine.high %v1063_v36, %v1067_v37  ;;  %v1108_v27 = vld [vmem:[#allocation7 + $0xb68] sm:$0xff]  ;;  %v192_v28 = vsub.s32 4, %v6390_v39  ;;  %v1111_v36 = vld [vmem:[#allocation7 + $0xb80] sm:$0xff] }
 0x1b4   :  { %3943 = vmatprep.subr.bf16.mxu0 %v5566_v46  ;;  %4107 = vmatprep.subr.bf16.mxu1 %v5568_v48  ;;  %v5616_v46 = vcombine.high %v1064_v40, %v1068_v41  ;;  %v1071_v48 = vld [vmem:[#allocation7 + $0xa40] sm:$0xff] }
 0x1b5   :  { %v5621_v1 = vcombine.low %v1071_v48, %v1075_v49  ;;  %v1115_v37 = vld [vmem:[#allocation7 + $0xba0] sm:$0xff] }
 0x1b7   :  { %3944 = vmatpush1.bf16.msra.mxu0 %v5565_v56  ;;  %4108 = vmatpush1.bf16.msra.mxu1 %v5567_v19  ;;  %v5615_v56 = vcombine.low %v1064_v40, %v1068_v41  ;;  %v5622_v19 = vcombine.high %v1071_v48, %v1075_v49  ;;  %v1112_v40 = vld [vmem:[#allocation7 + $0xb88] sm:$0xff]  ;;  %v5662_v48 = vcombine.high %v1111_v36, %v1115_v37 }
 0x1b8   :  { %3945 = vmatprep.subr.bf16.mxu0 %v5574_v59  ;;  %4109 = vmatprep.subr.bf16.mxu1 %v5576_v60  ;;  %v5624_v59 = vcombine.high %v1072_v52, %v1076_v53  ;;  %v1079_v60 = vld [vmem:[#allocation7 + $0xa80] sm:$0xff]  ;;  %v1116_v41 = vld [vmem:[#allocation7 + $0xba8] sm:$0xff] }
 0x1b9   :  { %v5629_v11 = vcombine.low %v1079_v60, %v1083_v61  ;;  %v5664_v49 = vcombine.high %v1112_v40, %v1116_v41 }
 0x1bb   :  { %3946 = vmatpush1.bf16.msra.mxu0 %v5573_v2  ;;  %4110 = vmatpush1.bf16.msra.mxu1 %v5575_v3  ;;  %v5623_v2 = vcombine.low %v1072_v52, %v1076_v53  ;;  %v5630_v3 = vcombine.high %v1079_v60, %v1083_v61  ;;  %v1119_v52 = vld [vmem:[#allocation7 + $0xbc0] sm:$0xff]  ;;  %v5661_v60 = vcombine.low %v1111_v36, %v1115_v37  ;;  %v1152_v36 = vld [vmem:[#allocation7 + $0xcc8] sm:$0xff] }
 0x1bc   :  { %3947 = vmatprep.subr.bf16.mxu0 %v5582_v4  ;;  %4111 = vmatprep.subr.bf16.mxu1 %v5584_v5  ;;  %v5632_v4 = vcombine.high %v1080_v62, %v1084_v63  ;;  %v1087_v5 = vld [vmem:[#allocation7 + $0xac0] sm:$0xff]  ;;  %v5663_v61 = vcombine.low %v1112_v40, %v1116_v41  ;;  %v1156_v37 = vld [vmem:[#allocation7 + $0xce8] sm:$0xff] }
 0x1bd   :  { %v5637_v21 = vcombine.low %v1087_v5, %v1091_v6  ;;  %v1123_v53 = vld [vmem:[#allocation7 + $0xbe0] sm:$0xff] }
 0x1bf   :  { %3948 = vmatpush1.bf16.msra.mxu0 %v5581_v12  ;;  %4112 = vmatpush1.bf16.msra.mxu1 %v5583_v13  ;;  %v5631_v12 = vcombine.low %v1080_v62, %v1084_v63  ;;  %v5638_v13 = vcombine.high %v1087_v5, %v1091_v6  ;;  %v5670_v62 = vcombine.high %v1119_v52, %v1123_v53 }
 0x1c0   :  { %3949 = vmatprep.subr.bf16.mxu0 %v5590_v15  ;;  %4113 = vmatprep.subr.bf16.mxu1 %v5592_v16  ;;  %v5640_v15 = vcombine.high %v1088_v8, %v1092_v9  ;;  %v1095_v16 = vld [vmem:[#allocation7 + $0xb00] sm:$0xff] }
 0x1c3   :  { %3950 = vmatpush1.bf16.msra.mxu0 %v5589_v22  ;;  %4114 = vmatpush1.bf16.msra.mxu1 %v5591_v23  ;;  %v5639_v22 = vcombine.low %v1088_v8, %v1092_v9  ;;  %v5646_v23 = vcombine.high %v1095_v16, %v1099_v17 }
 0x1c4   :  { %3951 = vmatprep.subr.bf16.mxu0 %v5598_v55  ;;  %4115 = vmatprep.subr.bf16.mxu1 %v5600_v24  ;;  %v5648_v55 = vcombine.high %v1096_v18, %v1100_v20  ;;  %v1103_v24 = vld [vmem:[#allocation7 + $0xb40] sm:$0xff] }
 0x1c7   :  { %3952 = vmatpush1.bf16.msra.mxu0 %v5597_v29  ;;  %4116 = vmatpush1.bf16.msra.mxu1 %v5599_v34  ;;  %v5645_v29 = vcombine.low %v1095_v16, %v1099_v17  ;;  %v5647_v34 = vcombine.low %v1096_v18, %v1100_v20 }
 0x1c8   :  { %3953 = vmatprep.subr.bf16.mxu0 %v5606_v58  ;;  %4117 = vmatprep.subr.bf16.mxu1 %v5608_v35  ;;  %v5654_v58 = vcombine.high %v1103_v24, %v1107_v25  ;;  %v5656_v35 = vcombine.high %v1104_v26, %v1108_v27 }
 0x1cb   :  { %3954 = vmatpush1.bf16.msra.mxu0 %v5605_v42  ;;  %4118 = vmatpush1.bf16.msra.mxu1 %v5607_v44  ;;  %v204_v42 = vsub.s32 7, %v6390_v39  ;;  %v193_v44 = vrot.slane %v6411_v31, %v192_v28 }
 0x1cc   :  { %3955 = vmatprep.subr.bf16.mxu0 %v5614_v45  ;;  %4119 = vmatprep.subr.bf16.mxu1 %v5616_v46  ;;  %v5653_v45 = vcombine.low %v1103_v24, %v1107_v25  ;;  %v5655_v46 = vcombine.low %v1104_v26, %v1108_v27  ;;  %v1148_v24 = vld [vmem:[#allocation7 + $0xca8] sm:$0xff] }
 0x1cf   :  { %3956 = vmatpush1.bf16.msra.mxu0 %v5613_v54  ;;  %4120 = vmatpush1.bf16.msra.mxu1 %v5615_v56  ;;  %v1120_v54 = vld [vmem:[#allocation7 + $0xbc8] sm:$0xff] }
 0x1d0   :  { %3957 = vmatprep.subr.bf16.mxu0 %v5622_v19  ;;  %4121 = vmatprep.subr.bf16.mxu1 %v5624_v59  ;;  %v1124_v56 = vld [vmem:[#allocation7 + $0xbe8] sm:$0xff]  ;;  %v205_v19 = vrot.slane %v6411_v31, %v204_v42  ;;  %v680_v59 = vadd.f32 %v6438_v57, %v193_v44  ;;  %v5669_v31 = vcombine.low %v1119_v52, %v1123_v53 }
 0x1d1   :  { %v5672_v63 = vcombine.high %v1120_v54, %v1124_v56  ;;  %v5671_v8 = vcombine.low %v1120_v54, %v1124_v56  ;;  %v1164_v52 = vld [vmem:[#allocation7 + $0xd28] sm:$0xff]  ;;  %v5703_v54 = vcombine.low %v1152_v36, %v1156_v37 }
 0x1d2   :  { %v723_v5 = vadd.f32 %v6444_v14, %v205_v19  ;;  %v731_v6 = vmax.f32 %v680_v59, 0.0  ;;  %v1167_v59 = vld [vmem:[#allocation7 + $0xd40] sm:$0xff] }
 0x1d3   :  { %3958 = vmatpush1.bf16.msra.mxu0 %v5621_v1  ;;  %4122 = vmatpush1.bf16.msra.mxu1 %v5623_v2  ;;  %v1127_v1 = vld [vmem:[#allocation7 + $0xc00] sm:$0xff] }
 0x1d4   :  { %3959 = vmatprep.subr.bf16.mxu0 %v5630_v3  ;;  %4123 = vmatprep.subr.bf16.mxu1 %v5632_v4  ;;  %v1131_v2 = vld [vmem:[#allocation7 + $0xc20] sm:$0xff]  ;;  %v1128_v3 = vld [vmem:[#allocation7 + $0xc08] sm:$0xff]  ;;  %v734_v16 = vmax.f32 %v723_v5, 0.0  ;;  %v6474_v17 = vpack.c.bf16 %v731_v6, %v731_v6 }
 0x1d5   :  { %v1132_v4 = vld [vmem:[#allocation7 + $0xc28] sm:$0xff]  ;;  %v5678_v57 = vcombine.high %v1127_v1, %v1131_v2  ;;  %v5677_v18 = vcombine.low %v1127_v1, %v1131_v2  ;;  %v1179_v5 = vld [vmem:[#allocation7 + $0xda0] sm:$0xff] }
 0x1d6   :  { %v5680_v9 = vcombine.high %v1128_v3, %v1132_v4  ;;  %v5679_v14 = vcombine.low %v1128_v3, %v1132_v4  ;;  %v6476_v25 = vpack.c.bf16 %v734_v16, %v734_v16  ;;  %v1175_v4 = vld [vmem:[#allocation7 + $0xd80] sm:$0xff]  ;;  %v1176_v6 = vld [vmem:[#allocation7 + $0xd88] sm:$0xff] }
 0x1d7   :  { %3960 = vmatpush1.bf16.msra.mxu0 %v5629_v11  ;;  %4124 = vmatpush1.bf16.msra.mxu1 %v5631_v12  ;;  %v1135_v11 = vld [vmem:[#allocation7 + $0xc40] sm:$0xff]  ;;  %v1188_v16 = vld [vmem:[#allocation7 + $0xde8] sm:$0xff] }
 0x1d8   :  { %3961 = vmatprep.subr.bf16.mxu0 %v5638_v13  ;;  %4125 = vmatprep.subr.bf16.mxu1 %v5640_v15  ;;  %v1139_v12 = vld [vmem:[#allocation7 + $0xc60] sm:$0xff]  ;;  %v1136_v13 = vld [vmem:[#allocation7 + $0xc48] sm:$0xff] }
 0x1d9   :  { %v1140_v15 = vld [vmem:[#allocation7 + $0xc68] sm:$0xff]  ;;  %v5686_v20 = vcombine.high %v1135_v11, %v1139_v12  ;;  %v5685_v26 = vcombine.low %v1135_v11, %v1139_v12  ;;  %v1183_v12 = vld [vmem:[#allocation7 + $0xdc0] sm:$0xff] }
 0x1da   :  { %v5687_v27 = vcombine.low %v1136_v13, %v1140_v15 }
 0x1db   :  { %3962 = vmatpush1.bf16.msra.mxu0 %v5637_v21  ;;  %4126 = vmatpush1.bf16.msra.mxu1 %v5639_v22  ;;  %v5688_v21 = vcombine.high %v1136_v13, %v1140_v15  ;;  %v1143_v22 = vld [vmem:[#allocation7 + $0xc80] sm:$0xff]  ;;  %v1184_v15 = vld [vmem:[#allocation7 + $0xdc8] sm:$0xff] }
 0x1dc   :  { %3963 = vmatprep.subr.bf16.mxu0 %v5646_v23  ;;  %4127 = vmatprep.subr.bf16.mxu1 %v5648_v55  ;;  %v1147_v23 = vld [vmem:[#allocation7 + $0xca0] sm:$0xff]  ;;  %v1144_v55 = vld [vmem:[#allocation7 + $0xc88] sm:$0xff] }
 0x1dd   :  { %v5693_v40 = vcombine.low %v1143_v22, %v1147_v23  ;;  %v5695_v41 = vcombine.low %v1144_v55, %v1148_v24  ;;  %v1187_v13 = vld [vmem:[#allocation7 + $0xde0] sm:$0xff] }
 0x1df   :  { %3964 = vmatpush1.bf16.msra.mxu0 %v5645_v29  ;;  %4128 = vmatpush1.bf16.msra.mxu1 %v5647_v34  ;;  %v5694_v29 = vcombine.high %v1143_v22, %v1147_v23  ;;  %v5696_v34 = vcombine.high %v1144_v55, %v1148_v24  ;;  %v1191_v22 = vld [vmem:[#allocation7 + $0xe00] sm:$0xff]  ;;  %v1192_v55 = vld [vmem:[#allocation7 + $0xe08] sm:$0xff] }
 0x1e0   :  { %3965 = vmatprep.subr.bf16.mxu0 %v5654_v58  ;;  %4129 = vmatprep.subr.bf16.mxu1 %v5656_v35  ;;  %v1151_v58 = vld [vmem:[#allocation7 + $0xcc0] sm:$0xff]  ;;  %v1196_v24 = vld [vmem:[#allocation7 + $0xe28] sm:$0xff] }
 0x1e1   :  { %v1155_v35 = vld [vmem:[#allocation7 + $0xce0] sm:$0xff] }
 0x1e2   :  { %v5702_v44 = vcombine.high %v1151_v58, %v1155_v35  ;;  %v5701_v53 = vcombine.low %v1151_v58, %v1155_v35  ;;  %v1195_v23 = vld [vmem:[#allocation7 + $0xe20] sm:$0xff] }
 0x1e3   :  { %3966 = vmatpush1.bf16.msra.mxu0 %v5653_v45  ;;  %4130 = vmatpush1.bf16.msra.mxu1 %v5655_v46  ;;  %v5704_v45 = vcombine.high %v1152_v36, %v1156_v37  ;;  %v1159_v46 = vld [vmem:[#allocation7 + $0xd00] sm:$0xff]  ;;  %v1200_v36 = vld [vmem:[#allocation7 + $0xe48] sm:$0xff] }
 0x1e4   :  { %3967 = vmatprep.subr.bf16.mxu0 %v5662_v48  ;;  %4131 = vmatprep.subr.bf16.mxu1 %v5664_v49  ;;  %v1163_v48 = vld [vmem:[#allocation7 + $0xd20] sm:$0xff]  ;;  %v1160_v49 = vld [vmem:[#allocation7 + $0xd08] sm:$0xff] }
 0x1e5   :  { %v5710_v56 = vcombine.high %v1159_v46, %v1163_v48  ;;  %v5712_v19 = vcombine.high %v1160_v49, %v1164_v52  ;;  %v5711_v1 = vcombine.low %v1160_v49, %v1164_v52  ;;  %v1199_v58 = vld [vmem:[#allocation7 + $0xe40] sm:$0xff]  ;;  %v1204_v37 = vld [vmem:[#allocation7 + $0xe68] sm:$0xff] }
 0x1e6   :  { %v1203_v35 = vld [vmem:[#allocation7 + $0xe60] sm:$0xff]  ;;  %v1208_v49 = vld [vmem:[#allocation7 + $0xe88] sm:$0xff] }
 0x1e7   :  { %3968 = vmatpush1.bf16.msra.mxu0 %v5661_v60  ;;  %4132 = vmatpush1.bf16.msra.mxu1 %v5663_v61  ;;  %v1171_v60 = vld [vmem:[#allocation7 + $0xd60] sm:$0xff]  ;;  %v1168_v61 = vld [vmem:[#allocation7 + $0xd48] sm:$0xff] }
 0x1e8   :  { %3969 = vmatprep.subr.bf16.mxu0 %v5670_v62  ;;  %4133 = vmatprep.subr.bf16.mxu1 %v5672_v63  ;;  %v1172_v62 = vld [vmem:[#allocation7 + $0xd68] sm:$0xff]  ;;  %v5709_v63 = vcombine.low %v1159_v46, %v1163_v48  ;;  %v5718_v2 = vcombine.high %v1167_v59, %v1171_v60  ;;  %v1207_v46 = vld [vmem:[#allocation7 + $0xe80] sm:$0xff] }
 0x1e9   :  { %v5720_v3 = vcombine.high %v1168_v61, %v1172_v62  ;;  %v1211_v48 = vld [vmem:[#allocation7 + $0xea0] sm:$0xff]  ;;  %v1212_v52 = vld [vmem:[#allocation7 + $0xea8] sm:$0xff] }
 0x1eb   :  { %3970 = vmatpush1.bf16.msra.mxu0 %v5669_v31  ;;  %4134 = vmatpush1.bf16.msra.mxu1 %v5671_v8  ;;  %v1180_v31 = vld [vmem:[#allocation7 + $0xda8] sm:$0xff]  ;;  %v5717_v8 = vcombine.low %v1167_v59, %v1171_v60  ;;  %v1215_v59 = vld [vmem:[#allocation7 + $0xec0] sm:$0xff] }
 0x1ec   :  { %3980 = vmatprep.subr.bf16.mxu0 %v5678_v57  ;;  %4144 = vmatprep.subr.bf16.mxu1 %v5680_v9  ;;  %v5719_v57 = vcombine.low %v1168_v61, %v1172_v62  ;;  %v5726_v9 = vcombine.high %v1175_v4, %v1179_v5  ;;  %v5728_v11 = vcombine.high %v1176_v6, %v1180_v31  ;;  %v1219_v60 = vld [vmem:[#allocation7 + $0xee0] sm:$0xff]  ;;  %v1216_v61 = vld [vmem:[#allocation7 + $0xec8] sm:$0xff] }
 0x1ed   :  { %v1220_v62 = vld [vmem:[#allocation7 + $0xee8] sm:$0xff] }
 0x1ee   :  { %3972 = vmatmul.mubr.bf16.vlgmr.msra.gmra.mrb[8].mxu0 %v6474_v17  ;;  %4136 = vmatmul.mubr.bf16.vlgmr.msra.gmra.mrb[8].mxu1 %v6474_v17 }
 0x1ef   :  { %3981 = vmatpush1.bf16.msra.mxu0 %v5677_v18  ;;  %4145 = vmatpush1.bf16.msra.mxu1 %v5679_v14  ;;  %v5725_v18 = vcombine.low %v1175_v4, %v1179_v5  ;;  %v5727_v14 = vcombine.low %v1176_v6, %v1180_v31  ;;  %v1223_v4 = vld [vmem:[#allocation7 + $0xf00] sm:$0xff]  ;;  %v1224_v6 = vld [vmem:[#allocation7 + $0xf08] sm:$0xff] }
 0x1f0   :  { %3982 = vmatprep.subr.bf16.mxu0 %v5686_v20  ;;  %4146 = vmatprep.subr.bf16.mxu1 %v5688_v21  ;;  %v5734_v20 = vcombine.high %v1183_v12, %v1187_v13  ;;  %v5736_v21 = vcombine.high %v1184_v15, %v1188_v16  ;;  %v1227_v5 = vld [vmem:[#allocation7 + $0xf20] sm:$0xff]  ;;  %v1228_v31 = vld [vmem:[#allocation7 + $0xf28] sm:$0xff] }
 0x1f1   :  { %4012 = vmatprep.mubr.bf16.mxu0 %v6476_v25  ;;  %4176 = vmatprep.mubr.bf16.mxu1 %v6476_v25 }
 0x1f3   :  { %3983 = vmatpush1.bf16.msra.mxu0 %v5685_v26  ;;  %4147 = vmatpush1.bf16.msra.mxu1 %v5687_v27  ;;  %v5733_v26 = vcombine.low %v1183_v12, %v1187_v13  ;;  %v5735_v27 = vcombine.low %v1184_v15, %v1188_v16  ;;  %v1231_v12 = vld [vmem:[#allocation7 + $0xf40] sm:$0xff]  ;;  %v1232_v15 = vld [vmem:[#allocation7 + $0xf48] sm:$0xff] }
 0x1f4   :  { %3984 = vmatprep.subr.bf16.mxu0 %v5694_v29  ;;  %4148 = vmatprep.subr.bf16.mxu1 %v5696_v34  ;;  %v5742_v29 = vcombine.high %v1191_v22, %v1195_v23  ;;  %v5744_v34 = vcombine.high %v1192_v55, %v1196_v24  ;;  %v1235_v13 = vld [vmem:[#allocation7 + $0xf60] sm:$0xff]  ;;  %v1236_v16 = vld [vmem:[#allocation7 + $0xf68] sm:$0xff] }
 0x1f7   :  { %3985 = vmatpush1.bf16.msra.mxu0 %v5693_v40  ;;  %4149 = vmatpush1.bf16.msra.mxu1 %v5695_v41  ;;  %v5741_v40 = vcombine.low %v1191_v22, %v1195_v23  ;;  %v5743_v41 = vcombine.low %v1192_v55, %v1196_v24  ;;  %v5784_v22 = vcombine.high %v1232_v15, %v1236_v16  ;;  %v1239_v23 = vld [vmem:[#allocation7 + $0xf80] sm:$0xff]  ;;  %v1240_v24 = vld [vmem:[#allocation7 + $0xf88] sm:$0xff] }
 0x1f8   :  { %3986 = vmatprep.subr.bf16.mxu0 %v5702_v44  ;;  %4150 = vmatprep.subr.bf16.mxu1 %v5704_v45  ;;  %v5750_v44 = vcombine.high %v1199_v58, %v1203_v35  ;;  %v5752_v45 = vcombine.high %v1200_v36, %v1204_v37  ;;  %v1243_v55 = vld [vmem:[#allocation7 + $0xfa0] sm:$0xff] }
 0x1fb   :  { %3987 = vmatpush1.bf16.msra.mxu0 %v5701_v53  ;;  %4151 = vmatpush1.bf16.msra.mxu1 %v5703_v54  ;;  %v5749_v53 = vcombine.low %v1199_v58, %v1203_v35  ;;  %v5751_v54 = vcombine.low %v1200_v36, %v1204_v37  ;;  %v5790_v35 = vcombine.high %v1239_v23, %v1243_v55  ;;  %v1247_v37 = vld [vmem:[#allocation7 + $0xfc0] sm:$0xff] }
 0x1fc   :  { %3988 = vmatprep.subr.bf16.mxu0 %v5710_v56  ;;  %4152 = vmatprep.subr.bf16.mxu1 %v5712_v19  ;;  %v5758_v56 = vcombine.high %v1207_v46, %v1211_v48  ;;  %v5760_v19 = vcombine.high %v1208_v49, %v1212_v52 }
 0x1ff   :  { %3989 = vmatpush1.bf16.msra.mxu0 %v5709_v63  ;;  %4153 = vmatpush1.bf16.msra.mxu1 %v5711_v1  ;;  %v5757_v63 = vcombine.low %v1207_v46, %v1211_v48  ;;  %v5759_v1 = vcombine.low %v1208_v49, %v1212_v52 }
 0x200   :  { %3990 = vmatprep.subr.bf16.mxu0 %v5718_v2  ;;  %4154 = vmatprep.subr.bf16.mxu1 %v5720_v3  ;;  %v5766_v2 = vcombine.high %v1215_v59, %v1219_v60  ;;  %v5768_v3 = vcombine.high %v1216_v61, %v1220_v62 }
 0x203   :  { %3991 = vmatpush1.bf16.msra.mxu0 %v5717_v8  ;;  %4155 = vmatpush1.bf16.msra.mxu1 %v5719_v57  ;;  %v5765_v8 = vcombine.low %v1215_v59, %v1219_v60  ;;  %v5767_v57 = vcombine.low %v1216_v61, %v1220_v62 }
 0x204   :  { %3992 = vmatprep.subr.bf16.mxu0 %v5726_v9  ;;  %4156 = vmatprep.subr.bf16.mxu1 %v5728_v11  ;;  %v5774_v9 = vcombine.high %v1223_v4, %v1227_v5  ;;  %v5776_v11 = vcombine.high %v1224_v6, %v1228_v31 }
 0x207   :  { %3993 = vmatpush1.bf16.msra.mxu0 %v5725_v18  ;;  %4157 = vmatpush1.bf16.msra.mxu1 %v5727_v14  ;;  %v5773_v18 = vcombine.low %v1223_v4, %v1227_v5  ;;  %v5775_v14 = vcombine.low %v1224_v6, %v1228_v31 }
 0x208   :  { %3994 = vmatprep.subr.bf16.mxu0 %v5734_v20  ;;  %4158 = vmatprep.subr.bf16.mxu1 %v5736_v21  ;;  %v200_v20 = vsub.s32 6, %v6390_v39  ;;  %v5782_v21 = vcombine.high %v1231_v12, %v1235_v13 }
 0x20b   :  { %3995 = vmatpush1.bf16.msra.mxu0 %v5733_v26  ;;  %4159 = vmatpush1.bf16.msra.mxu1 %v5735_v27  ;;  %v1244_v26 = vld [vmem:[#allocation7 + $0xfa8] sm:$0xff]  ;;  %v5781_v27 = vcombine.low %v1231_v12, %v1235_v13  ;;  %v766_v12 = vld [vmem:[#allocation7 + $0xb8] sm:$0xff] }
 0x20c   :  { %3996 = vmatprep.subr.bf16.mxu0 %v5742_v29  ;;  %4160 = vmatprep.subr.bf16.mxu1 %v5744_v34  ;;  %v5783_v29 = vcombine.low %v1232_v15, %v1236_v16  ;;  %v6092_v34 = vld [vmem:[#allocation5] sm:$0xff]  ;;  %v5792_v36 = vcombine.high %v1240_v24, %v1244_v26  ;;  %v5791_v46 = vcombine.low %v1240_v24, %v1244_v26 }
 0x20d   :  { %v201_v58 = vrot.slane %v6092_v34, %v200_v20  ;;  %v781_v34 = vld [vmem:[#allocation7 + $0x130] sm:$0xff] }
 0x20f   :  { %3997 = vmatpush1.bf16.msra.mxu0 %v5741_v40  ;;  %4161 = vmatpush1.bf16.msra.mxu1 %v5743_v41  ;;  %v1251_v40 = vld [vmem:[#allocation7 + $0xfe0] sm:$0xff]  ;;  %v1248_v41 = vld [vmem:[#allocation7 + $0xfc8] sm:$0xff]  ;;  %v721_v48 = vadd.f32 %v6442_v10, %v201_v58  ;;  %v754_v10 = vld [vmem:[#allocation7 + $0x58] sm:$0xff] }
 0x210   :  { %3998 = vmatprep.subr.bf16.mxu0 %v5750_v44  ;;  %4162 = vmatprep.subr.bf16.mxu1 %v5752_v45  ;;  %v1252_v44 = vld [vmem:[#allocation7 + $0xfe8] sm:$0xff]  ;;  %v5789_v45 = vcombine.low %v1239_v23, %v1243_v55  ;;  %v5798_v49 = vcombine.high %v1247_v37, %v1251_v40  ;;  %v5797_v59 = vcombine.low %v1247_v37, %v1251_v40  ;;  %v774_v23 = vld [vmem:[#allocation7 + $0xf8] sm:$0xff] }
 0x211   :  { %v5800_v52 = vcombine.high %v1248_v41, %v1252_v44  ;;  %v5799_v60 = vcombine.low %v1248_v41, %v1252_v44  ;;  %v733_v61 = vmax.f32 %v721_v48, 0.0  ;;  %v782_v58 = vld [vmem:[#allocation7 + $0x138] sm:$0xff]  ;;  %v785_v41 = vld [vmem:[#allocation7 + $0x150] sm:$0xff] }
 0x212   :  { %v789_v44 = vld [vmem:[#allocation7 + $0x170] sm:$0xff] }
 0x213   :  { %3999 = vmatpush1.bf16.msra.mxu0 %v5749_v53  ;;  %4163 = vmatpush1.bf16.msra.mxu1 %v5751_v54  ;;  %v745_v53 = vld [vmem:[#allocation7 + $0x10] sm:$0xff]  ;;  %v6486_v5 = vpack.c.bf16 %v733_v61, %v733_v61 }
 0x214   :  { %4000 = vmatprep.subr.bf16.mxu0 %v5758_v56  ;;  %4164 = vmatprep.subr.bf16.mxu1 %v5760_v19  ;;  %v749_v54 = vld [vmem:[#allocation7 + $0x30] sm:$0xff]  ;;  %v746_v56 = vld [vmem:[#allocation7 + $0x18] sm:$0xff] }
 0x215   :  { %v750_v19 = vld [vmem:[#allocation7 + $0x38] sm:$0xff]  ;;  %v5298_v62 = vcombine.high %v745_v53, %v749_v54  ;;  %v5297_v4 = vcombine.low %v745_v53, %v749_v54  ;;  %v793_v54 = vld [vmem:[#allocation7 + $0x190] sm:$0xff] }
 0x216   :  { %v5299_v6 = vcombine.low %v746_v56, %v750_v19 }
 0x217   :  { %4001 = vmatpush1.bf16.msra.mxu0 %v5757_v63  ;;  %4165 = vmatpush1.bf16.msra.mxu1 %v5759_v1  ;;  %v5300_v63 = vcombine.high %v746_v56, %v750_v19  ;;  %v753_v1 = vld [vmem:[#allocation7 + $0x50] sm:$0xff]  ;;  %v794_v19 = vld [vmem:[#allocation7 + $0x198] sm:$0xff] }
 0x218   :  { %4002 = vmatprep.subr.bf16.mxu0 %v5766_v2  ;;  %4166 = vmatprep.subr.bf16.mxu1 %v5768_v3  ;;  %v757_v2 = vld [vmem:[#allocation7 + $0x70] sm:$0xff]  ;;  %v758_v3 = vld [vmem:[#allocation7 + $0x78] sm:$0xff] }
 0x219   :  { %v5306_v31 = vcombine.high %v753_v1, %v757_v2  ;;  %v5305_v13 = vcombine.low %v753_v1, %v757_v2  ;;  %v5307_v15 = vcombine.low %v754_v10, %v758_v3  ;;  %v797_v56 = vld [vmem:[#allocation7 + $0x1b0] sm:$0xff] }
 0x21a   :  { %v801_v1 = vld [vmem:[#allocation7 + $0x1d0] sm:$0xff] }
 0x21b   :  { %4003 = vmatpush1.bf16.msra.mxu0 %v5765_v8  ;;  %4167 = vmatpush1.bf16.msra.mxu1 %v5767_v57  ;;  %v5308_v8 = vcombine.high %v754_v10, %v758_v3  ;;  %v761_v57 = vld [vmem:[#allocation7 + $0x90] sm:$0xff]  ;;  %v802_v10 = vld [vmem:[#allocation7 + $0x1d8] sm:$0xff] }
 0x21c   :  { %4004 = vmatprep.subr.bf16.mxu0 %v5774_v9  ;;  %4168 = vmatprep.subr.bf16.mxu1 %v5776_v11  ;;  %v765_v9 = vld [vmem:[#allocation7 + $0xb0] sm:$0xff]  ;;  %v762_v11 = vld [vmem:[#allocation7 + $0x98] sm:$0xff] }
 0x21d   :  { %v5314_v16 = vcombine.high %v761_v57, %v765_v9  ;;  %v5313_v55 = vcombine.low %v761_v57, %v765_v9  ;;  %v5315_v24 = vcombine.low %v762_v11, %v766_v12  ;;  %v805_v2 = vld [vmem:[#allocation7 + $0x1f0] sm:$0xff]  ;;  %v806_v3 = vld [vmem:[#allocation7 + $0x1f8] sm:$0xff] }
 0x21e   :  { %v809_v57 = vld [vmem:[#allocation7 + $0x210] sm:$0xff] }
 0x21f   :  { %4005 = vmatpush1.bf16.msra.mxu0 %v5773_v18  ;;  %4169 = vmatpush1.bf16.msra.mxu1 %v5775_v14  ;;  %v5316_v18 = vcombine.high %v762_v11, %v766_v12  ;;  %v769_v14 = vld [vmem:[#allocation7 + $0xd0] sm:$0xff]  ;;  %v810_v11 = vld [vmem:[#allocation7 + $0x218] sm:$0xff] }
 0x220   :  { %4006 = vmatprep.subr.bf16.mxu0 %v5782_v21  ;;  %4170 = vmatprep.subr.bf16.mxu1 %v5784_v22  ;;  %v773_v21 = vld [vmem:[#allocation7 + $0xf0] sm:$0xff]  ;;  %v770_v22 = vld [vmem:[#allocation7 + $0xd8] sm:$0xff] }
 0x221   :  { %v5322_v26 = vcombine.high %v769_v14, %v773_v21  ;;  %v813_v9 = vld [vmem:[#allocation7 + $0x230] sm:$0xff]  ;;  %v814_v12 = vld [vmem:[#allocation7 + $0x238] sm:$0xff] }
 0x223   :  { %4007 = vmatpush1.bf16.msra.mxu0 %v5781_v27  ;;  %4171 = vmatpush1.bf16.msra.mxu1 %v5783_v29  ;;  %v5324_v27 = vcombine.high %v770_v22, %v774_v23  ;;  %v777_v29 = vld [vmem:[#allocation7 + $0x110] sm:$0xff] }
 0x224   :  { %4008 = vmatprep.subr.bf16.mxu0 %v5790_v35  ;;  %4172 = vmatprep.subr.bf16.mxu1 %v5792_v36  ;;  %v5321_v35 = vcombine.low %v769_v14, %v773_v21  ;;  %v5323_v36 = vcombine.low %v770_v22, %v774_v23  ;;  %v5330_v37 = vcombine.high %v777_v29, %v781_v34  ;;  %v817_v14 = vld [vmem:[#allocation7 + $0x250] sm:$0xff]  ;;  %v818_v22 = vld [vmem:[#allocation7 + $0x258] sm:$0xff] }
 0x225   :  { %v5329_v48 = vcombine.low %v777_v29, %v781_v34  ;;  %v821_v21 = vld [vmem:[#allocation7 + $0x270] sm:$0xff]  ;;  %v822_v23 = vld [vmem:[#allocation7 + $0x278] sm:$0xff] }
 0x226   :  { %v825_v29 = vld [vmem:[#allocation7 + $0x290] sm:$0xff] }
 0x227   :  { %4009 = vmatpush1.bf16.msra.mxu0 %v5789_v45  ;;  %4173 = vmatpush1.bf16.msra.mxu1 %v5791_v46  ;;  %v786_v45 = vld [vmem:[#allocation7 + $0x158] sm:$0xff]  ;;  %v829_v34 = vld [vmem:[#allocation7 + $0x2b0] sm:$0xff] }
 0x228   :  { %4010 = vmatprep.subr.bf16.mxu0 %v5798_v49  ;;  %4174 = vmatprep.subr.bf16.mxu1 %v5800_v52  ;;  %v790_v46 = vld [vmem:[#allocation7 + $0x178] sm:$0xff]  ;;  %v5338_v52 = vcombine.high %v785_v41, %v789_v44 }
 0x229   :  { %v5340_v53 = vcombine.high %v786_v45, %v790_v46  ;;  %v5339_v61 = vcombine.low %v786_v45, %v790_v46  ;;  %v834_v45 = vld [vmem:[#allocation7 + $0x2d8] sm:$0xff] }
 0x22a   :  { %v838_v46 = vld [vmem:[#allocation7 + $0x2f8] sm:$0xff] }
 0x22b   :  { %4011 = vmatpush1.bf16.msra.mxu0 %v5797_v59  ;;  %4175 = vmatpush1.bf16.msra.mxu1 %v5799_v60  ;;  %v798_v59 = vld [vmem:[#allocation7 + $0x1b8] sm:$0xff]  ;;  %v5337_v60 = vcombine.low %v785_v41, %v789_v44  ;;  %v833_v41 = vld [vmem:[#allocation7 + $0x2d0] sm:$0xff] }
 0x22c   :  { %4185 = vmatprep.subr.bf16.mxu0 %v5298_v62  ;;  %4349 = vmatprep.subr.bf16.mxu1 %v5300_v63  ;;  %v5346_v62 = vcombine.high %v793_v54, %v797_v56  ;;  %v5348_v63 = vcombine.high %v794_v19, %v798_v59  ;;  %v837_v44 = vld [vmem:[#allocation7 + $0x2f0] sm:$0xff] }
 0x22e   :  { %4013 = vmatmul.mubr.bf16.vlgmr.msra.gmra.mrb[8].mxu0 %v6486_v5  ;;  %4177 = vmatmul.mubr.bf16.vlgmr.msra.gmra.mrb[8].mxu1 %v6486_v5 }
 0x22f   :  { %4186 = vmatpush1.bf16.msra.mxu0 %v5297_v4  ;;  %4217 = vmatprep.mubr.bf16.mxu0 %v6424_v50  ;;  %v5345_v4 = vcombine.low %v793_v54, %v797_v56  ;;  %v841_v54 = vld [vmem:[#allocation7 + $0x310] sm:$0xff] }
 0x230   :  { %4350 = vmatpush1.bf16.msra.mxu1 %v5299_v6  ;;  %4381 = vmatprep.mubr.bf16.mxu1 %v6424_v50  ;;  %v778_v50 = vld [vmem:[#allocation7 + $0x118] sm:$0xff]  ;;  %v5347_v6 = vcombine.low %v794_v19, %v798_v59  ;;  %v845_v56 = vld [vmem:[#allocation7 + $0x330] sm:$0xff] }
 0x231   :  { %4187 = vmatprep.subr.bf16.mxu0 %v5306_v31  ;;  %4351 = vmatprep.subr.bf16.mxu1 %v5308_v8  ;;  %v5332_v40 = vcombine.high %v778_v50, %v782_v58  ;;  %v5331_v49 = vcombine.low %v778_v50, %v782_v58  ;;  %v5354_v31 = vcombine.high %v801_v1, %v805_v2  ;;  %v826_v50 = vld [vmem:[#allocation7 + $0x298] sm:$0xff] }
 0x232   :  { %v5356_v8 = vcombine.high %v802_v10, %v806_v3  ;;  %v830_v58 = vld [vmem:[#allocation7 + $0x2b8] sm:$0xff] }
 0x233   :  { %4188 = vmatpush1.bf16.msra.mxu0 %v5305_v13  ;;  %v5353_v13 = vcombine.low %v801_v1, %v805_v2  ;;  %v842_v19 = vld [vmem:[#allocation7 + $0x318] sm:$0xff]  ;;  %v849_v1 = vld [vmem:[#allocation7 + $0x350] sm:$0xff] }
 0x234   :  { %4352 = vmatpush1.bf16.msra.mxu1 %v5307_v15  ;;  %4189 = vmatprep.subr.bf16.mxu0 %v5314_v16  ;;  %v5355_v15 = vcombine.low %v802_v10, %v806_v3  ;;  %v5362_v16 = vcombine.high %v809_v57, %v813_v9  ;;  %v846_v59 = vld [vmem:[#allocation7 + $0x338] sm:$0xff]  ;;  %v853_v2 = vld [vmem:[#allocation7 + $0x370] sm:$0xff] }
 0x235   :  { %4353 = vmatprep.subr.bf16.mxu1 %v5316_v18  ;;  %v5364_v18 = vcombine.high %v810_v11, %v814_v12  ;;  %v850_v10 = vld [vmem:[#allocation7 + $0x358] sm:$0xff] }
 0x236   :  { %v854_v3 = vld [vmem:[#allocation7 + $0x378] sm:$0xff] }
 0x237   :  { %4190 = vmatpush1.bf16.msra.mxu0 %v5313_v55  ;;  %v5361_v55 = vcombine.low %v809_v57, %v813_v9  ;;  %v857_v57 = vld [vmem:[#allocation7 + $0x390] sm:$0xff] }
 0x238   :  { %4354 = vmatpush1.bf16.msra.mxu1 %v5315_v24  ;;  %4191 = vmatprep.subr.bf16.mxu0 %v5322_v26  ;;  %v5363_v24 = vcombine.low %v810_v11, %v814_v12  ;;  %v5370_v26 = vcombine.high %v817_v14, %v821_v21  ;;  %v861_v9 = vld [vmem:[#allocation7 + $0x3b0] sm:$0xff]  ;;  %v858_v11 = vld [vmem:[#allocation7 + $0x398] sm:$0xff] }
 0x239   :  { %4355 = vmatprep.subr.bf16.mxu1 %v5324_v27  ;;  %v5372_v27 = vcombine.high %v818_v22, %v822_v23  ;;  %v862_v12 = vld [vmem:[#allocation7 + $0x3b8] sm:$0xff] }
 0x23b   :  { %4192 = vmatpush1.bf16.msra.mxu0 %v5321_v35  ;;  %v5369_v35 = vcombine.low %v817_v14, %v821_v21  ;;  %v865_v14 = vld [vmem:[#allocation7 + $0x3d0] sm:$0xff] }
 0x23c   :  { %4356 = vmatpush1.bf16.msra.mxu1 %v5323_v36  ;;  %4193 = vmatprep.subr.bf16.mxu0 %v5330_v37  ;;  %v5371_v36 = vcombine.low %v818_v22, %v822_v23  ;;  %v5378_v37 = vcombine.high %v825_v29, %v829_v34  ;;  %v869_v21 = vld [vmem:[#allocation7 + $0x3f0] sm:$0xff]  ;;  %v866_v22 = vld [vmem:[#allocation7 + $0x3d8] sm:$0xff] }
 0x23d   :  { %4357 = vmatprep.subr.bf16.mxu1 %v5332_v40  ;;  %v5380_v40 = vcombine.high %v826_v50, %v830_v58  ;;  %v870_v23 = vld [vmem:[#allocation7 + $0x3f8] sm:$0xff] }
 0x23f   :  { %4194 = vmatpush1.bf16.msra.mxu0 %v5329_v48  ;;  %v5377_v48 = vcombine.low %v825_v29, %v829_v34  ;;  %v873_v29 = vld [vmem:[#allocation7 + $0x410] sm:$0xff] }
 0x240   :  { %4358 = vmatpush1.bf16.msra.mxu1 %v5331_v49  ;;  %4195 = vmatprep.subr.bf16.mxu0 %v5338_v52  ;;  %v5379_v49 = vcombine.low %v826_v50, %v830_v58  ;;  %v5386_v52 = vcombine.high %v833_v41, %v837_v44  ;;  %v877_v34 = vld [vmem:[#allocation7 + $0x430] sm:$0xff]  ;;  %v874_v50 = vld [vmem:[#allocation7 + $0x418] sm:$0xff] }
 0x241   :  { %4359 = vmatprep.subr.bf16.mxu1 %v5340_v53  ;;  %v5388_v53 = vcombine.high %v834_v45, %v838_v46  ;;  %v878_v58 = vld [vmem:[#allocation7 + $0x438] sm:$0xff] }
 0x243   :  { %4196 = vmatpush1.bf16.msra.mxu0 %v5337_v60  ;;  %v5385_v60 = vcombine.low %v833_v41, %v837_v44  ;;  %v881_v41 = vld [vmem:[#allocation7 + $0x450] sm:$0xff] }
 0x244   :  { %4360 = vmatpush1.bf16.msra.mxu1 %v5339_v61  ;;  %4197 = vmatprep.subr.bf16.mxu0 %v5346_v62  ;;  %v5387_v61 = vcombine.low %v834_v45, %v838_v46  ;;  %v5394_v62 = vcombine.high %v841_v54, %v845_v56  ;;  %v885_v44 = vld [vmem:[#allocation7 + $0x470] sm:$0xff]  ;;  %v5425_v45 = vcombine.low %v873_v29, %v877_v34  ;;  %v882_v46 = vld [vmem:[#allocation7 + $0x458] sm:$0xff] }
 0x245   :  { %4361 = vmatprep.subr.bf16.mxu1 %v5348_v63  ;;  %v5396_v63 = vcombine.high %v842_v19, %v846_v59 }
 0x247   :  { %4198 = vmatpush1.bf16.msra.mxu0 %v5345_v4  ;;  %v5393_v4 = vcombine.low %v841_v54, %v845_v56  ;;  %v893_v54 = vld [vmem:[#allocation7 + $0x4b0] sm:$0xff] }
 0x248   :  { %4362 = vmatpush1.bf16.msra.mxu1 %v5347_v6  ;;  %4199 = vmatprep.subr.bf16.mxu0 %v5354_v31  ;;  %v5395_v6 = vcombine.low %v842_v19, %v846_v59  ;;  %v5402_v31 = vcombine.high %v849_v1, %v853_v2  ;;  %v890_v19 = vld [vmem:[#allocation7 + $0x498] sm:$0xff] }
 0x249   :  { %4363 = vmatprep.subr.bf16.mxu1 %v5356_v8  ;;  %v5404_v8 = vcombine.high %v850_v10, %v854_v3  ;;  %v894_v59 = vld [vmem:[#allocation7 + $0x4b8] sm:$0xff] }
 0x24b   :  { %4200 = vmatpush1.bf16.msra.mxu0 %v5353_v13  ;;  %v5401_v13 = vcombine.low %v849_v1, %v853_v2  ;;  %v897_v1 = vld [vmem:[#allocation7 + $0x4d0] sm:$0xff] }
 0x24c   :  { %4364 = vmatpush1.bf16.msra.mxu1 %v5355_v15  ;;  %4201 = vmatprep.subr.bf16.mxu0 %v5362_v16  ;;  %v5403_v15 = vcombine.low %v850_v10, %v854_v3  ;;  %v5410_v16 = vcombine.high %v857_v57, %v861_v9  ;;  %v901_v2 = vld [vmem:[#allocation7 + $0x4f0] sm:$0xff]  ;;  %v898_v10 = vld [vmem:[#allocation7 + $0x4d8] sm:$0xff] }
 0x24d   :  { %4365 = vmatprep.subr.bf16.mxu1 %v5364_v18  ;;  %v5412_v18 = vcombine.high %v858_v11, %v862_v12  ;;  %v902_v3 = vld [vmem:[#allocation7 + $0x4f8] sm:$0xff] }
 0x24f   :  { %4202 = vmatpush1.bf16.msra.mxu0 %v5361_v55  ;;  %v5409_v55 = vcombine.low %v857_v57, %v861_v9  ;;  %v909_v57 = vld [vmem:[#allocation7 + $0x530] sm:$0xff]  ;;  %v906_v9 = vld [vmem:[#allocation7 + $0x518] sm:$0xff] }
 0x250   :  { %4366 = vmatpush1.bf16.msra.mxu1 %v5363_v24  ;;  %4203 = vmatprep.subr.bf16.mxu0 %v5370_v26  ;;  %v5411_v24 = vcombine.low %v858_v11, %v862_v12  ;;  %v5418_v26 = vcombine.high %v865_v14, %v869_v21  ;;  %v910_v11 = vld [vmem:[#allocation7 + $0x538] sm:$0xff]  ;;  %v5451_v12 = vcombine.low %v898_v10, %v902_v3 }
 0x251   :  { %4367 = vmatprep.subr.bf16.mxu1 %v5372_v27  ;;  %v5420_v27 = vcombine.high %v866_v22, %v870_v23 }
 0x253   :  { %4204 = vmatpush1.bf16.msra.mxu0 %v5369_v35  ;;  %v5417_v35 = vcombine.low %v865_v14, %v869_v21  ;;  %v914_v14 = vld [vmem:[#allocation7 + $0x558] sm:$0xff] }
 0x254   :  { %4368 = vmatpush1.bf16.msra.mxu1 %v5371_v36  ;;  %4205 = vmatprep.subr.bf16.mxu0 %v5378_v37  ;;  %v5419_v36 = vcombine.low %v866_v22, %v870_v23  ;;  %v5426_v37 = vcombine.high %v873_v29, %v877_v34  ;;  %v918_v21 = vld [vmem:[#allocation7 + $0x578] sm:$0xff]  ;;  %v5459_v23 = vcombine.low %v906_v9, %v910_v11 }
 0x255   :  { %4369 = vmatprep.subr.bf16.mxu1 %v5380_v40  ;;  %v5428_v40 = vcombine.high %v874_v50, %v878_v58  ;;  %v922_v29 = vld [vmem:[#allocation7 + $0x598] sm:$0xff] }
 0x256   :  { %v926_v34 = vld [vmem:[#allocation7 + $0x5b8] sm:$0xff] }
 0x257   :  { %4206 = vmatpush1.bf16.msra.mxu0 %v5377_v48  ;;  %v886_v48 = vld [vmem:[#allocation7 + $0x478] sm:$0xff] }
 0x258   :  { %4370 = vmatpush1.bf16.msra.mxu1 %v5379_v49  ;;  %4207 = vmatprep.subr.bf16.mxu0 %v5386_v52  ;;  %v5427_v49 = vcombine.low %v874_v50, %v878_v58  ;;  %v5434_v52 = vcombine.high %v881_v41, %v885_v44  ;;  %v5436_v56 = vcombine.high %v882_v46, %v886_v48 }
 0x259   :  { %4371 = vmatprep.subr.bf16.mxu1 %v5388_v53  ;;  %v889_v53 = vld [vmem:[#allocation7 + $0x490] sm:$0xff]  ;;  %v5467_v58 = vcombine.low %v914_v14, %v918_v21 }
 0x25b   :  { %4208 = vmatpush1.bf16.msra.mxu0 %v5385_v60  ;;  %v5433_v60 = vcombine.low %v881_v41, %v885_v44  ;;  %v930_v41 = vld [vmem:[#allocation7 + $0x5d8] sm:$0xff] }
 0x25c   :  { %4372 = vmatpush1.bf16.msra.mxu1 %v5387_v61  ;;  %4209 = vmatprep.subr.bf16.mxu0 %v5394_v62  ;;  %v5435_v61 = vcombine.low %v882_v46, %v886_v48  ;;  %v5442_v62 = vcombine.high %v889_v53, %v893_v54  ;;  %v934_v44 = vld [vmem:[#allocation7 + $0x5f8] sm:$0xff]  ;;  %v5475_v46 = vcombine.low %v922_v29, %v926_v34 }
 0x25d   :  { %4373 = vmatprep.subr.bf16.mxu1 %v5396_v63  ;;  %v5444_v63 = vcombine.high %v890_v19, %v894_v59 }
 0x25f   :  { %4210 = vmatpush1.bf16.msra.mxu0 %v5393_v4  ;;  %v5441_v4 = vcombine.low %v889_v53, %v893_v54  ;;  %v941_v53 = vld [vmem:[#allocation7 + $0x630] sm:$0xff]  ;;  %v938_v54 = vld [vmem:[#allocation7 + $0x618] sm:$0xff] }
 0x260   :  { %4374 = vmatpush1.bf16.msra.mxu1 %v5395_v6  ;;  %4211 = vmatprep.subr.bf16.mxu0 %v5402_v31  ;;  %v5450_v6 = vcombine.high %v897_v1, %v901_v2  ;;  %v5452_v31 = vcombine.high %v898_v10, %v902_v3 }
 0x261   :  { %4375 = vmatprep.subr.bf16.mxu1 %v5404_v8  ;;  %v905_v8 = vld [vmem:[#allocation7 + $0x510] sm:$0xff] }
 0x262   :  { %v5457_v22 = vcombine.low %v905_v8, %v909_v57 }
 0x263   :  { %4212 = vmatpush1.bf16.msra.mxu0 %v5401_v13  ;;  %v5458_v13 = vcombine.high %v905_v8, %v909_v57  ;;  %v954_v8 = vld [vmem:[#allocation7 + $0x698] sm:$0xff] }
 0x264   :  { %4376 = vmatpush1.bf16.msra.mxu1 %v5403_v15  ;;  %4213 = vmatprep.subr.bf16.mxu0 %v5410_v16  ;;  %v5460_v15 = vcombine.high %v906_v9, %v910_v11  ;;  %v913_v16 = vld [vmem:[#allocation7 + $0x550] sm:$0xff]  ;;  %v958_v57 = vld [vmem:[#allocation7 + $0x6b8] sm:$0xff] }
 0x265   :  { %4377 = vmatprep.subr.bf16.mxu1 %v5412_v18  ;;  %v917_v18 = vld [vmem:[#allocation7 + $0x570] sm:$0xff] }
 0x266   :  { %v5465_v50 = vcombine.low %v913_v16, %v917_v18 }
 0x267   :  { %4214 = vmatpush1.bf16.msra.mxu0 %v5409_v55  ;;  %v5466_v55 = vcombine.high %v913_v16, %v917_v18  ;;  %v962_v16 = vld [vmem:[#allocation7 + $0x6d8] sm:$0xff] }
 0x268   :  { %4378 = vmatpush1.bf16.msra.mxu1 %v5411_v24  ;;  %4215 = vmatprep.subr.bf16.mxu0 %v5418_v26  ;;  %v5468_v24 = vcombine.high %v914_v14, %v918_v21  ;;  %v921_v26 = vld [vmem:[#allocation7 + $0x590] sm:$0xff]  ;;  %v966_v18 = vld [vmem:[#allocation7 + $0x6f8] sm:$0xff]  ;;  %v5507_v21 = vcombine.low %v954_v8, %v958_v57 }
 0x269   :  { %4379 = vmatprep.subr.bf16.mxu1 %v5420_v27  ;;  %v925_v27 = vld [vmem:[#allocation7 + $0x5b0] sm:$0xff] }
 0x26b   :  { %4216 = vmatpush1.bf16.msra.mxu0 %v5417_v35  ;;  %v5474_v35 = vcombine.high %v921_v26, %v925_v27 }
 0x26c   :  { %4380 = vmatpush1.bf16.msra.mxu1 %v5419_v36  ;;  %4226 = vmatprep.subr.bf16.mxu0 %v5426_v37  ;;  %v5476_v36 = vcombine.high %v922_v29, %v926_v34  ;;  %v929_v37 = vld [vmem:[#allocation7 + $0x5d0] sm:$0xff]  ;;  %v5515_v34 = vcombine.low %v962_v16, %v966_v18 }
 0x26d   :  { %4390 = vmatprep.subr.bf16.mxu1 %v5428_v40  ;;  %v933_v40 = vld [vmem:[#allocation7 + $0x5f0] sm:$0xff] }
 0x26e   :  { %4218 = vmatmul.mubr.bf16.vlgmr.msra.gmra.mrb[12].mxu0 %v6426_v51  ;;  %v5482_v48 = vcombine.high %v929_v37, %v933_v40 }
 0x26f   :  { %4382 = vmatmul.mubr.bf16.vlgmr.msra.gmra.mrb[12].mxu1 %v6426_v51  ;;  %4227 = vmatpush1.bf16.msra.mxu0 %v5425_v45  ;;  %v5443_v51 = vcombine.low %v890_v19, %v894_v59  ;;  %v5473_v45 = vcombine.low %v921_v26, %v925_v27  ;;  %v5481_v19 = vcombine.low %v929_v37, %v933_v40  ;;  %v970_v26 = vld [vmem:[#allocation7 + $0x718] sm:$0xff] }
 0x270   :  { %4258 = vmatprep.mubr.bf16.mxu0 %v6434_v7  ;;  %4391 = vmatpush1.bf16.msra.mxu1 %v5427_v49  ;;  %v5484_v49 = vcombine.high %v930_v41, %v934_v44  ;;  %v5483_v59 = vcombine.low %v930_v41, %v934_v44  ;;  %v974_v27 = vld [vmem:[#allocation7 + $0x738] sm:$0xff] }
 0x271   :  { %4422 = vmatprep.mubr.bf16.mxu1 %v6434_v7  ;;  %4228 = vmatprep.subr.bf16.mxu0 %v5434_v52  ;;  %v5449_v7 = vcombine.low %v897_v1, %v901_v2  ;;  %v937_v52 = vld [vmem:[#allocation7 + $0x610] sm:$0xff]  ;;  %v946_v1 = vld [vmem:[#allocation7 + $0x658] sm:$0xff]  ;;  %v5523_v44 = vcombine.low %v970_v26, %v974_v27 }
 0x272   :  { %4392 = vmatprep.subr.bf16.mxu1 %v5436_v56  ;;  %v942_v56 = vld [vmem:[#allocation7 + $0x638] sm:$0xff]  ;;  %v5489_v10 = vcombine.low %v937_v52, %v941_v53 }
 0x273   :  { %4229 = vmatpush1.bf16.msra.mxu0 %v5433_v60  ;;  %v5490_v60 = vcombine.high %v937_v52, %v941_v53  ;;  %v950_v2 = vld [vmem:[#allocation7 + $0x678] sm:$0xff]  ;;  %v5491_v3 = vcombine.low %v938_v54, %v942_v56 }
 0x274   :  { %4393 = vmatpush1.bf16.msra.mxu1 %v5435_v61  ;;  %4230 = vmatprep.subr.bf16.mxu0 %v5442_v62  ;;  %v5492_v61 = vcombine.high %v938_v54, %v942_v56  ;;  %v945_v62 = vld [vmem:[#allocation7 + $0x650] sm:$0xff]  ;;  %v5499_v11 = vcombine.low %v946_v1, %v950_v2  ;;  %v978_v37 = vld [vmem:[#allocation7 + $0x758] sm:$0xff] }
 0x275   :  { %4394 = vmatprep.subr.bf16.mxu1 %v5444_v63  ;;  %v949_v63 = vld [vmem:[#allocation7 + $0x670] sm:$0xff]  ;;  %v982_v40 = vld [vmem:[#allocation7 + $0x778] sm:$0xff] }
 0x276   :  { %v5497_v9 = vcombine.low %v945_v62, %v949_v63  ;;  %v986_v52 = vld [vmem:[#allocation7 + $0x798] sm:$0xff]  ;;  %v5531_v56 = vcombine.low %v978_v37, %v982_v40 }
 0x277   :  { %4231 = vmatpush1.bf16.msra.mxu0 %v5441_v4  ;;  %v5498_v4 = vcombine.high %v945_v62, %v949_v63  ;;  %v990_v53 = vld [vmem:[#allocation7 + $0x7b8] sm:$0xff] }
 0x278   :  { %4395 = vmatpush1.bf16.msra.mxu1 %v5443_v51  ;;  %4232 = vmatprep.subr.bf16.mxu0 %v5450_v6  ;;  %v5500_v51 = vcombine.high %v946_v1, %v950_v2  ;;  %v953_v6 = vld [vmem:[#allocation7 + $0x690] sm:$0xff]  ;;  %v994_v62 = vld [vmem:[#allocation7 + $0x7d8] sm:$0xff]  ;;  %v5539_v2 = vcombine.low %v986_v52, %v990_v53 }
 0x279   :  { %4396 = vmatprep.subr.bf16.mxu1 %v5452_v31  ;;  %v957_v31 = vld [vmem:[#allocation7 + $0x6b0] sm:$0xff]  ;;  %v998_v63 = vld [vmem:[#allocation7 + $0x7f8] sm:$0xff] }
 0x27a   :  { %v5505_v14 = vcombine.low %v953_v6, %v957_v31 }
 0x27b   :  { %4233 = vmatpush1.bf16.msra.mxu0 %v5449_v7  ;;  %v5506_v7 = vcombine.high %v953_v6, %v957_v31  ;;  %v1002_v6 = vld [vmem:[#allocation7 + $0x818] sm:$0xff] }
 0x27c   :  { %4397 = vmatpush1.bf16.msra.mxu1 %v5451_v12  ;;  %4234 = vmatprep.subr.bf16.mxu0 %v5458_v13  ;;  %v5508_v12 = vcombine.high %v954_v8, %v958_v57  ;;  %v961_v13 = vld [vmem:[#allocation7 + $0x6d0] sm:$0xff]  ;;  %v1006_v31 = vld [vmem:[#allocation7 + $0x838] sm:$0xff]  ;;  %v5547_v57 = vcombine.low %v994_v62, %v998_v63 }
 0x27d   :  { %4398 = vmatprep.subr.bf16.mxu1 %v5460_v15  ;;  %v965_v15 = vld [vmem:[#allocation7 + $0x6f0] sm:$0xff] }
 0x27e   :  { %v5513_v29 = vcombine.low %v961_v13, %v965_v15 }
 0x27f   :  { %4235 = vmatpush1.bf16.msra.mxu0 %v5457_v22  ;;  %v5514_v22 = vcombine.high %v961_v13, %v965_v15  ;;  %v1010_v15 = vld [vmem:[#allocation7 + $0x858] sm:$0xff] }
 0x280   :  { %4399 = vmatpush1.bf16.msra.mxu1 %v5459_v23  ;;  %4236 = vmatprep.subr.bf16.mxu0 %v5466_v55  ;;  %v5516_v23 = vcombine.high %v962_v16, %v966_v18  ;;  %v969_v55 = vld [vmem:[#allocation7 + $0x710] sm:$0xff]  ;;  %v1014_v16 = vld [vmem:[#allocation7 + $0x878] sm:$0xff]  ;;  %v5555_v18 = vcombine.low %v1002_v6, %v1006_v31 }
 0x281   :  { %4400 = vmatprep.subr.bf16.mxu1 %v5468_v24  ;;  %v973_v24 = vld [vmem:[#allocation7 + $0x730] sm:$0xff] }
 0x282   :  { %v5521_v41 = vcombine.low %v969_v55, %v973_v24 }
 0x283   :  { %4237 = vmatpush1.bf16.msra.mxu0 %v5465_v50  ;;  %v5522_v50 = vcombine.high %v969_v55, %v973_v24  ;;  %v1018_v55 = vld [vmem:[#allocation7 + $0x898] sm:$0xff] }
 0x284   :  { %4401 = vmatpush1.bf16.msra.mxu1 %v5467_v58  ;;  %4238 = vmatprep.subr.bf16.mxu0 %v5474_v35  ;;  %v5524_v58 = vcombine.high %v970_v26, %v974_v27  ;;  %v977_v35 = vld [vmem:[#allocation7 + $0x750] sm:$0xff]  ;;  %v1022_v24 = vld [vmem:[#allocation7 + $0x8b8] sm:$0xff]  ;;  %v5563_v27 = vcombine.low %v1010_v15, %v1014_v16 }
 0x285   :  { %4402 = vmatprep.subr.bf16.mxu1 %v5476_v36  ;;  %v981_v36 = vld [vmem:[#allocation7 + $0x770] sm:$0xff] }
 0x286   :  { %v5529_v54 = vcombine.low %v977_v35, %v981_v36 }
 0x287   :  { %4239 = vmatpush1.bf16.msra.mxu0 %v5473_v45  ;;  %v5530_v45 = vcombine.high %v977_v35, %v981_v36  ;;  %v1026_v35 = vld [vmem:[#allocation7 + $0x8d8] sm:$0xff] }
 0x288   :  { %4403 = vmatpush1.bf16.msra.mxu1 %v5475_v46  ;;  %4240 = vmatprep.subr.bf16.mxu0 %v5482_v48  ;;  %v5532_v46 = vcombine.high %v978_v37, %v982_v40  ;;  %v985_v48 = vld [vmem:[#allocation7 + $0x790] sm:$0xff]  ;;  %v1030_v36 = vld [vmem:[#allocation7 + $0x8f8] sm:$0xff] }
 0x289   :  { %4404 = vmatprep.subr.bf16.mxu1 %v5484_v49  ;;  %v989_v49 = vld [vmem:[#allocation7 + $0x7b0] sm:$0xff] }
 0x28a   :  { %v5537_v1 = vcombine.low %v985_v48, %v989_v49 }
 0x28b   :  { %4241 = vmatpush1.bf16.msra.mxu0 %v5481_v19  ;;  %v5538_v19 = vcombine.high %v985_v48, %v989_v49  ;;  %v1038_v48 = vld [vmem:[#allocation7 + $0x938] sm:$0xff]  ;;  %v5579_v49 = vcombine.low %v1026_v35, %v1030_v36 }
 0x28c   :  { %4405 = vmatpush1.bf16.msra.mxu1 %v5483_v59  ;;  %4242 = vmatprep.subr.bf16.mxu0 %v5490_v60  ;;  %v5540_v59 = vcombine.high %v986_v52, %v990_v53  ;;  %v993_v60 = vld [vmem:[#allocation7 + $0x7d0] sm:$0xff] }
 0x28d   :  { %4406 = vmatprep.subr.bf16.mxu1 %v5492_v61  ;;  %v997_v61 = vld [vmem:[#allocation7 + $0x7f0] sm:$0xff] }
 0x28e   :  { %v5545_v8 = vcombine.low %v993_v60, %v997_v61 }
 0x28f   :  { %4243 = vmatpush1.bf16.msra.mxu0 %v5489_v10  ;;  %v5546_v10 = vcombine.high %v993_v60, %v997_v61 }
 0x290   :  { %4407 = vmatpush1.bf16.msra.mxu1 %v5491_v3  ;;  %4244 = vmatprep.subr.bf16.mxu0 %v5498_v4  ;;  %v5548_v3 = vcombine.high %v994_v62, %v998_v63  ;;  %v1001_v4 = vld [vmem:[#allocation7 + $0x810] sm:$0xff] }
 0x291   :  { %4408 = vmatprep.subr.bf16.mxu1 %v5500_v51  ;;  %v1005_v51 = vld [vmem:[#allocation7 + $0x830] sm:$0xff] }
 0x292   :  { %v5553_v13 = vcombine.low %v1001_v4, %v1005_v51 }
 0x293   :  { %4245 = vmatpush1.bf16.msra.mxu0 %v5497_v9  ;;  %v5554_v9 = vcombine.high %v1001_v4, %v1005_v51 }
 0x294   :  { %4409 = vmatpush1.bf16.msra.mxu1 %v5499_v11  ;;  %4246 = vmatprep.subr.bf16.mxu0 %v5506_v7  ;;  %v5556_v11 = vcombine.high %v1002_v6, %v1006_v31  ;;  %v1009_v7 = vld [vmem:[#allocation7 + $0x850] sm:$0xff] }
 0x295   :  { %4410 = vmatprep.subr.bf16.mxu1 %v5508_v12  ;;  %v1013_v12 = vld [vmem:[#allocation7 + $0x870] sm:$0xff] }
 0x296   :  { %v5561_v26 = vcombine.low %v1009_v7, %v1013_v12 }
 0x297   :  { %4247 = vmatpush1.bf16.msra.mxu0 %v5505_v14  ;;  %v5562_v14 = vcombine.high %v1009_v7, %v1013_v12 }
 0x298   :  { %4411 = vmatpush1.bf16.msra.mxu1 %v5507_v21  ;;  %4248 = vmatprep.subr.bf16.mxu0 %v5514_v22  ;;  %v1017_v21 = vld [vmem:[#allocation7 + $0x890] sm:$0xff] }
 0x299   :  { %4412 = vmatprep.subr.bf16.mxu1 %v5516_v23  ;;  %v1021_v22 = vld [vmem:[#allocation7 + $0x8b0] sm:$0xff]  ;;  %v5564_v23 = vcombine.high %v1010_v15, %v1014_v16 }
 0x29a   :  { %v5569_v37 = vcombine.low %v1017_v21, %v1021_v22  ;;  %v1065_v16 = vld [vmem:[#allocation7 + $0xa10] sm:$0xff] }
 0x29b   :  { %4249 = vmatpush1.bf16.msra.mxu0 %v5513_v29  ;;  %v5570_v29 = vcombine.high %v1017_v21, %v1021_v22  ;;  %v1070_v21 = vld [vmem:[#allocation7 + $0xa38] sm:$0xff] }
 0x29c   :  { %4413 = vmatpush1.bf16.msra.mxu1 %v5515_v34  ;;  %4250 = vmatprep.subr.bf16.mxu0 %v5522_v50  ;;  %v5572_v34 = vcombine.high %v1018_v55, %v1022_v24  ;;  %v1025_v50 = vld [vmem:[#allocation7 + $0x8d0] sm:$0xff] }
 0x29d   :  { %4414 = vmatprep.subr.bf16.mxu1 %v5524_v58  ;;  %v1029_v58 = vld [vmem:[#allocation7 + $0x8f0] sm:$0xff] }
 0x29e   :  { %v5578_v40 = vcombine.high %v1025_v50, %v1029_v58 }
 0x29f   :  { %4251 = vmatpush1.bf16.msra.mxu0 %v5521_v41  ;;  %v5580_v41 = vcombine.high %v1026_v35, %v1030_v36 }
 0x2a0   :  { %4415 = vmatpush1.bf16.msra.mxu1 %v5523_v44  ;;  %4252 = vmatprep.subr.bf16.mxu0 %v5530_v45  ;;  %v1033_v44 = vld [vmem:[#allocation7 + $0x910] sm:$0xff] }
 0x2a1   :  { %4416 = vmatprep.subr.bf16.mxu1 %v5532_v46  ;;  %v1037_v45 = vld [vmem:[#allocation7 + $0x930] sm:$0xff]  ;;  %v1034_v46 = vld [vmem:[#allocation7 + $0x918] sm:$0xff] }
 0x2a2   :  { %v5586_v52 = vcombine.high %v1033_v44, %v1037_v45  ;;  %v5588_v53 = vcombine.high %v1034_v46, %v1038_v48  ;;  %v5585_v60 = vcombine.low %v1033_v44, %v1037_v45  ;;  %v5587_v61 = vcombine.low %v1034_v46, %v1038_v48 }
 0x2a3   :  { %4253 = vmatpush1.bf16.msra.mxu0 %v5529_v54  ;;  %v1041_v54 = vld [vmem:[#allocation7 + $0x950] sm:$0xff] }
 0x2a4   :  { %4417 = vmatpush1.bf16.msra.mxu1 %v5531_v56  ;;  %4254 = vmatprep.subr.bf16.mxu0 %v5538_v19  ;;  %v1045_v56 = vld [vmem:[#allocation7 + $0x970] sm:$0xff]  ;;  %v1042_v19 = vld [vmem:[#allocation7 + $0x958] sm:$0xff] }
 0x2a5   :  { %4418 = vmatprep.subr.bf16.mxu1 %v5540_v59  ;;  %v1046_v59 = vld [vmem:[#allocation7 + $0x978] sm:$0xff]  ;;  %v5594_v62 = vcombine.high %v1041_v54, %v1045_v56  ;;  %v5593_v4 = vcombine.low %v1041_v54, %v1045_v56 }
 0x2a6   :  { %v5596_v63 = vcombine.high %v1042_v19, %v1046_v59  ;;  %v5595_v51 = vcombine.low %v1042_v19, %v1046_v59 }
 0x2a7   :  { %4255 = vmatpush1.bf16.msra.mxu0 %v5537_v1  ;;  %v1049_v1 = vld [vmem:[#allocation7 + $0x990] sm:$0xff] }
 0x2a8   :  { %4419 = vmatpush1.bf16.msra.mxu1 %v5539_v2  ;;  %4256 = vmatprep.subr.bf16.mxu0 %v5546_v10  ;;  %v1053_v2 = vld [vmem:[#allocation7 + $0x9b0] sm:$0xff]  ;;  %v1050_v10 = vld [vmem:[#allocation7 + $0x998] sm:$0xff] }
 0x2a9   :  { %4420 = vmatprep.subr.bf16.mxu1 %v5548_v3  ;;  %v1054_v3 = vld [vmem:[#allocation7 + $0x9b8] sm:$0xff]  ;;  %v5602_v6 = vcombine.high %v1049_v1, %v1053_v2  ;;  %v5601_v7 = vcombine.low %v1049_v1, %v1053_v2 }
 0x2aa   :  { %v5604_v31 = vcombine.high %v1050_v10, %v1054_v3  ;;  %v5603_v12 = vcombine.low %v1050_v10, %v1054_v3 }
 0x2ab   :  { %4257 = vmatpush1.bf16.msra.mxu0 %v5545_v8  ;;  %v1057_v8 = vld [vmem:[#allocation7 + $0x9d0] sm:$0xff] }
 0x2ac   :  { %4421 = vmatpush1.bf16.msra.mxu1 %v5547_v57  ;;  %4267 = vmatprep.subr.bf16.mxu0 %v5554_v9  ;;  %v1061_v57 = vld [vmem:[#allocation7 + $0x9f0] sm:$0xff]  ;;  %v1058_v9 = vld [vmem:[#allocation7 + $0x9d8] sm:$0xff] }
 0x2ad   :  { %4431 = vmatprep.subr.bf16.mxu1 %v5556_v11  ;;  %v1062_v11 = vld [vmem:[#allocation7 + $0x9f8] sm:$0xff]  ;;  %v5609_v22 = vcombine.low %v1057_v8, %v1061_v57 }
 0x2ae   :  { %4259 = vmatmul.mubr.bf16.vlgmr.msra.gmra.mrb[12].mxu0 %v6456_v33  ;;  %v5612_v15 = vcombine.high %v1058_v9, %v1062_v11 }
 0x2af   :  { %4423 = vmatmul.mubr.bf16.vlgmr.msra.gmra.mrb[12].mxu1 %v6456_v33  ;;  %4268 = vmatpush1.bf16.msra.mxu0 %v5553_v13  ;;  %v5571_v33 = vcombine.low %v1018_v55, %v1022_v24  ;;  %v5610_v13 = vcombine.high %v1057_v8, %v1061_v57 }
 0x2b0   :  { %4299 = vmatprep.mubr.bf16.mxu0 %v6458_v43  ;;  %4432 = vmatpush1.bf16.msra.mxu1 %v5555_v18  ;;  %v1069_v18 = vld [vmem:[#allocation7 + $0xa30] sm:$0xff] }
 0x2b1   :  { %4463 = vmatprep.mubr.bf16.mxu1 %v6458_v43  ;;  %4269 = vmatprep.subr.bf16.mxu0 %v5562_v14  ;;  %v5577_v43 = vcombine.low %v1025_v50, %v1029_v58  ;;  %v1066_v14 = vld [vmem:[#allocation7 + $0xa18] sm:$0xff]  ;;  %v5618_v55 = vcombine.high %v1065_v16, %v1069_v18  ;;  %v5617_v50 = vcombine.low %v1065_v16, %v1069_v18 }
 0x2b2   :  { %4433 = vmatprep.subr.bf16.mxu1 %v5564_v23  ;;  %v5611_v23 = vcombine.low %v1058_v9, %v1062_v11  ;;  %v5620_v24 = vcombine.high %v1066_v14, %v1070_v21  ;;  %v5619_v58 = vcombine.low %v1066_v14, %v1070_v21 }
 0x2b3   :  { %4270 = vmatpush1.bf16.msra.mxu0 %v5561_v26  ;;  %v1073_v26 = vld [vmem:[#allocation7 + $0xa50] sm:$0xff] }
 0x2b4   :  { %4434 = vmatpush1.bf16.msra.mxu1 %v5563_v27  ;;  %4271 = vmatprep.subr.bf16.mxu0 %v5570_v29  ;;  %v1077_v27 = vld [vmem:[#allocation7 + $0xa70] sm:$0xff]  ;;  %v1074_v29 = vld [vmem:[#allocation7 + $0xa58] sm:$0xff] }
 0x2b5   :  { %4435 = vmatprep.subr.bf16.mxu1 %v5572_v34  ;;  %v1078_v34 = vld [vmem:[#allocation7 + $0xa78] sm:$0xff]  ;;  %v5626_v35 = vcombine.high %v1073_v26, %v1077_v27  ;;  %v5625_v44 = vcombine.low %v1073_v26, %v1077_v27 }
 0x2b6   :  { %v5628_v36 = vcombine.high %v1074_v29, %v1078_v34  ;;  %v5627_v45 = vcombine.low %v1074_v29, %v1078_v34 }
 0x2b7   :  { %4272 = vmatpush1.bf16.msra.mxu0 %v5569_v37  ;;  %v1081_v37 = vld [vmem:[#allocation7 + $0xa90] sm:$0xff] }
 0x2b8   :  { %4436 = vmatpush1.bf16.msra.mxu1 %v5571_v33  ;;  %4273 = vmatprep.subr.bf16.mxu0 %v5578_v40  ;;  %v1085_v33 = vld [vmem:[#allocation7 + $0xab0] sm:$0xff]  ;;  %v1082_v40 = vld [vmem:[#allocation7 + $0xa98] sm:$0xff] }
 0x2b9   :  { %4437 = vmatprep.subr.bf16.mxu1 %v5580_v41  ;;  %v1086_v41 = vld [vmem:[#allocation7 + $0xab8] sm:$0xff]  ;;  %v5634_v46 = vcombine.high %v1081_v37, %v1085_v33  ;;  %v5633_v54 = vcombine.low %v1081_v37, %v1085_v33 }
 0x2ba   :  { %v5636_v48 = vcombine.high %v1082_v40, %v1086_v41  ;;  %v5635_v56 = vcombine.low %v1082_v40, %v1086_v41 }
 0x2bb   :  { %4274 = vmatpush1.bf16.msra.mxu0 %v5577_v43  ;;  %v1089_v43 = vld [vmem:[#allocation7 + $0xad0] sm:$0xff] }
 0x2bc   :  { %4438 = vmatpush1.bf16.msra.mxu1 %v5579_v49  ;;  %4275 = vmatprep.subr.bf16.mxu0 %v5586_v52  ;;  %v1093_v49 = vld [vmem:[#allocation7 + $0xaf0] sm:$0xff]  ;;  %v1090_v52 = vld [vmem:[#allocation7 + $0xad8] sm:$0xff] }
 0x2bd   :  { %4439 = vmatprep.subr.bf16.mxu1 %v5588_v53  ;;  %v1094_v53 = vld [vmem:[#allocation7 + $0xaf8] sm:$0xff]  ;;  %v5642_v19 = vcombine.high %v1089_v43, %v1093_v49  ;;  %v5641_v1 = vcombine.low %v1089_v43, %v1093_v49 }
 0x2be   :  { %v5644_v59 = vcombine.high %v1090_v52, %v1094_v53  ;;  %v5643_v2 = vcombine.low %v1090_v52, %v1094_v53  ;;  %v1142_v43 = vld [vmem:[#allocation7 + $0xc78] sm:$0xff]  ;;  %v1145_v53 = vld [vmem:[#allocation7 + $0xc90] sm:$0xff] }
 0x2bf   :  { %4276 = vmatpush1.bf16.msra.mxu0 %v5585_v60  ;;  %v1097_v60 = vld [vmem:[#allocation7 + $0xb10] sm:$0xff] }
 0x2c0   :  { %4440 = vmatpush1.bf16.msra.mxu1 %v5587_v61  ;;  %4277 = vmatprep.subr.bf16.mxu0 %v5594_v62  ;;  %v1101_v61 = vld [vmem:[#allocation7 + $0xb30] sm:$0xff]  ;;  %v1098_v62 = vld [vmem:[#allocation7 + $0xb18] sm:$0xff] }
 0x2c1   :  { %4441 = vmatprep.subr.bf16.mxu1 %v5596_v63  ;;  %v1102_v63 = vld [vmem:[#allocation7 + $0xb38] sm:$0xff]  ;;  %v5650_v10 = vcombine.high %v1097_v60, %v1101_v61  ;;  %v5649_v8 = vcombine.low %v1097_v60, %v1101_v61 }
 0x2c2   :  { %v5652_v3 = vcombine.high %v1098_v62, %v1102_v63  ;;  %v5651_v57 = vcombine.low %v1098_v62, %v1102_v63 }
 0x2c3   :  { %4278 = vmatpush1.bf16.msra.mxu0 %v5593_v4  ;;  %v1105_v4 = vld [vmem:[#allocation7 + $0xb50] sm:$0xff] }
 0x2c4   :  { %4442 = vmatpush1.bf16.msra.mxu1 %v5595_v51  ;;  %4279 = vmatprep.subr.bf16.mxu0 %v5602_v6  ;;  %v1109_v51 = vld [vmem:[#allocation7 + $0xb70] sm:$0xff]  ;;  %v1106_v6 = vld [vmem:[#allocation7 + $0xb58] sm:$0xff] }
 0x2c5   :  { %4443 = vmatprep.subr.bf16.mxu1 %v5604_v31  ;;  %v1110_v31 = vld [vmem:[#allocation7 + $0xb78] sm:$0xff]  ;;  %v5658_v9 = vcombine.high %v1105_v4, %v1109_v51  ;;  %v5657_v16 = vcombine.low %v1105_v4, %v1109_v51 }
 0x2c6   :  { %v5660_v11 = vcombine.high %v1106_v6, %v1110_v31  ;;  %v5659_v18 = vcombine.low %v1106_v6, %v1110_v31  ;;  %v1161_v31 = vld [vmem:[#allocation7 + $0xd10] sm:$0xff] }
 0x2c7   :  { %4280 = vmatpush1.bf16.msra.mxu0 %v5601_v7  ;;  %v1113_v7 = vld [vmem:[#allocation7 + $0xb90] sm:$0xff] }
 0x2c8   :  { %4444 = vmatpush1.bf16.msra.mxu1 %v5603_v12  ;;  %4281 = vmatprep.subr.bf16.mxu0 %v5610_v13  ;;  %v1117_v12 = vld [vmem:[#allocation7 + $0xbb0] sm:$0xff]  ;;  %v1114_v13 = vld [vmem:[#allocation7 + $0xb98] sm:$0xff] }
 0x2c9   :  { %4445 = vmatprep.subr.bf16.mxu1 %v5612_v15  ;;  %v1118_v15 = vld [vmem:[#allocation7 + $0xbb8] sm:$0xff]  ;;  %v5666_v14 = vcombine.high %v1113_v7, %v1117_v12  ;;  %v5665_v26 = vcombine.low %v1113_v7, %v1117_v12 }
 0x2ca   :  { %v5668_v21 = vcombine.high %v1114_v13, %v1118_v15  ;;  %v5667_v27 = vcombine.low %v1114_v13, %v1118_v15  ;;  %v1169_v13 = vld [vmem:[#allocation7 + $0xd50] sm:$0xff] }
 0x2cb   :  { %4282 = vmatpush1.bf16.msra.mxu0 %v5609_v22  ;;  %v1121_v22 = vld [vmem:[#allocation7 + $0xbd0] sm:$0xff] }
 0x2cc   :  { %4446 = vmatpush1.bf16.msra.mxu1 %v5611_v23  ;;  %4283 = vmatprep.subr.bf16.mxu0 %v5618_v55  ;;  %v1125_v23 = vld [vmem:[#allocation7 + $0xbf0] sm:$0xff]  ;;  %v1122_v55 = vld [vmem:[#allocation7 + $0xbd8] sm:$0xff] }
 0x2cd   :  { %4447 = vmatprep.subr.bf16.mxu1 %v5620_v24  ;;  %v1126_v24 = vld [vmem:[#allocation7 + $0xbf8] sm:$0xff]  ;;  %v5674_v29 = vcombine.high %v1121_v22, %v1125_v23  ;;  %v5673_v37 = vcombine.low %v1121_v22, %v1125_v23  ;;  %v1173_v15 = vld [vmem:[#allocation7 + $0xd70] sm:$0xff] }
 0x2ce   :  { %v5676_v34 = vcombine.high %v1122_v55, %v1126_v24  ;;  %v5675_v33 = vcombine.low %v1122_v55, %v1126_v24  ;;  %v5722_v22 = vcombine.high %v1169_v13, %v1173_v15  ;;  %v1177_v55 = vld [vmem:[#allocation7 + $0xd90] sm:$0xff] }
 0x2cf   :  { %4284 = vmatpush1.bf16.msra.mxu0 %v5617_v50  ;;  %v1129_v50 = vld [vmem:[#allocation7 + $0xc10] sm:$0xff] }
 0x2d0   :  { %4448 = vmatpush1.bf16.msra.mxu1 %v5619_v58  ;;  %4285 = vmatprep.subr.bf16.mxu0 %v5626_v35  ;;  %v1133_v58 = vld [vmem:[#allocation7 + $0xc30] sm:$0xff]  ;;  %v1130_v35 = vld [vmem:[#allocation7 + $0xc18] sm:$0xff] }
 0x2d1   :  { %4449 = vmatprep.subr.bf16.mxu1 %v5628_v36  ;;  %v1134_v36 = vld [vmem:[#allocation7 + $0xc38] sm:$0xff]  ;;  %v5682_v40 = vcombine.high %v1129_v50, %v1133_v58  ;;  %v1181_v24 = vld [vmem:[#allocation7 + $0xdb0] sm:$0xff] }
 0x2d2   :  { %v5684_v41 = vcombine.high %v1130_v35, %v1134_v36  ;;  %v5683_v49 = vcombine.low %v1130_v35, %v1134_v36 }
 0x2d3   :  { %4286 = vmatpush1.bf16.msra.mxu0 %v5625_v44  ;;  %v1137_v44 = vld [vmem:[#allocation7 + $0xc50] sm:$0xff] }
 0x2d4   :  { %4450 = vmatpush1.bf16.msra.mxu1 %v5627_v45  ;;  %4287 = vmatprep.subr.bf16.mxu0 %v5634_v46  ;;  %v1141_v45 = vld [vmem:[#allocation7 + $0xc70] sm:$0xff]  ;;  %v5681_v46 = vcombine.low %v1129_v50, %v1133_v58  ;;  %v5730_v50 = vcombine.high %v1177_v55, %v1181_v24 }
 0x2d5   :  { %4451 = vmatprep.subr.bf16.mxu1 %v5636_v48  ;;  %v1138_v48 = vld [vmem:[#allocation7 + $0xc58] sm:$0xff]  ;;  %v5690_v52 = vcombine.high %v1137_v44, %v1141_v45  ;;  %v5689_v60 = vcombine.low %v1137_v44, %v1141_v45 }
 0x2d6   :  { %v5691_v61 = vcombine.low %v1138_v48, %v1142_v43  ;;  %v1186_v44 = vld [vmem:[#allocation7 + $0xdd8] sm:$0xff] }
 0x2d7   :  { %4288 = vmatpush1.bf16.msra.mxu0 %v5633_v54  ;;  %v1149_v54 = vld [vmem:[#allocation7 + $0xcb0] sm:$0xff]  ;;  %v1190_v45 = vld [vmem:[#allocation7 + $0xdf8] sm:$0xff] }
 0x2d8   :  { %4452 = vmatpush1.bf16.msra.mxu1 %v5635_v56  ;;  %4289 = vmatprep.subr.bf16.mxu0 %v5642_v19  ;;  %v5692_v56 = vcombine.high %v1138_v48, %v1142_v43  ;;  %v1146_v19 = vld [vmem:[#allocation7 + $0xc98] sm:$0xff]  ;;  %v5698_v62 = vcombine.high %v1145_v53, %v1149_v54  ;;  %v5697_v4 = vcombine.low %v1145_v53, %v1149_v54 }
 0x2d9   :  { %4453 = vmatprep.subr.bf16.mxu1 %v5644_v59  ;;  %v1150_v59 = vld [vmem:[#allocation7 + $0xcb8] sm:$0xff]  ;;  %v5729_v43 = vcombine.low %v1177_v55, %v1181_v24 }
 0x2da   :  { %v5700_v63 = vcombine.high %v1146_v19, %v1150_v59 }
 0x2db   :  { %4290 = vmatpush1.bf16.msra.mxu0 %v5641_v1  ;;  %v1153_v1 = vld [vmem:[#allocation7 + $0xcd0] sm:$0xff] }
 0x2dc   :  { %4454 = vmatpush1.bf16.msra.mxu1 %v5643_v2  ;;  %4291 = vmatprep.subr.bf16.mxu0 %v5650_v10  ;;  %v1157_v2 = vld [vmem:[#allocation7 + $0xcf0] sm:$0xff]  ;;  %v1154_v10 = vld [vmem:[#allocation7 + $0xcd8] sm:$0xff] }
 0x2dd   :  { %4455 = vmatprep.subr.bf16.mxu1 %v5652_v3  ;;  %v1158_v3 = vld [vmem:[#allocation7 + $0xcf8] sm:$0xff]  ;;  %v5706_v51 = vcombine.high %v1153_v1, %v1157_v2 }
 0x2de   :  { %v5708_v6 = vcombine.high %v1154_v10, %v1158_v3 }
 0x2df   :  { %4292 = vmatpush1.bf16.msra.mxu0 %v5649_v8  ;;  %v1165_v8 = vld [vmem:[#allocation7 + $0xd30] sm:$0xff] }
 0x2e0   :  { %4456 = vmatpush1.bf16.msra.mxu1 %v5651_v57  ;;  %4293 = vmatprep.subr.bf16.mxu0 %v5658_v9  ;;  %v1162_v57 = vld [vmem:[#allocation7 + $0xd18] sm:$0xff]  ;;  %v5714_v7 = vcombine.high %v1161_v31, %v1165_v8 }
 0x2e1   :  { %4457 = vmatprep.subr.bf16.mxu1 %v5660_v11  ;;  %v1166_v9 = vld [vmem:[#allocation7 + $0xd38] sm:$0xff]  ;;  %v5707_v11 = vcombine.low %v1154_v10, %v1158_v3  ;;  %v1201_v10 = vld [vmem:[#allocation7 + $0xe50] sm:$0xff] }
 0x2e2   :  { %v5716_v12 = vcombine.high %v1162_v57, %v1166_v9  ;;  %v1205_v3 = vld [vmem:[#allocation7 + $0xe70] sm:$0xff] }
 0x2e3   :  { %4294 = vmatpush1.bf16.msra.mxu0 %v5657_v16  ;;  %v1170_v16 = vld [vmem:[#allocation7 + $0xd58] sm:$0xff] }
 0x2e4   :  { %4458 = vmatpush1.bf16.msra.mxu1 %v5659_v18  ;;  %4295 = vmatprep.subr.bf16.mxu0 %v5666_v14  ;;  %v1174_v18 = vld [vmem:[#allocation7 + $0xd78] sm:$0xff]  ;;  %v5713_v14 = vcombine.low %v1161_v31, %v1165_v8  ;;  %v5754_v31 = vcombine.high %v1201_v10, %v1205_v3 }
 0x2e5   :  { %4459 = vmatprep.subr.bf16.mxu1 %v5668_v21  ;;  %v5715_v21 = vcombine.low %v1162_v57, %v1166_v9  ;;  %v5724_v23 = vcombine.high %v1170_v16, %v1174_v18  ;;  %v1209_v57 = vld [vmem:[#allocation7 + $0xe90] sm:$0xff] }
 0x2e6   :  { %v1213_v9 = vld [vmem:[#allocation7 + $0xeb0] sm:$0xff] }
 0x2e7   :  { %4296 = vmatpush1.bf16.msra.mxu0 %v5665_v26  ;;  %v1178_v26 = vld [vmem:[#allocation7 + $0xd98] sm:$0xff] }
 0x2e8   :  { %4460 = vmatpush1.bf16.msra.mxu1 %v5667_v27  ;;  %4297 = vmatprep.subr.bf16.mxu0 %v5674_v29  ;;  %v1182_v27 = vld [vmem:[#allocation7 + $0xdb8] sm:$0xff]  ;;  %v5721_v29 = vcombine.low %v1169_v13, %v1173_v15  ;;  %v5762_v13 = vcombine.high %v1209_v57, %v1213_v9 }
 0x2e9   :  { %4461 = vmatprep.subr.bf16.mxu1 %v5676_v34  ;;  %v5723_v34 = vcombine.low %v1170_v16, %v1174_v18  ;;  %v5732_v36 = vcombine.high %v1178_v26, %v1182_v27  ;;  %v5731_v53 = vcombine.low %v1178_v26, %v1182_v27  ;;  %v1217_v16 = vld [vmem:[#allocation7 + $0xed0] sm:$0xff] }
 0x2ea   :  { %v1221_v18 = vld [vmem:[#allocation7 + $0xef0] sm:$0xff] }
 0x2eb   :  { %4298 = vmatpush1.bf16.msra.mxu0 %v5673_v37  ;;  %v1185_v37 = vld [vmem:[#allocation7 + $0xdd0] sm:$0xff]  ;;  %v5770_v55 = vcombine.high %v1217_v16, %v1221_v18 }
 0x2ec   :  { %4462 = vmatpush1.bf16.msra.mxu1 %v5675_v33  ;;  %4308 = vmatprep.subr.bf16.mxu0 %v5682_v40  ;;  %v1189_v33 = vld [vmem:[#allocation7 + $0xdf0] sm:$0xff] }
 0x2ed   :  { %4472 = vmatprep.subr.bf16.mxu1 %v5684_v41  ;;  %v5738_v54 = vcombine.high %v1185_v37, %v1189_v33  ;;  %v1225_v26 = vld [vmem:[#allocation7 + $0xf10] sm:$0xff] }
 0x2ee   :  { %4300 = vmatmul.mubr.bf16.vlgmr.msra.gmra.mrb[12].mxu0 %v6474_v17  ;;  %v1229_v27 = vld [vmem:[#allocation7 + $0xf30] sm:$0xff] }
 0x2ef   :  { %4464 = vmatmul.mubr.bf16.vlgmr.msra.gmra.mrb[12].mxu1 %v6474_v17  ;;  %4309 = vmatpush1.bf16.msra.mxu0 %v5681_v46  ;;  %v5699_v17 = vcombine.low %v1146_v19, %v1150_v59  ;;  %v1193_v19 = vld [vmem:[#allocation7 + $0xe10] sm:$0xff] }
 0x2f0   :  { %4340 = vmatprep.mubr.bf16.mxu0 %v6476_v25  ;;  %4473 = vmatpush1.bf16.msra.mxu1 %v5683_v49  ;;  %v1197_v59 = vld [vmem:[#allocation7 + $0xe30] sm:$0xff] }
 0x2f1   :  { %4504 = vmatprep.mubr.bf16.mxu1 %v6476_v25  ;;  %4310 = vmatprep.subr.bf16.mxu0 %v5690_v52  ;;  %v5705_v25 = vcombine.low %v1153_v1, %v1157_v2  ;;  %v5746_v1 = vcombine.high %v1193_v19, %v1197_v59 }
 0x2f2   :  { %4474 = vmatprep.subr.bf16.mxu1 %v5692_v56  ;;  %v5740_v56 = vcombine.high %v1186_v44, %v1190_v45 }
 0x2f3   :  { %4311 = vmatpush1.bf16.msra.mxu0 %v5689_v60  ;;  %v1194_v60 = vld [vmem:[#allocation7 + $0xe18] sm:$0xff] }
 0x2f4   :  { %4475 = vmatpush1.bf16.msra.mxu1 %v5691_v61  ;;  %4312 = vmatprep.subr.bf16.mxu0 %v5698_v62  ;;  %v1198_v61 = vld [vmem:[#allocation7 + $0xe38] sm:$0xff]  ;;  %v5737_v62 = vcombine.low %v1185_v37, %v1189_v33  ;;  %v5778_v37 = vcombine.high %v1225_v26, %v1229_v27 }
 0x2f5   :  { %4476 = vmatprep.subr.bf16.mxu1 %v5700_v63  ;;  %v5739_v63 = vcombine.low %v1186_v44, %v1190_v45  ;;  %v5748_v2 = vcombine.high %v1194_v60, %v1198_v61  ;;  %v1233_v44 = vld [vmem:[#allocation7 + $0xf50] sm:$0xff] }
 0x2f6   :  { %v1237_v45 = vld [vmem:[#allocation7 + $0xf70] sm:$0xff] }
 0x2f7   :  { %4313 = vmatpush1.bf16.msra.mxu0 %v5697_v4  ;;  %v1202_v4 = vld [vmem:[#allocation7 + $0xe58] sm:$0xff] }
 0x2f8   :  { %4477 = vmatpush1.bf16.msra.mxu1 %v5699_v17  ;;  %4314 = vmatprep.subr.bf16.mxu0 %v5706_v51  ;;  %v1206_v17 = vld [vmem:[#allocation7 + $0xe78] sm:$0xff]  ;;  %v5745_v51 = vcombine.low %v1193_v19, %v1197_v59 }
 0x2f9   :  { %4478 = vmatprep.subr.bf16.mxu1 %v5708_v6  ;;  %v5747_v6 = vcombine.low %v1194_v60, %v1198_v61  ;;  %v5756_v8 = vcombine.high %v1202_v4, %v1206_v17  ;;  %v1242_v19 = vld [vmem:[#allocation7 + $0xf98] sm:$0xff]  ;;  %v6512_v60 = vld [vmem:[#allocation8] sm:$0xff]  ;;  %v5785_v61 = vcombine.low %v1233_v44, %v1237_v45 }
 0x2fa   :  { %v1246_v59 = vld [vmem:[#allocation7 + $0xfb8] sm:$0xff] }
 0x2fb   :  { %4315 = vmatpush1.bf16.msra.mxu0 %v5705_v25  ;;  %v1210_v25 = vld [vmem:[#allocation7 + $0xe98] sm:$0xff] }
 0x2fc   :  { %4479 = vmatpush1.bf16.msra.mxu1 %v5707_v11  ;;  %4316 = vmatprep.subr.bf16.mxu0 %v5714_v7  ;;  %v1214_v11 = vld [vmem:[#allocation7 + $0xeb8] sm:$0xff]  ;;  %v5753_v7 = vcombine.low %v1201_v10, %v1205_v3  ;;  %v1253_v10 = vld [vmem:[#allocation7 + $0xff0] sm:$0xff]  ;;  %v1264_v3 = vrot.slane %v6512_v60, %v180_v32 }
 0x2fd   :  { %4480 = vmatprep.subr.bf16.mxu1 %v5716_v12  ;;  %v5755_v12 = vcombine.low %v1202_v4, %v1206_v17  ;;  %v5764_v15 = vcombine.high %v1210_v25, %v1214_v11  ;;  %v1250_v4 = vld [vmem:[#allocation7 + $0xfd8] sm:$0xff] }
 0x2fe   :  { %v1254_v17 = vld [vmem:[#allocation7 + $0xff8] sm:$0xff] }
 0x2ff   :  { %4317 = vmatpush1.bf16.msra.mxu0 %v5713_v14  ;;  %v1218_v14 = vld [vmem:[#allocation7 + $0xed8] sm:$0xff] }
 0x300   :  { %4481 = vmatpush1.bf16.msra.mxu1 %v5715_v21  ;;  %4318 = vmatprep.subr.bf16.mxu0 %v5722_v22  ;;  %v1222_v21 = vld [vmem:[#allocation7 + $0xef8] sm:$0xff]  ;;  %v5761_v22 = vcombine.low %v1209_v57, %v1213_v9  ;;  %v5804_v57 = vcombine.high %v1250_v4, %v1254_v17 }
 0x301   :  { %v6504_v58 = vpop.f32.mrb[8].mxu0  ;;  %v6506_v35 = vpop.f32.mrb[8].mxu1  ;;  %4482 = vmatprep.subr.bf16.mxu1 %v5724_v23  ;;  %v5763_v23 = vcombine.low %v1210_v25, %v1214_v11  ;;  %v5772_v24 = vcombine.high %v1218_v14, %v1222_v21  ;;  %v5803_v11 = vcombine.low %v1250_v4, %v1254_v17  ;;  %v6063_v4 = vld [vmem:[#allocation10 + $0x180] sm:$0xff]   ;;  %v6064_v17 = vld [vmem:[#allocation10 + $0x148] sm:$0xff]  }
 0x302   :  { %v6508_v40 = vpop.f32.mrb[9].mxu0  ;;  %v6510_v41 = vpop.f32.mrb[9].mxu1 }
 0x303   :  { %v4018_v46 = vpop.f32.mrb[10].mxu0  ;;  %v4182_v48 = vpop.f32.mrb[10].mxu1  ;;  %4319 = vmatpush1.bf16.msra.mxu0 %v5721_v29  ;;  %v1226_v29 = vld [vmem:[#allocation7 + $0xf18] sm:$0xff]  ;;  %v5959_v9 = vadd.f32 %v6508_v40, %v1264_v3 }
 0x304   :  { %4483 = vmatpush1.bf16.msra.mxu1 %v5723_v34  ;;  %v4019_v49 = vpop.f32.mrb[11].mxu0  ;;  %v4183_v52 = vpop.f32.mrb[11].mxu1  ;;  %4320 = vmatprep.subr.bf16.mxu0 %v5730_v50  ;;  %v1230_v34 = vld [vmem:[#allocation7 + $0xf38] sm:$0xff]  ;;  %v5769_v50 = vcombine.low %v1217_v16, %v1221_v18  ;;  %v6031_v16 = vld [vmem:[#allocation10 + $0x80] sm:$0xff]   ;;  %v6032_v18 = vld [vmem:[#allocation10 + $0x48] sm:$0xff]  }
 0x305   :  { %4484 = vmatprep.subr.bf16.mxu1 %v5732_v36  ;;  %v5771_v36 = vcombine.low %v1218_v14, %v1222_v21  ;;  %v5780_v33 = vcombine.high %v1226_v29, %v1230_v34  ;;  %v1234_v46 = vld [vmem:[#allocation7 + $0xf58] sm:$0xff]  ;;  %v5779_v49 = vcombine.low %v1226_v29, %v1230_v34  ;;  %v5786_v52 = vcombine.high %v1233_v44, %v1237_v45  ;;  %v6034_v21 = vld [vmem:[#allocation10 + $0x8] sm:$0xff]   ;;  %v6041_v29 = vld [vmem:[#allocation10 + $0xd8] sm:$0xff]  }
 0x306   :  { %v1238_v48 = vld [vmem:[#allocation7 + $0xf78] sm:$0xff]  ;;  %v6043_v34 = vld [vmem:[#allocation10 + $0x98] sm:$0xff]   ;;  %v6048_v44 = vld [vmem:[#allocation10 + $0x68] sm:$0xff]  }
 0x307   :  { %4321 = vmatpush1.bf16.msra.mxu0 %v5729_v43  ;;  %v5777_v43 = vcombine.low %v1225_v26, %v1229_v27  ;;  %v6039_v26 = vld [vmem:[#allocation10 + $0x90] sm:$0xff]   ;;  %v6040_v27 = vld [vmem:[#allocation10 + $0x58] sm:$0xff]   ;;  %v6049_v45 = vld [vmem:[#allocation10 + $0xe8] sm:$0xff]  }
 0x308   :  { %4485 = vmatpush1.bf16.msra.mxu1 %v5731_v53  ;;  %4322 = vmatprep.subr.bf16.mxu0 %v5738_v54  ;;  %v5788_v53 = vcombine.high %v1234_v46, %v1238_v48  ;;  %v1241_v54 = vld [vmem:[#allocation7 + $0xf90] sm:$0xff] }
 0x309   :  { %4486 = vmatprep.subr.bf16.mxu1 %v5740_v56  ;;  %v1245_v56 = vld [vmem:[#allocation7 + $0xfb0] sm:$0xff] }
 0x30b   :  { %4323 = vmatpush1.bf16.msra.mxu0 %v5737_v62  ;;  %v5787_v62 = vcombine.low %v1234_v46, %v1238_v48  ;;  %v6050_v46 = vld [vmem:[#allocation10 + $0x28] sm:$0xff]   ;;  %v1260_v48 = vrot.slane %v6512_v60, %v176_v30 }
 0x30c   :  { %4487 = vmatpush1.bf16.msra.mxu1 %v5739_v63  ;;  %4324 = vmatprep.subr.bf16.mxu0 %v5746_v1  ;;  %v5794_v63 = vcombine.high %v1241_v54, %v1245_v56  ;;  %v5796_v1 = vcombine.high %v1242_v19, %v1246_v59 }
 0x30d   :  { %4488 = vmatprep.subr.bf16.mxu1 %v5748_v2  ;;  %v1249_v2 = vld [vmem:[#allocation7 + $0xfd0] sm:$0xff] }
 0x30e   :  { %v5801_v32 = vcombine.low %v1249_v2, %v1253_v10 }
 0x30f   :  { %4325 = vmatpush1.bf16.msra.mxu0 %v5745_v51  ;;  %v1272_v51 = vrot.slane %v6512_v60, %v188_v38  ;;  %v6029_v38 = vld [vmem:[#allocation10 + $0xc0] sm:$0xff]  }
 0x310   :  { %4489 = vmatpush1.bf16.msra.mxu1 %v5747_v6  ;;  %4326 = vmatprep.subr.bf16.mxu0 %v5754_v31  ;;  %v5793_v6 = vcombine.low %v1241_v54, %v1245_v56  ;;  %v5795_v31 = vcombine.low %v1242_v19, %v1246_v59  ;;  %v6054_v54 = vld [vmem:[#allocation10 + $0x30] sm:$0xff]   ;;  %v5958_v56 = vadd.f32 %v6504_v58, %v1260_v48  ;;  %v6056_v59 = vld [vmem:[#allocation10 + $0x78] sm:$0xff]   ;;  %v6062_v58 = vld [vmem:[#allocation10 + $0x100] sm:$0xff]  }
 0x311   :  { %4490 = vmatprep.subr.bf16.mxu1 %v5756_v8  ;;  %v5802_v8 = vcombine.high %v1249_v2, %v1253_v10  ;;  %v5961_v25 = vadd.f32 %v6510_v41, %v1272_v51  ;;  %v6033_v41 = vld [vmem:[#allocation10 + $0xc8] sm:$0xff]   ;;  %v6055_v19 = vld [vmem:[#allocation10 + $0xb0] sm:$0xff]   ;;  %v6061_v10 = vld [vmem:[#allocation10 + $0x1c0] sm:$0xff]  }
 0x312   :  { %v6065_v51 = vld [vmem:[#allocation10 + $0x1c8] sm:$0xff]  }
 0x313   :  { %4327 = vmatpush1.bf16.msra.mxu0 %v5753_v7  ;;  %v6028_v7 = vld [vmem:[#allocation10 + $0x40] sm:$0xff]  }
 0x314   :  { %4491 = vmatpush1.bf16.msra.mxu1 %v5755_v12  ;;  %4328 = vmatprep.subr.bf16.mxu0 %v5762_v13  ;;  %v4514_v12 = vmax.f32 %v5959_v9, 0.0  ;;  %v4516_v13 = vmax.f32 %v5961_v25, 0.0  ;;  %v6070_v9 = vld [vmem:[#allocation10 + $0x110] sm:$0xff]  }
 0x315   :  { %4492 = vmatprep.subr.bf16.mxu1 %v5764_v15  ;;  %v6030_v15 = vld [vmem:[#allocation10] sm:$0xff]   ;;  %v6071_v25 = vld [vmem:[#allocation10 + $0x190] sm:$0xff]  }
 0x316   :  { %v4522_v40 = vpack.c.bf16 %v4514_v12, %v4514_v12  ;;  %v4524_v14 = vpack.c.bf16 %v4516_v13, %v4516_v13  ;;  %v6076_v12 = vld [vmem:[#allocation10 + $0x160] sm:$0xff]  }
 0x317   :  { %4329 = vmatpush1.bf16.msra.mxu0 %v5761_v22  ;;  %v6035_v22 = vld [vmem:[#allocation10 + $0x88] sm:$0xff]   ;;  %v6077_v13 = vld [vmem:[#allocation10 + $0x1e0] sm:$0xff]  }
 0x318   :  { %4493 = vmatpush1.bf16.msra.mxu1 %v5763_v23  ;;  %4330 = vmatprep.subr.bf16.mxu0 %v5770_v55  ;;  %v6036_v23 = vld [vmem:[#allocation10 + $0x50] sm:$0xff]  }
 0x319   :  { %4494 = vmatprep.subr.bf16.mxu1 %v5772_v24  ;;  %v6037_v55 = vld [vmem:[#allocation10 + $0xd0] sm:$0xff]  }
 0x31a   :  { %v6038_v24 = vld [vmem:[#allocation10 + $0x10] sm:$0xff]  }
 0x31b   :  { %4331 = vmatpush1.bf16.msra.mxu0 %v5769_v50  ;;  %v6044_v50 = vld [vmem:[#allocation10 + $0x60] sm:$0xff]  }
 0x31c   :  { %4495 = vmatpush1.bf16.msra.mxu1 %v5771_v36  ;;  %4332 = vmatprep.subr.bf16.mxu0 %v5778_v37  ;;  %v6045_v36 = vld [vmem:[#allocation10 + $0xe0] sm:$0xff]  }
 0x31d   :  { %4496 = vmatprep.subr.bf16.mxu1 %v5780_v33  ;;  %v6046_v37 = vld [vmem:[#allocation10 + $0x20] sm:$0xff]  }
 0x31e   :  { %v6047_v33 = vld [vmem:[#allocation10 + $0xa0] sm:$0xff]  }
 0x31f   :  { %4333 = vmatpush1.bf16.msra.mxu0 %v5777_v43  ;;  %v6051_v43 = vld [vmem:[#allocation10 + $0xa8] sm:$0xff]  }
 0x320   :  { %4497 = vmatpush1.bf16.msra.mxu1 %v5779_v49  ;;  %4334 = vmatprep.subr.bf16.mxu0 %v5786_v52  ;;  %v6052_v49 = vld [vmem:[#allocation10 + $0x70] sm:$0xff]   ;;  %v1268_v52 = vrot.slane %v6512_v60, %v184_v47  ;;  %v6059_v47 = vld [vmem:[#allocation10 + $0xb8] sm:$0xff]  }
 0x321   :  { %4498 = vmatprep.subr.bf16.mxu1 %v5788_v53  ;;  %v6053_v53 = vld [vmem:[#allocation10 + $0xf0] sm:$0xff]  }
 0x322   :  { %v5960_v30 = vadd.f32 %v6506_v35, %v1268_v52 }
 0x323   :  { %4335 = vmatpush1.bf16.msra.mxu0 %v5785_v61  ;;  %v6057_v61 = vld [vmem:[#allocation10 + $0xf8] sm:$0xff]  }
 0x324   :  { %4499 = vmatpush1.bf16.msra.mxu1 %v5787_v62  ;;  %4336 = vmatprep.subr.bf16.mxu0 %v5794_v63  ;;  %v6058_v62 = vld [vmem:[#allocation10 + $0x38] sm:$0xff]   ;;  %v4513_v63 = vmax.f32 %v5958_v56, 0.0  ;;  %v4515_v2 = vmax.f32 %v5960_v30, 0.0 }
 0x325   :  { %4500 = vmatprep.subr.bf16.mxu1 %v5796_v1  ;;  %v6060_v1 = vld [vmem:[#allocation10 + $0x140] sm:$0xff]  }
 0x326   :  { %v4521_v3 = vpack.c.bf16 %v4513_v63, %v4513_v63  ;;  %v4523_v35 = vpack.c.bf16 %v4515_v2, %v4515_v2 }
 0x327   :  { %4337 = vmatpush1.bf16.msra.mxu0 %v5793_v6  ;;  %v6066_v6 = vld [vmem:[#allocation10 + $0x108] sm:$0xff]  }
 0x328   :  { %4501 = vmatpush1.bf16.msra.mxu1 %v5795_v31  ;;  %4338 = vmatprep.subr.bf16.mxu0 %v5802_v8  ;;  %v6067_v31 = vld [vmem:[#allocation10 + $0x188] sm:$0xff]   ;;  %v6068_v8 = vld [vmem:[#allocation10 + $0x150] sm:$0xff]  }
 0x329   :  { %4502 = vmatprep.subr.bf16.mxu1 %v5804_v57  ;;  %v6069_v57 = vld [vmem:[#allocation10 + $0x1d0] sm:$0xff]  }
 0x32b   :  { %4339 = vmatpush1.bf16.msra.mxu0 %v5801_v32  ;;  %v6072_v32 = vld [vmem:[#allocation10 + $0x158] sm:$0xff]  }
 0x32c   :  { %4503 = vmatpush1.bf16.msra.mxu1 %v5803_v11  ;;  %5870 = vmatprep.subr.bf16.mxu0 %v6028_v7  ;;  %v6073_v11 = vld [vmem:[#allocation10 + $0x1d8] sm:$0xff]  }
 0x32d   :  { %5892 = vmatprep.subr.bf16.mxu1 %v6029_v38  ;;  %v6074_v7 = vld [vmem:[#allocation10 + $0x118] sm:$0xff]  }
 0x32e   :  { %4341 = vmatmul.mubr.bf16.vlgmr.msra.gmra.mrb[12].mxu0 %v6486_v5  ;;  %v6075_v38 = vld [vmem:[#allocation10 + $0x198] sm:$0xff]  }
 0x32f   :  { %4505 = vmatmul.mubr.bf16.vlgmr.msra.gmra.mrb[12].mxu1 %v6486_v5  ;;  %5871 = vmatpush3.bf16.msra.mxu0 %v6030_v15  ;;  %v6042_v5 = vld [vmem:[#allocation10 + $0x18] sm:$0xff]   ;;  %v6078_v15 = vld [vmem:[#allocation10 + $0x120] sm:$0xff]  }
 0x330   :  { %5080 = vmatprep.mubr.bf16.mxu0 %v4522_v40  ;;  %5893 = vmatpush3.bf16.msra.mxu1 %v6031_v16  ;;  %v6079_v16 = vld [vmem:[#allocation10 + $0x1a0] sm:$0xff]   ;;  %v6081_v40 = vld [vmem:[#allocation10 + $0x1e8] sm:$0xff]  }
 0x331   :  { %5120 = vmatprep.mubr.bf16.mxu1 %v4524_v14  ;;  %5872 = vmatprep.subr.bf16.mxu0 %v6032_v18  ;;  %v6080_v18 = vld [vmem:[#allocation10 + $0x168] sm:$0xff]  }
 0x332   :  { %5894 = vmatprep.subr.bf16.mxu1 %v6033_v41  ;;  %v6082_v41 = vld [vmem:[#allocation10 + $0x128] sm:$0xff]  }
 0x333   :  { %5873 = vmatpush3.bf16.msra.mxu0 %v6034_v21  ;;  %v6083_v14 = vld [vmem:[#allocation10 + $0x1a8] sm:$0xff]   ;;  %v6084_v21 = vld [vmem:[#allocation10 + $0x170] sm:$0xff]  }
 0x334   :  { %5895 = vmatpush3.bf16.msra.mxu1 %v6035_v22  ;;  %5874 = vmatprep.subr.bf16.mxu0 %v6036_v23  ;;  %v6085_v22 = vld [vmem:[#allocation10 + $0x1f0] sm:$0xff]  }
 0x335   :  { %5896 = vmatprep.subr.bf16.mxu1 %v6037_v55  ;;  %v6086_v23 = vld [vmem:[#allocation10 + $0x130] sm:$0xff]  }
 0x336   :  { %v6087_v55 = vld [vmem:[#allocation10 + $0x1b0] sm:$0xff]  }
 0x337   :  { %5875 = vmatpush3.bf16.msra.mxu0 %v6038_v24  ;;  %v6088_v24 = vld [vmem:[#allocation10 + $0x178] sm:$0xff]  }
 0x338   :  { %5897 = vmatpush3.bf16.msra.mxu1 %v6039_v26  ;;  %5876 = vmatprep.subr.bf16.mxu0 %v6040_v27  ;;  %v6089_v26 = vld [vmem:[#allocation10 + $0x1f8] sm:$0xff]  }
 0x339   :  { %5898 = vmatprep.subr.bf16.mxu1 %v6041_v29  ;;  %v6090_v27 = vld [vmem:[#allocation10 + $0x138] sm:$0xff]  }
 0x33a   :  { %v6091_v29 = vld [vmem:[#allocation10 + $0x1b8] sm:$0xff]  }
 0x33b   :  { %5877 = vmatpush3.bf16.msra.mxu0 %v6042_v5  ;;  %v1276_v5 = vrot.slane %v6512_v60, %v192_v28 }
 0x33c   :  { %5899 = vmatpush3.bf16.msra.mxu1 %v6043_v34  ;;  %5878 = vmatprep.subr.bf16.mxu0 %v6044_v50  ;;  %v1284_v34 = vrot.slane %v6512_v60, %v200_v20  ;;  %v1280_v50 = vrot.slane %v6512_v60, %v196_v0 }
 0x33d   :  { %5900 = vmatprep.subr.bf16.mxu1 %v6045_v36  ;;  %v1288_v36 = vrot.slane %v6512_v60, %v204_v42 }
 0x33f   :  { %5879 = vmatpush3.bf16.msra.mxu0 %v6046_v37 }
 0x340   :  { %5901 = vmatpush3.bf16.msra.mxu1 %v6047_v33  ;;  %5880 = vmatprep.subr.bf16.mxu0 %v6048_v44 }
 0x341   :  { %5902 = vmatprep.subr.bf16.mxu1 %v6049_v45 }
 0x343   :  { %5881 = vmatpush3.bf16.msra.mxu0 %v6050_v46 }
 0x344   :  { %5903 = vmatpush3.bf16.msra.mxu1 %v6051_v43  ;;  %5882 = vmatprep.subr.bf16.mxu0 %v6052_v49 }
 0x345   :  { %5904 = vmatprep.subr.bf16.mxu1 %v6053_v53 }
 0x347   :  { %5883 = vmatpush3.bf16.msra.mxu0 %v6054_v54 }
 0x348   :  { %5905 = vmatpush3.bf16.msra.mxu1 %v6055_v19  ;;  %5884 = vmatprep.subr.bf16.mxu0 %v6056_v59 }
 0x349   :  { %5906 = vmatprep.subr.bf16.mxu1 %v6057_v61 }
 0x34b   :  { %5885 = vmatpush3.bf16.msra.mxu0 %v6058_v62  ;;  %v5805_v62 = vld [vmem:[#allocation11] ss:$0 sm:$0xff] }
 0x34c   :  { %5907 = vmatpush3.bf16.msra.mxu1 %v6059_v47  ;;  %5914 = vmatprep.subr.bf16.mxu0 %v6060_v1 }
 0x34d   :  { %5936 = vmatprep.subr.bf16.mxu1 %v6061_v10 }
 0x34e   :  { %5081 = vmatmul.mubr.bf16.vlgmr.msra.gmra.mrb[16].mxu0 %v4521_v3 }
 0x34f   :  { %5121 = vmatmul.mubr.bf16.vlgmr.msra.gmra.mrb[16].mxu1 %v4523_v35  ;;  %5915 = vmatpush3.bf16.msra.mxu0 %v6062_v58 }
 0x350   :  { %5937 = vmatpush3.bf16.msra.mxu1 %v6063_v4  ;;  %5916 = vmatprep.subr.bf16.mxu0 %v6064_v17 }
 0x351   :  { %5938 = vmatprep.subr.bf16.mxu1 %v6065_v51 }
 0x353   :  { %5917 = vmatpush3.bf16.msra.mxu0 %v6066_v6 }
 0x354   :  { %5939 = vmatpush3.bf16.msra.mxu1 %v6067_v31  ;;  %5918 = vmatprep.subr.bf16.mxu0 %v6068_v8 }
 0x355   :  { %5940 = vmatprep.subr.bf16.mxu1 %v6069_v57 }
 0x357   :  { %5919 = vmatpush3.bf16.msra.mxu0 %v6070_v9 }
 0x358   :  { %5941 = vmatpush3.bf16.msra.mxu1 %v6071_v25  ;;  %5920 = vmatprep.subr.bf16.mxu0 %v6072_v32 }
 0x359   :  { %5942 = vmatprep.subr.bf16.mxu1 %v6073_v11 }
 0x35b   :  { %5921 = vmatpush3.bf16.msra.mxu0 %v6074_v7 }
 0x35c   :  { %5943 = vmatpush3.bf16.msra.mxu1 %v6075_v38  ;;  %5922 = vmatprep.subr.bf16.mxu0 %v6076_v12 }
 0x35d   :  { %5944 = vmatprep.subr.bf16.mxu1 %v6077_v13 }
 0x35f   :  { %5923 = vmatpush3.bf16.msra.mxu0 %v6078_v15 }
 0x360   :  { %5945 = vmatpush3.bf16.msra.mxu1 %v6079_v16  ;;  %5924 = vmatprep.subr.bf16.mxu0 %v6080_v18 }
 0x361   :  { %5946 = vmatprep.subr.bf16.mxu1 %v6081_v40 }
 0x363   :  { %5925 = vmatpush3.bf16.msra.mxu0 %v6082_v41 }
 0x364   :  { %5947 = vmatpush3.bf16.msra.mxu1 %v6083_v14  ;;  %5926 = vmatprep.subr.bf16.mxu0 %v6084_v21 }
 0x365   :  { %5948 = vmatprep.subr.bf16.mxu1 %v6085_v22 }
 0x367   :  { %5927 = vmatpush3.bf16.msra.mxu0 %v6086_v23 }
 0x368   :  { %5949 = vmatpush3.bf16.msra.mxu1 %v6087_v55  ;;  %5928 = vmatprep.subr.bf16.mxu0 %v6088_v24 }
 0x369   :  { %5950 = vmatprep.subr.bf16.mxu1 %v6089_v26 }
 0x36b   :  { %5929 = vmatpush3.bf16.msra.mxu0 %v6090_v27 }
 0x36c   :  { %5951 = vmatpush3.bf16.msra.mxu1 %v6091_v29 }
 0x401   :  { %v4342_v37 = vpop.f32.mrb[12].mxu0 }
 0x402   :  { %v5962_v33 = vadd.f32 %v4342_v37, %v1276_v5  ;;  %v4506_v44 = vpop.f32.mrb[12].mxu1  ;;  %v4344_v45 = vpop.f32.mrb[13].mxu0 }
 0x403   :  { %v5964_v46 = vadd.f32 %v4506_v44, %v1284_v34  ;;  %v5963_v48 = vadd.f32 %v4344_v45, %v1280_v50  ;;  %v4508_v43 = vpop.f32.mrb[13].mxu1  ;;  %v4346_v28 = vpop.f32.mrb[14].mxu0 }
 0x404   :  { %v4517_v49 = vmax.f32 %v5962_v33, 0.0  ;;  %v5965_v52 = vadd.f32 %v4508_v43, %v1288_v36  ;;  %v4510_v53 = vpop.f32.mrb[14].mxu1  ;;  %v4347_v20 = vpop.f32.mrb[15].mxu0 }
 0x405   :  { %v4519_v54 = vmax.f32 %v5964_v46, 0.0  ;;  %v4518_v56 = vmax.f32 %v5963_v48, 0.0  ;;  %v4511_v19 = vpop.f32.mrb[15].mxu1 }
 0x406   :  { %v4520_v0 = vmax.f32 %v5965_v52, 0.0  ;;  %v4525_v39 = vpack.c.bf16 %v4517_v49, %v4517_v49 }
 0x407   :  { %v4526_v59 = vpack.c.bf16 %v4518_v56, %v4518_v56  ;;  %v4527_v42 = vpack.c.bf16 %v4519_v54, %v4519_v54 }
 0x408   :  { %v4528_v30 = vpack.c.bf16 %v4520_v0, %v4520_v0 }
 0x409   :  { %5160 = vmatprep.mubr.bf16.mxu0 %v4526_v59 }
 0x40a   :  { %5200 = vmatprep.mubr.bf16.mxu1 %v4528_v30  ;;  %5161 = vmatmul.mubr.bf16.vlgmr.msra.gmra.mrb[20].mxu0 %v4525_v39 }
 0x40b   :  { %5201 = vmatmul.mubr.bf16.vlgmr.msra.gmra.mrb[20].mxu1 %v4527_v42 }
 0x421   :  { %v5886_v60 = vpop.f32.mrb[16].mxu0 }
 0x422   :  { %v5908_v61 = vpop.f32.mrb[16].mxu1  ;;  %v5887_v63 = vpop.f32.mrb[17].mxu0 }
 0x423   :  { %v5888_v47 = vadd.f32 %v5887_v63, %v5886_v60  ;;  %v5909_v1 = vpop.f32.mrb[17].mxu1  ;;  %v5889_v2 = vpop.f32.mrb[18].mxu0 }
 0x424   :  { %v5910_v10 = vadd.f32 %v5909_v1, %v5908_v61  ;;  %v5911_v58 = vpop.f32.mrb[18].mxu1  ;;  %v5890_v3 = vpop.f32.mrb[19].mxu0 }
 0x425   :  { %v5083_v4 = vadd.f32 %v5888_v47, %v5805_v62  ;;  %v5912_v17 = vpop.f32.mrb[19].mxu1 }
 0x427   :  { %v5123_v35 = vadd.f32 %v5910_v10, %v5083_v4 }
 0x4dd   :  { %v5930_v51 = vpop.f32.mrb[20].mxu0 }
 0x4de   :  { %v5952_v6 = vpop.f32.mrb[20].mxu1  ;;  %v5931_v31 = vpop.f32.mrb[21].mxu0 }
 0x4df   :  { %v5932_v8 = vadd.f32 %v5931_v31, %v5930_v51  ;;  %v5953_v57 = vpop.f32.mrb[21].mxu1  ;;  %v5933_v9 = vpop.f32.mrb[22].mxu0 }
 0x4e0   :  { %v5954_v25 = vadd.f32 %v5953_v57, %v5952_v6  ;;  %v5955_v32 = vpop.f32.mrb[22].mxu1  ;;  %v5934_v11 = vpop.f32.mrb[23].mxu0 }
 0x4e1   :  { %v5163_v7 = vadd.f32 %v5932_v8, %v5123_v35  ;;  %v5956_v38 = vpop.f32.mrb[23].mxu1 }
 0x4e3   :  { %v5203_v12 = vadd.f32 %v5954_v25, %v5163_v7 }
 0x4e5   :  { %5208 = vst [vmem:[#allocation13] sm:$0xff] %v5203_v12 }
 0x4e6   :  { %5213 = vsyncadd [#allocation4], 96  ;;  %s6269_s0 = smov [#allocation13]  }
 0x4e7   :  { %s5214_s9 = sshll.u32 %s6269_s0, 4  ;;  %s5215_s9 = int_to_ptr.vmem [resolvable:$true] %s5214_s9 }
 0x4e8   :  { %s6225_s10 = scalar_lea.vmem %s5215_s9, 32  ;;  %s6229_s11 = scalar_lea.vmem %s5215_s9, 128 }
 0x4e9   :  { %p6226_p6 = scmp.ne.s32.totalorder %s5215_s9, %s6225_s10  ;;  %p6230_p7 = scmp.lt.s32.totalorder %s5215_s9, %s5215_s9 }
 0x4ea   :  { %p6231_p8 = scmp.lt.s32.totalorder %s6229_s11, %s6225_s10 }
 0x4ec   :  { %p6232_p9 = por %p6231_p8, %p6230_p7 }
 0x4ee   :  { %p6233_p10 = pnand %p6232_p9, %p6226_p6 }
 0x4f0   :  { %6236 = shalt.err (!%p6233_p10)
}
 0x4f1   :  { %s6237_s12 = scalar_lea.hbm %s6565_s7, 32 }
 0x4f2   :  { %p6238_p11 = scmp.ne.s32.totalorder %s6565_s7, %s6237_s12  ;;  %p6241_p12 = scmp.lt.u32.totalorder %s6237_s12, %s6565_s7 }
 0x4f4   :  { %p6243_p13 = pnand %p6241_p12, %p6238_p11 }
 0x4f6   :  { %6246 = shalt.err (!%p6243_p13)
}
 0x4f7   :  { %s6270_s18 = smov 2  }
 0x4f8   :  { %5220 = dma.vmem_to_hbm [thread:$0]  %s5215_s9, 32, %s6565_s7, [#allocation4], %s6261_s27, %s6261_s27, %s6270_s18  }
 0x4f9   :  { %6255 = dma.done.wait [#allocation4], 128  }
 0x4fa   :  { %6256 = vsyncadd [#allocation4], 4294967168 }
 0x4fb   :  { %5224 = vsyncpa [#allocation3], 1 }
 0x4fc   :  { %5225 = vsyncpa [#allocation6], 1 }
 0x4fd   :  { %5226 = vsyncpa [#allocation9], 1 }
 0x4fe   :  { %5227 = vsyncpa [#allocation12], 1 }
 0x4ff   :  { %5228 = vsyncpa [#allocation4], 1 }

</bundles_post_ra>
